<compile_context>
chip_gen: v7x
topology: tpu7x:2x2x1
jax: 0.10.0
libtpu: 0.0.40
codegen_flags: <defaults>
</compile_context>

<pallas_src>
import functools

import numpy as np
import jax
import jax.numpy as jnp
from jax import lax
from jax.experimental import pallas as pl
from jax.experimental.pallas import tpu as pltpu


# --------------------------------------------------------------------------------------
# Host-side construction of the (tiny, deterministic) filter / interpolation matrices
# --------------------------------------------------------------------------------------
def _haar_mats(n):
    """Haar analysis matrices (n//2, n): lo[i]=(x[2i]+x[2i+1])/sqrt2, hi=(x[2i]-x[2i+1])/sqrt2."""
    s = 1.0 / np.sqrt(2.0)
    lo = np.zeros((n // 2, n), np.float32)
    hi = np.zeros((n // 2, n), np.float32)
    for i in range(n // 2):
        lo[i, 2 * i] = s
        lo[i, 2 * i + 1] = s
        hi[i, 2 * i] = s
        hi[i, 2 * i + 1] = -s
    return lo, hi


def _bilinear_mat(out_size, in_size):
    """PyTorch F.interpolate(mode='bilinear', align_corners=False) along one axis, as (out, in)."""
    U = np.zeros((out_size, in_size), np.float32)
    scale = in_size / out_size
    for i in range(out_size):
        src = max((i + 0.5) * scale - 0.5, 0.0)     # torch clamps negative source index to 0
        i0 = min(int(np.floor(src)), in_size - 1)
        i1 = min(i0 + 1, in_size - 1)
        lam = src - i0
        U[i, i0] += 1.0 - lam
        U[i, i1] += lam
    return U


# --------------------------------------------------------------------------------------
# Pallas kernel: per (batch, NB-channel block) -> 3 level-1 + 3 level-2 upsampled details
# --------------------------------------------------------------------------------------
def _wavelet_kernel(x_ref,
                    wh_ref, wwT_ref,        # level-1 stacked analysis mats  (H,H) / (W,W)
                    wh2_ref, ww2T_ref,      # level-2 stacked analysis mats  (H/2,H/2) / (W/2,W/2)
                    uh1_ref, uw1T_ref,      # level-1 bilinear upsample mats (H,H/2) / (W/2,W)
                    uh2_ref, uw2T_ref,      # level-2 bilinear upsample mats (H,H/4) / (W/4,W)
                    o1_ref, o2_ref,
                    *, flatten, precision):
    f32 = jnp.float32
    _, nb, H, W = x_ref.shape
    h2, w2, h4, w4 = H // 2, W // 2, H // 4, W // 4

    def right(a, m):
        # (n, r, k) @ (k, p) along the last (lane) dim.  Rows are independent, so when the row
        # dim is sublane-aligned we merge the leading dims into one big 2-D matmul (fills the
        # MXU M dimension); otherwise fall back to a standard batched matmul.
        n, r, k = a.shape
        p = m.shape[1]
        if r % 8 == 0:
            out = jnp.dot(a.reshape(n * r, k), m, precision=precision,
                          preferred_element_type=f32)
            return out.reshape(n, r, p)
        mb = jnp.broadcast_to(m, (n, k, p))
        return lax.dot_general(a, mb, (((2,), (1,)), ((0,), (0,))),
                               precision=precision, preferred_element_type=f32)

    def left(m, a):
        # per-image  m (p, r) @ a[i] (r, k)  -> (n, p, k).
        # TODO(synk): a merged-M / weight-stationary form (transposed-data right-multiply or
        # pltpu.matmul_push_rhs) would fill the MXU better when W < 256; kept as a standard
        # batched matmul because that form is guaranteed to lower on all generations.
        n = a.shape[0]
        if n == 1:
            return jnp.dot(m, a[0], precision=precision,
                           preferred_element_type=f32)[None]
        mb = jnp.broadcast_to(m, (n,) + m.shape)
        return lax.dot_general(mb, a, (((2,), (1,)), ((0,), (0,))),
                               precision=precision, preferred_element_type=f32)

    def store(o_ref, up):
        # up: (3*nb, H, W) with the orientation index outermost (from the band concatenation).
        up4 = up.reshape(3, nb, H, W)                 # leading-dim split only -> cheap
        if flatten:
            # Build a lane-dense (3, nb, H*W) value row by row (lane-dim concatenate), so the
            # output store and the VMEM->HBM writeback are unmasked / contiguous.
            flat = jnp.concatenate([up4[:, :, i, :] for i in range(H)], axis=-1)
            o_ref[...] = flat[None].astype(o_ref.dtype)
        else:
            o_ref[...] = up4[None].astype(o_ref.dtype)

    x = x_ref[0].astype(f32)                          # (nb, H, W); torch does x.float()

    # ---- level-1 Haar analysis: one matmul per direction (stacked lo/hi filters) ----
    xw = right(x, wwT_ref[...])                       # lanes: [lo-w | hi-w]
    y1 = left(wh_ref[...], xw)                        # rows : [lo-h ; hi-h] -> quadrants
    # (quadrant boundaries are tile-aligned for the common W%256==0 / H%16==0 case)
    ll1 = y1[:, :h2, :w2]                             # LL1
    d1 = jnp.concatenate([y1[:, h2:, :w2],            # band0: lo-width, hi-height
                          y1[:, :h2, w2:],            # band1: hi-width, lo-height
                          y1[:, h2:, w2:]], axis=0)   # band2: hi-width, hi-height

    # ---- level-1 upsample + store FIRST (shrinks peak live f32 intermediates) ----
    up1 = left(uh1_ref[...], right(d1, uw1T_ref[...]))   # (3*nb, H, W)
    store(o1_ref, up1)

    # ---- level-2 Haar analysis on LL1 + upsample ----
    y2 = left(wh2_ref[...], right(ll1, ww2T_ref[...]))
    d2 = jnp.concatenate([y2[:, h4:, :w4],
                          y2[:, :h4, w4:],
                          y2[:, h4:, w4:]], axis=0)       # (3*nb, H/4, W/4)
    up2 = left(uh2_ref[...], right(d2, uw2T_ref[...]))    # (3*nb, H, W)
    store(o2_ref, up2)


# --------------------------------------------------------------------------------------
# Wrapper: tiling choice + pallas_call
# --------------------------------------------------------------------------------------
def _vmem_capacity_bytes():
    try:
        cap = int(pltpu.get_tpu_info().vmem_capacity_bytes)
        if cap >= (16 << 20):
            return cap
    except Exception:
        pass
    return 128 << 20


def wavelet_decomp(x, levels=2, out_dtype=None, precision=lax.Precision.HIGHEST):
    """Pallas implementation of WaveletDecomp.forward.

    Returns [feat_level1, feat_level2], each (B, 3*C, H, W) in orientation-major channel order
    (matching `rearrange(yh, 'b x y h w -> b (y x) h w')`), dtype = out_dtype (default x.dtype).
    """
    assert levels == 2, "this fused kernel implements the module default (levels=2)"
    B, C, H, W = x.shape
    assert H % 4 == 0 and W % 4 == 0, "2-level Haar DWT needs H, W divisible by 4"
    out_dtype = jnp.dtype(x.dtype) if out_dtype is None else jnp.dtype(out_dtype)

    # stacked Haar analysis matrices: [lo ; hi] on the height side, [lo | hi] on the width side
    lh, hh = _haar_mats(H)
    lw, hw = _haar_mats(W)
    lh2, hh2 = _haar_mats(H // 2)
    lw2, hw2 = _haar_mats(W // 2)
    mats_np = [
        np.concatenate([lh, hh], axis=0),                       # wh    (H, H)
        np.concatenate([lw.T, hw.T], axis=1),                   # wwT   (W, W)
        np.concatenate([lh2, hh2], axis=0),                     # wh2   (H/2, H/2)
        np.concatenate([lw2.T, hw2.T], axis=1),                 # ww2T  (W/2, W/2)
        _bilinear_mat(H, H // 2),                               # uh1   (H, H/2)
        np.ascontiguousarray(_bilinear_mat(W, W // 2).T),       # uw1T  (W/2, W)
        _bilinear_mat(H, H // 4),                               # uh2   (H, H/4)
        np.ascontiguousarray(_bilinear_mat(W, W // 4).T),       # uw2T  (W/4, W)
    ]
    mats = [jnp.asarray(m) for m in mats_np]
    mat_bytes = sum(int(m.size) for m in mats_np) * 4 * 2       # default double-buffered

    in_bytes = jnp.dtype(x.dtype).itemsize
    out_bytes = out_dtype.itemsize

    # Lane-dense output layout: flatten (H, W) -> H*W when W is not 128-aligned (biggest single
    # lever: the kernel writes 6x the input volume).  For W % 128 == 0 the 5-D layout is dense.
    flatten = (W % 128 != 0) and ((H * W) % 128 == 0) and (H <= 256)

    # Generation-aware VMEM budget: ~96 MiB on 128-MiB v5e/v6e, ~44 MiB on 64-MiB v7x.
    cap = _vmem_capacity_bytes()
    headroom = max(20 << 20, cap // 4)
    budget = cap - headroom

    def vmem_bytes(nb):
        img = nb * H * W
        return (2 * img * in_bytes                  # input block, double buffered
                + 2 * 2 * 3 * img * out_bytes       # two (.,3,nb,...) outputs, double buffered
                + 12 * img * 4                      # bound on live f32 intermediates (reordered body)
                + mat_bytes                         # constant filter/upsample matrices
                + (2 << 20))                        # slop for relayout staging / spills

    def allowed(d):
        # For the flattened output layout the channel block is the second-minor output dim,
        # so it must be sublane-aligned or cover the whole channel dim.
        return True if not flatten else (d == C or d % 8 == 0)

    target_steps = min(8, B * C)                    # >= ~4 steps per TensorCore on a 2-TC chip
    divs = [d for d in range(1, C + 1) if C % d == 0 and allowed(d)]
    fitting = [d for d in divs if vmem_bytes(d) <= budget] or [min(divs)]
    good = [d for d in fitting if B * (C // d) >= target_steps]
    NB = max(good) if good else min(fitting)

    grid = (B, C // NB)
    est = vmem_bytes(NB)
    vmem_limit = max(32 << 20, min(cap - (12 << 20), est + (8 << 20)))
    vmem_limit = int(min(vmem_limit, cap - (4 << 20)))

    x_spec = pl.BlockSpec((1, NB, H, W), lambda b, cb: (b, cb, 0, 0))
    # Constant filter matrices: constant index_map -> DMA'd once and revisited every step.
    mat_specs = [pl.BlockSpec(m.shape, lambda b, cb: (0, 0)) for m in mats]

    if flatten:
        out_sds = jax.ShapeDtypeStruct((B, 3, C, H * W), out_dtype)
        out_spec = pl.BlockSpec((1, 3, NB, H * W), lambda b, cb: (b, 0, cb, 0))
    else:
        out_sds = jax.ShapeDtypeStruct((B, 3, C, H, W), out_dtype)
        out_spec = pl.BlockSpec((1, 3, NB, H, W), lambda b, cb: (b, 0, cb, 0, 0))

    kernel = functools.partial(_wavelet_kernel, flatten=flatten, precision=precision)

    f1, f2 = pl.pallas_call(
        kernel,
        out_shape=(out_sds, out_sds),
        grid=grid,
        in_specs=[x_spec] + mat_specs,
        out_specs=[out_spec, out_spec],
        compiler_params=pltpu.CompilerParams(
            dimension_semantics=("parallel", "parallel"),
            vmem_limit_bytes=vmem_limit),
    )(x, *mats)

    # (B, 3, C, H*W) or (B, 3, C, H, W) -> (B, 3C, H, W): free reshape (no transpose / copy).
    return [f1.reshape(B, 3 * C, H, W), f2.reshape(B, 3 * C, H, W)]


# --------------------------------------------------------------------------------------
# Exact host-side (numpy) reference: slicing-based Haar + matrix bilinear, float64 oracle
# --------------------------------------------------------------------------------------
def _ref_wavelet_decomp_np(x_np):
    B, C, H, W = x_np.shape
    xf = x_np.astype(np.float64)

    def haar(z):
        a = z[..., 0::2, 0::2]
        b = z[..., 0::2, 1::2]
        c = z[..., 1::2, 0::2]
        d = z[..., 1::2, 1::2]
        ll = 0.5 * (a + b + c + d)
        lohi = 0.5 * (a + b - c - d)   # lo-width, hi-height (band 0)
        hilo = 0.5 * (a - b + c - d)   # hi-width, lo-height (band 1)
        hihi = 0.5 * (a - b - c + d)   # band 2
        return ll, np.stack([lohi, hilo, hihi], axis=2)   # (B, C, 3, h, w)

    ll1, yh1 = haar(xf)
    _, yh2 = haar(ll1)
    feats = []
    for yh in (yh1, yh2):
        h, w = yh.shape[-2:]
        f = np.transpose(yh, (0, 2, 1, 3, 4)).reshape(B, 3 * C, h, w)   # orientation-major
        Uh = _bilinear_mat(H, h).astype(np.float64)
        Uw = _bilinear_mat(W, w).astype(np.float64)
        f = np.einsum('Ih,bchw,Jw->bcIJ', Uh, f, Uw)
        feats.append(f.astype(x_np.dtype))
    return feats


if __name__ == "__main__":
    key = jax.random.PRNGKey(0)
    B, C, H, W = 2, 4, 16, 16
    x = jax.random.normal(key, (B, C, H, W), dtype=jnp.float32)

    feats = wavelet_decomp(x, levels=2)
    feats = [jax.block_until_ready(f) for f in feats]

    ref = _ref_wavelet_decomp_np(np.asarray(x))
    for got, exp in zip(feats, ref):
        assert got.shape == (B, 3 * C, H, W) and got.dtype == x.dtype
        np.testing.assert_allclose(np.asarray(got), exp, rtol=1e-3, atol=1e-3)

    print("KERNEL_OK")
</pallas_src>

<mosaic_0001>
module attributes {stable_mosaic.version = 11 : i64} {
  func.func @_wavelet_kernel(%arg0: i32, %arg1: i32, %arg2: memref<1x4x16x16xf32, #tpu.memory_space<vmem>>, %arg3: memref<16x16xf32, #tpu.memory_space<vmem>>, %arg4: memref<16x16xf32, #tpu.memory_space<vmem>>, %arg5: memref<8x8xf32, #tpu.memory_space<vmem>>, %arg6: memref<8x8xf32, #tpu.memory_space<vmem>>, %arg7: memref<16x8xf32, #tpu.memory_space<vmem>>, %arg8: memref<8x16xf32, #tpu.memory_space<vmem>>, %arg9: memref<16x4xf32, #tpu.memory_space<vmem>>, %arg10: memref<4x16xf32, #tpu.memory_space<vmem>>, %arg11: memref<1x3x4x256xf32, #tpu.memory_space<vmem>>, %arg12: memref<1x3x4x256xf32, #tpu.memory_space<vmem>>) attributes {dimension_semantics = [#tpu.dimension_semantics<parallel>, #tpu.dimension_semantics<parallel>], iteration_bounds = array<i64: 2, 1>, scalar_prefetch = 0 : i64, scratch_operands = 0 : i64, tpu.core_type = #tpu.core_type<tc>, window_params = [{transform_indices = @transform_0, window_bounds = array<i64: 1, 4, 16, 16>}, {pipeline_mode = #tpu.pipeline_mode<synchronous>, transform_indices = @transform_1, window_bounds = array<i64: 16, 16>}, {pipeline_mode = #tpu.pipeline_mode<synchronous>, transform_indices = @transform_2, window_bounds = array<i64: 16, 16>}, {pipeline_mode = #tpu.pipeline_mode<synchronous>, transform_indices = @transform_3, window_bounds = array<i64: 8, 8>}, {pipeline_mode = #tpu.pipeline_mode<synchronous>, transform_indices = @transform_4, window_bounds = array<i64: 8, 8>}, {pipeline_mode = #tpu.pipeline_mode<synchronous>, transform_indices = @transform_5, window_bounds = array<i64: 16, 8>}, {pipeline_mode = #tpu.pipeline_mode<synchronous>, transform_indices = @transform_6, window_bounds = array<i64: 8, 16>}, {pipeline_mode = #tpu.pipeline_mode<synchronous>, transform_indices = @transform_7, window_bounds = array<i64: 16, 4>}, {pipeline_mode = #tpu.pipeline_mode<synchronous>, transform_indices = @transform_8, window_bounds = array<i64: 4, 16>}, {transform_indices = @transform_9, window_bounds = array<i64: 1, 3, 4, 256>}, {transform_indices = @transform_10, window_bounds = array<i64: 1, 3, 4, 256>}]} {
    %c0 = arith.constant 0 : index
    %c0_0 = arith.constant 0 : index
    %c0_1 = arith.constant 0 : index
    %c0_2 = arith.constant 0 : index
    %0 = vector.load %arg2[%c0, %c0_0, %c0_1, %c0_2] : memref<1x4x16x16xf32, #tpu.memory_space<vmem>>, vector<1x4x16x16xf32>
    %1 = vector.shape_cast %0 : vector<1x4x16x16xf32> to vector<4x16x16xf32>
    %c0_3 = arith.constant 0 : index
    %c0_4 = arith.constant 0 : index
    %2 = vector.load %arg4[%c0_3, %c0_4] : memref<16x16xf32, #tpu.memory_space<vmem>>, vector<16x16xf32>
    %3 = vector.shape_cast %1 : vector<4x16x16xf32> to vector<64x16xf32>
    %cst = arith.constant dense<0.000000e+00> : vector<64x16xf32>
    %4 = tpu.matmul %3, %2, %cst {dimension_numbers = #tpu.dot_dimension_numbers<[1], [0], [0], [1], [0, 0, 1, 1], [], []>, precision = #tpu.contract_precision<fp32>} : vector<64x16xf32>, vector<16x16xf32>, vector<64x16xf32> -> vector<64x16xf32>
    %5 = vector.shape_cast %4 : vector<64x16xf32> to vector<4x16x16xf32>
    %c0_5 = arith.constant 0 : index
    %c0_6 = arith.constant 0 : index
    %6 = vector.load %arg3[%c0_5, %c0_6] : memref<16x16xf32, #tpu.memory_space<vmem>>, vector<16x16xf32>
    %7 = vector.shape_cast %6 : vector<16x16xf32> to vector<1x16x16xf32>
    %8 = vector.broadcast %7 : vector<1x16x16xf32> to vector<4x16x16xf32>
    %cst_7 = arith.constant dense<0.000000e+00> : vector<4x16x16xf32>
    %9 = tpu.matmul %8, %5, %cst_7 {dimension_numbers = #tpu.dot_dimension_numbers<[2], [1], [1], [2], [0, 0, 0, 1, 1, 2], [0], [0]>, precision = #tpu.contract_precision<fp32>} : vector<4x16x16xf32>, vector<4x16x16xf32>, vector<4x16x16xf32> -> vector<4x16x16xf32>
    %10 = vector.extract_strided_slice %9 {offsets = [0, 0, 0], sizes = [4, 8, 8], strides = [1, 1, 1]} : vector<4x16x16xf32> to vector<4x8x8xf32>
    %11 = vector.extract_strided_slice %9 {offsets = [0, 8, 0], sizes = [4, 8, 8], strides = [1, 1, 1]} : vector<4x16x16xf32> to vector<4x8x8xf32>
    %12 = vector.extract_strided_slice %9 {offsets = [0, 0, 8], sizes = [4, 8, 8], strides = [1, 1, 1]} : vector<4x16x16xf32> to vector<4x8x8xf32>
    %13 = vector.extract_strided_slice %9 {offsets = [0, 8, 8], sizes = [4, 8, 8], strides = [1, 1, 1]} : vector<4x16x16xf32> to vector<4x8x8xf32>
    %14 = tpu.concatenate %11, %12, %13 in 0 : vector<4x8x8xf32>, vector<4x8x8xf32>, vector<4x8x8xf32> -> vector<12x8x8xf32>
    %c0_8 = arith.constant 0 : index
    %c0_9 = arith.constant 0 : index
    %15 = vector.load %arg7[%c0_8, %c0_9] : memref<16x8xf32, #tpu.memory_space<vmem>>, vector<16x8xf32>
    %c0_10 = arith.constant 0 : index
    %c0_11 = arith.constant 0 : index
    %16 = vector.load %arg8[%c0_10, %c0_11] : memref<8x16xf32, #tpu.memory_space<vmem>>, vector<8x16xf32>
    %17 = vector.shape_cast %14 : vector<12x8x8xf32> to vector<96x8xf32>
    %cst_12 = arith.constant dense<0.000000e+00> : vector<96x16xf32>
    %18 = tpu.matmul %17, %16, %cst_12 {dimension_numbers = #tpu.dot_dimension_numbers<[1], [0], [0], [1], [0, 0, 1, 1], [], []>, precision = #tpu.contract_precision<fp32>} : vector<96x8xf32>, vector<8x16xf32>, vector<96x16xf32> -> vector<96x16xf32>
    %19 = vector.shape_cast %18 : vector<96x16xf32> to vector<12x8x16xf32>
    %20 = vector.shape_cast %15 : vector<16x8xf32> to vector<1x16x8xf32>
    %21 = vector.broadcast %20 : vector<1x16x8xf32> to vector<12x16x8xf32>
    %cst_13 = arith.constant dense<0.000000e+00> : vector<12x16x16xf32>
    %22 = tpu.matmul %21, %19, %cst_13 {dimension_numbers = #tpu.dot_dimension_numbers<[2], [1], [1], [2], [0, 0, 0, 1, 1, 2], [0], [0]>, precision = #tpu.contract_precision<fp32>} : vector<12x16x8xf32>, vector<12x8x16xf32>, vector<12x16x16xf32> -> vector<12x16x16xf32>
    %23 = vector.shape_cast %22 : vector<12x16x16xf32> to vector<3x4x16x16xf32>
    %24 = vector.extract_strided_slice %23 {offsets = [0, 0, 0, 0], sizes = [3, 4, 1, 16], strides = [1, 1, 1, 1]} : vector<3x4x16x16xf32> to vector<3x4x1x16xf32>
    %25 = vector.shape_cast %24 : vector<3x4x1x16xf32> to vector<3x4x16xf32>
    %26 = vector.extract_strided_slice %23 {offsets = [0, 0, 1, 0], sizes = [3, 4, 1, 16], strides = [1, 1, 1, 1]} : vector<3x4x16x16xf32> to vector<3x4x1x16xf32>
    %27 = vector.shape_cast %26 : vector<3x4x1x16xf32> to vector<3x4x16xf32>
    %28 = vector.extract_strided_slice %23 {offsets = [0, 0, 2, 0], sizes = [3, 4, 1, 16], strides = [1, 1, 1, 1]} : vector<3x4x16x16xf32> to vector<3x4x1x16xf32>
    %29 = vector.shape_cast %28 : vector<3x4x1x16xf32> to vector<3x4x16xf32>
    %30 = vector.extract_strided_slice %23 {offsets = [0, 0, 3, 0], sizes = [3, 4, 1, 16], strides = [1, 1, 1, 1]} : vector<3x4x16x16xf32> to vector<3x4x1x16xf32>
    %31 = vector.shape_cast %30 : vector<3x4x1x16xf32> to vector<3x4x16xf32>
    %32 = vector.extract_strided_slice %23 {offsets = [0, 0, 4, 0], sizes = [3, 4, 1, 16], strides = [1, 1, 1, 1]} : vector<3x4x16x16xf32> to vector<3x4x1x16xf32>
    %33 = vector.shape_cast %32 : vector<3x4x1x16xf32> to vector<3x4x16xf32>
    %34 = vector.extract_strided_slice %23 {offsets = [0, 0, 5, 0], sizes = [3, 4, 1, 16], strides = [1, 1, 1, 1]} : vector<3x4x16x16xf32> to vector<3x4x1x16xf32>
    %35 = vector.shape_cast %34 : vector<3x4x1x16xf32> to vector<3x4x16xf32>
    %36 = vector.extract_strided_slice %23 {offsets = [0, 0, 6, 0], sizes = [3, 4, 1, 16], strides = [1, 1, 1, 1]} : vector<3x4x16x16xf32> to vector<3x4x1x16xf32>
    %37 = vector.shape_cast %36 : vector<3x4x1x16xf32> to vector<3x4x16xf32>
    %38 = vector.extract_strided_slice %23 {offsets = [0, 0, 7, 0], sizes = [3, 4, 1, 16], strides = [1, 1, 1, 1]} : vector<3x4x16x16xf32> to vector<3x4x1x16xf32>
    %39 = vector.shape_cast %38 : vector<3x4x1x16xf32> to vector<3x4x16xf32>
    %40 = vector.extract_strided_slice %23 {offsets = [0, 0, 8, 0], sizes = [3, 4, 1, 16], strides = [1, 1, 1, 1]} : vector<3x4x16x16xf32> to vector<3x4x1x16xf32>
    %41 = vector.shape_cast %40 : vector<3x4x1x16xf32> to vector<3x4x16xf32>
    %42 = vector.extract_strided_slice %23 {offsets = [0, 0, 9, 0], sizes = [3, 4, 1, 16], strides = [1, 1, 1, 1]} : vector<3x4x16x16xf32> to vector<3x4x1x16xf32>
    %43 = vector.shape_cast %42 : vector<3x4x1x16xf32> to vector<3x4x16xf32>
    %44 = vector.extract_strided_slice %23 {offsets = [0, 0, 10, 0], sizes = [3, 4, 1, 16], strides = [1, 1, 1, 1]} : vector<3x4x16x16xf32> to vector<3x4x1x16xf32>
    %45 = vector.shape_cast %44 : vector<3x4x1x16xf32> to vector<3x4x16xf32>
    %46 = vector.extract_strided_slice %23 {offsets = [0, 0, 11, 0], sizes = [3, 4, 1, 16], strides = [1, 1, 1, 1]} : vector<3x4x16x16xf32> to vector<3x4x1x16xf32>
    %47 = vector.shape_cast %46 : vector<3x4x1x16xf32> to vector<3x4x16xf32>
    %48 = vector.extract_strided_slice %23 {offsets = [0, 0, 12, 0], sizes = [3, 4, 1, 16], strides = [1, 1, 1, 1]} : vector<3x4x16x16xf32> to vector<3x4x1x16xf32>
    %49 = vector.shape_cast %48 : vector<3x4x1x16xf32> to vector<3x4x16xf32>
    %50 = vector.extract_strided_slice %23 {offsets = [0, 0, 13, 0], sizes = [3, 4, 1, 16], strides = [1, 1, 1, 1]} : vector<3x4x16x16xf32> to vector<3x4x1x16xf32>
    %51 = vector.shape_cast %50 : vector<3x4x1x16xf32> to vector<3x4x16xf32>
    %52 = vector.extract_strided_slice %23 {offsets = [0, 0, 14, 0], sizes = [3, 4, 1, 16], strides = [1, 1, 1, 1]} : vector<3x4x16x16xf32> to vector<3x4x1x16xf32>
    %53 = vector.shape_cast %52 : vector<3x4x1x16xf32> to vector<3x4x16xf32>
    %54 = vector.extract_strided_slice %23 {offsets = [0, 0, 15, 0], sizes = [3, 4, 1, 16], strides = [1, 1, 1, 1]} : vector<3x4x16x16xf32> to vector<3x4x1x16xf32>
    %55 = vector.shape_cast %54 : vector<3x4x1x16xf32> to vector<3x4x16xf32>
    %56 = tpu.concatenate %25, %27, %29, %31, %33, %35, %37, %39, %41, %43, %45, %47, %49, %51, %53, %55 in 2 : vector<3x4x16xf32>, vector<3x4x16xf32>, vector<3x4x16xf32>, vector<3x4x16xf32>, vector<3x4x16xf32>, vector<3x4x16xf32>, vector<3x4x16xf32>, vector<3x4x16xf32>, vector<3x4x16xf32>, vector<3x4x16xf32>, vector<3x4x16xf32>, vector<3x4x16xf32>, vector<3x4x16xf32>, vector<3x4x16xf32>, vector<3x4x16xf32>, vector<3x4x16xf32> -> vector<3x4x256xf32>
    %57 = vector.shape_cast %56 : vector<3x4x256xf32> to vector<1x3x4x256xf32>
    %c0_14 = arith.constant 0 : index
    %c0_15 = arith.constant 0 : index
    %c0_16 = arith.constant 0 : index
    %c0_17 = arith.constant 0 : index
    %58 = vector.load %arg11[%c0_14, %c0_15, %c0_16, %c0_17] : memref<1x3x4x256xf32, #tpu.memory_space<vmem>>, vector<1x3x4x256xf32>
    tpu.vector_store %arg11[%c0_14, %c0_15, %c0_16, %c0_17], %57 {strides = array<i32>} : memref<1x3x4x256xf32, #tpu.memory_space<vmem>>, vector<1x3x4x256xf32>,
    %c0_18 = arith.constant 0 : index
    %c0_19 = arith.constant 0 : index
    %59 = vector.load %arg5[%c0_18, %c0_19] : memref<8x8xf32, #tpu.memory_space<vmem>>, vector<8x8xf32>
    %c0_20 = arith.constant 0 : index
    %c0_21 = arith.constant 0 : index
    %60 = vector.load %arg6[%c0_20, %c0_21] : memref<8x8xf32, #tpu.memory_space<vmem>>, vector<8x8xf32>
    %61 = vector.shape_cast %10 : vector<4x8x8xf32> to vector<32x8xf32>
    %cst_22 = arith.constant dense<0.000000e+00> : vector<32x8xf32>
    %62 = tpu.matmul %61, %60, %cst_22 {dimension_numbers = #tpu.dot_dimension_numbers<[1], [0], [0], [1], [0, 0, 1, 1], [], []>, precision = #tpu.contract_precision<fp32>} : vector<32x8xf32>, vector<8x8xf32>, vector<32x8xf32> -> vector<32x8xf32>
    %63 = vector.shape_cast %62 : vector<32x8xf32> to vector<4x8x8xf32>
    %64 = vector.shape_cast %59 : vector<8x8xf32> to vector<1x8x8xf32>
    %65 = vector.broadcast %64 : vector<1x8x8xf32> to vector<4x8x8xf32>
    %cst_23 = arith.constant dense<0.000000e+00> : vector<4x8x8xf32>
    %66 = tpu.matmul %65, %63, %cst_23 {dimension_numbers = #tpu.dot_dimension_numbers<[2], [1], [1], [2], [0, 0, 0, 1, 1, 2], [0], [0]>, precision = #tpu.contract_precision<fp32>} : vector<4x8x8xf32>, vector<4x8x8xf32>, vector<4x8x8xf32> -> vector<4x8x8xf32>
    %67 = vector.extract_strided_slice %66 {offsets = [0, 4, 0], sizes = [4, 4, 4], strides = [1, 1, 1]} : vector<4x8x8xf32> to vector<4x4x4xf32>
    %68 = vector.extract_strided_slice %66 {offsets = [0, 0, 4], sizes = [4, 4, 4], strides = [1, 1, 1]} : vector<4x8x8xf32> to vector<4x4x4xf32>
    %69 = vector.extract_strided_slice %66 {offsets = [0, 4, 4], sizes = [4, 4, 4], strides = [1, 1, 1]} : vector<4x8x8xf32> to vector<4x4x4xf32>
    %70 = tpu.concatenate %67, %68, %69 in 0 : vector<4x4x4xf32>, vector<4x4x4xf32>, vector<4x4x4xf32> -> vector<12x4x4xf32>
    %c0_24 = arith.constant 0 : index
    %c0_25 = arith.constant 0 : index
    %71 = vector.load %arg9[%c0_24, %c0_25] : memref<16x4xf32, #tpu.memory_space<vmem>>, vector<16x4xf32>
    %c0_26 = arith.constant 0 : index
    %c0_27 = arith.constant 0 : index
    %72 = vector.load %arg10[%c0_26, %c0_27] : memref<4x16xf32, #tpu.memory_space<vmem>>, vector<4x16xf32>
    %73 = vector.shape_cast %72 : vector<4x16xf32> to vector<1x4x16xf32>
    %74 = vector.broadcast %73 : vector<1x4x16xf32> to vector<12x4x16xf32>
    %cst_28 = arith.constant dense<0.000000e+00> : vector<12x4x16xf32>
    %75 = tpu.matmul %70, %74, %cst_28 {dimension_numbers = #tpu.dot_dimension_numbers<[2], [1], [1], [2], [0, 0, 0, 1, 1, 2], [0], [0]>, precision = #tpu.contract_precision<fp32>} : vector<12x4x4xf32>, vector<12x4x16xf32>, vector<12x4x16xf32> -> vector<12x4x16xf32>
    %76 = vector.shape_cast %71 : vector<16x4xf32> to vector<1x16x4xf32>
    %77 = vector.broadcast %76 : vector<1x16x4xf32> to vector<12x16x4xf32>
    %cst_29 = arith.constant dense<0.000000e+00> : vector<12x16x16xf32>
    %78 = tpu.matmul %77, %75, %cst_29 {dimension_numbers = #tpu.dot_dimension_numbers<[2], [1], [1], [2], [0, 0, 0, 1, 1, 2], [0], [0]>, precision = #tpu.contract_precision<fp32>} : vector<12x16x4xf32>, vector<12x4x16xf32>, vector<12x16x16xf32> -> vector<12x16x16xf32>
    %79 = vector.shape_cast %78 : vector<12x16x16xf32> to vector<3x4x16x16xf32>
    %80 = vector.extract_strided_slice %79 {offsets = [0, 0, 0, 0], sizes = [3, 4, 1, 16], strides = [1, 1, 1, 1]} : vector<3x4x16x16xf32> to vector<3x4x1x16xf32>
    %81 = vector.shape_cast %80 : vector<3x4x1x16xf32> to vector<3x4x16xf32>
    %82 = vector.extract_strided_slice %79 {offsets = [0, 0, 1, 0], sizes = [3, 4, 1, 16], strides = [1, 1, 1, 1]} : vector<3x4x16x16xf32> to vector<3x4x1x16xf32>
    %83 = vector.shape_cast %82 : vector<3x4x1x16xf32> to vector<3x4x16xf32>
    %84 = vector.extract_strided_slice %79 {offsets = [0, 0, 2, 0], sizes = [3, 4, 1, 16], strides = [1, 1, 1, 1]} : vector<3x4x16x16xf32> to vector<3x4x1x16xf32>
    %85 = vector.shape_cast %84 : vector<3x4x1x16xf32> to vector<3x4x16xf32>
    %86 = vector.extract_strided_slice %79 {offsets = [0, 0, 3, 0], sizes = [3, 4, 1, 16], strides = [1, 1, 1, 1]} : vector<3x4x16x16xf32> to vector<3x4x1x16xf32>
    %87 = vector.shape_cast %86 : vector<3x4x1x16xf32> to vector<3x4x16xf32>
    %88 = vector.extract_strided_slice %79 {offsets = [0, 0, 4, 0], sizes = [3, 4, 1, 16], strides = [1, 1, 1, 1]} : vector<3x4x16x16xf32> to vector<3x4x1x16xf32>
    %89 = vector.shape_cast %88 : vector<3x4x1x16xf32> to vector<3x4x16xf32>
    %90 = vector.extract_strided_slice %79 {offsets = [0, 0, 5, 0], sizes = [3, 4, 1, 16], strides = [1, 1, 1, 1]} : vector<3x4x16x16xf32> to vector<3x4x1x16xf32>
    %91 = vector.shape_cast %90 : vector<3x4x1x16xf32> to vector<3x4x16xf32>
    %92 = vector.extract_strided_slice %79 {offsets = [0, 0, 6, 0], sizes = [3, 4, 1, 16], strides = [1, 1, 1, 1]} : vector<3x4x16x16xf32> to vector<3x4x1x16xf32>
    %93 = vector.shape_cast %92 : vector<3x4x1x16xf32> to vector<3x4x16xf32>
    %94 = vector.extract_strided_slice %79 {offsets = [0, 0, 7, 0], sizes = [3, 4, 1, 16], strides = [1, 1, 1, 1]} : vector<3x4x16x16xf32> to vector<3x4x1x16xf32>
    %95 = vector.shape_cast %94 : vector<3x4x1x16xf32> to vector<3x4x16xf32>
    %96 = vector.extract_strided_slice %79 {offsets = [0, 0, 8, 0], sizes = [3, 4, 1, 16], strides = [1, 1, 1, 1]} : vector<3x4x16x16xf32> to vector<3x4x1x16xf32>
    %97 = vector.shape_cast %96 : vector<3x4x1x16xf32> to vector<3x4x16xf32>
    %98 = vector.extract_strided_slice %79 {offsets = [0, 0, 9, 0], sizes = [3, 4, 1, 16], strides = [1, 1, 1, 1]} : vector<3x4x16x16xf32> to vector<3x4x1x16xf32>
    %99 = vector.shape_cast %98 : vector<3x4x1x16xf32> to vector<3x4x16xf32>
    %100 = vector.extract_strided_slice %79 {offsets = [0, 0, 10, 0], sizes = [3, 4, 1, 16], strides = [1, 1, 1, 1]} : vector<3x4x16x16xf32> to vector<3x4x1x16xf32>
    %101 = vector.shape_cast %100 : vector<3x4x1x16xf32> to vector<3x4x16xf32>
    %102 = vector.extract_strided_slice %79 {offsets = [0, 0, 11, 0], sizes = [3, 4, 1, 16], strides = [1, 1, 1, 1]} : vector<3x4x16x16xf32> to vector<3x4x1x16xf32>
    %103 = vector.shape_cast %102 : vector<3x4x1x16xf32> to vector<3x4x16xf32>
    %104 = vector.extract_strided_slice %79 {offsets = [0, 0, 12, 0], sizes = [3, 4, 1, 16], strides = [1, 1, 1, 1]} : vector<3x4x16x16xf32> to vector<3x4x1x16xf32>
    %105 = vector.shape_cast %104 : vector<3x4x1x16xf32> to vector<3x4x16xf32>
    %106 = vector.extract_strided_slice %79 {offsets = [0, 0, 13, 0], sizes = [3, 4, 1, 16], strides = [1, 1, 1, 1]} : vector<3x4x16x16xf32> to vector<3x4x1x16xf32>
    %107 = vector.shape_cast %106 : vector<3x4x1x16xf32> to vector<3x4x16xf32>
    %108 = vector.extract_strided_slice %79 {offsets = [0, 0, 14, 0], sizes = [3, 4, 1, 16], strides = [1, 1, 1, 1]} : vector<3x4x16x16xf32> to vector<3x4x1x16xf32>
    %109 = vector.shape_cast %108 : vector<3x4x1x16xf32> to vector<3x4x16xf32>
    %110 = vector.extract_strided_slice %79 {offsets = [0, 0, 15, 0], sizes = [3, 4, 1, 16], strides = [1, 1, 1, 1]} : vector<3x4x16x16xf32> to vector<3x4x1x16xf32>
    %111 = vector.shape_cast %110 : vector<3x4x1x16xf32> to vector<3x4x16xf32>
    %112 = tpu.concatenate %81, %83, %85, %87, %89, %91, %93, %95, %97, %99, %101, %103, %105, %107, %109, %111 in 2 : vector<3x4x16xf32>, vector<3x4x16xf32>, vector<3x4x16xf32>, vector<3x4x16xf32>, vector<3x4x16xf32>, vector<3x4x16xf32>, vector<3x4x16xf32>, vector<3x4x16xf32>, vector<3x4x16xf32>, vector<3x4x16xf32>, vector<3x4x16xf32>, vector<3x4x16xf32>, vector<3x4x16xf32>, vector<3x4x16xf32>, vector<3x4x16xf32>, vector<3x4x16xf32> -> vector<3x4x256xf32>
    %113 = vector.shape_cast %112 : vector<3x4x256xf32> to vector<1x3x4x256xf32>
    %c0_30 = arith.constant 0 : index
    %c0_31 = arith.constant 0 : index
    %c0_32 = arith.constant 0 : index
    %c0_33 = arith.constant 0 : index
    %114 = vector.load %arg12[%c0_30, %c0_31, %c0_32, %c0_33] : memref<1x3x4x256xf32, #tpu.memory_space<vmem>>, vector<1x3x4x256xf32>
    tpu.vector_store %arg12[%c0_30, %c0_31, %c0_32, %c0_33], %113 {strides = array<i32>} : memref<1x3x4x256xf32, #tpu.memory_space<vmem>>, vector<1x3x4x256xf32>,
    return
  }
  func.func @transform_0(%arg0: i32, %arg1: i32) -> (i32, i32, i32, i32) {
    %c0_i32 = arith.constant 0 : i32
    %c0_i32_0 = arith.constant 0 : i32
    %c0_i32_1 = arith.constant 0 : i32
    return %arg0, %arg1, %c0_i32, %c0_i32_0 : i32, i32, i32, i32
  }
  func.func @transform_1(%arg0: i32, %arg1: i32) -> (i32, i32) {
    %c0_i32 = arith.constant 0 : i32
    %c0_i32_0 = arith.constant 0 : i32
    %c0_i32_1 = arith.constant 0 : i32
    return %c0_i32, %c0_i32_0 : i32, i32
  }
  func.func @transform_2(%arg0: i32, %arg1: i32) -> (i32, i32) {
    %c0_i32 = arith.constant 0 : i32
    %c0_i32_0 = arith.constant 0 : i32
    %c0_i32_1 = arith.constant 0 : i32
    return %c0_i32, %c0_i32_0 : i32, i32
  }
  func.func @transform_3(%arg0: i32, %arg1: i32) -> (i32, i32) {
    %c0_i32 = arith.constant 0 : i32
    %c0_i32_0 = arith.constant 0 : i32
    %c0_i32_1 = arith.constant 0 : i32
    return %c0_i32, %c0_i32_0 : i32, i32
  }
  func.func @transform_4(%arg0: i32, %arg1: i32) -> (i32, i32) {
    %c0_i32 = arith.constant 0 : i32
    %c0_i32_0 = arith.constant 0 : i32
    %c0_i32_1 = arith.constant 0 : i32
    return %c0_i32, %c0_i32_0 : i32, i32
  }
  func.func @transform_5(%arg0: i32, %arg1: i32) -> (i32, i32) {
    %c0_i32 = arith.constant 0 : i32
    %c0_i32_0 = arith.constant 0 : i32
    %c0_i32_1 = arith.constant 0 : i32
    return %c0_i32, %c0_i32_0 : i32, i32
  }
  func.func @transform_6(%arg0: i32, %arg1: i32) -> (i32, i32) {
    %c0_i32 = arith.constant 0 : i32
    %c0_i32_0 = arith.constant 0 : i32
    %c0_i32_1 = arith.constant 0 : i32
    return %c0_i32, %c0_i32_0 : i32, i32
  }
  func.func @transform_7(%arg0: i32, %arg1: i32) -> (i32, i32) {
    %c0_i32 = arith.constant 0 : i32
    %c0_i32_0 = arith.constant 0 : i32
    %c0_i32_1 = arith.constant 0 : i32
    return %c0_i32, %c0_i32_0 : i32, i32
  }
  func.func @transform_8(%arg0: i32, %arg1: i32) -> (i32, i32) {
    %c0_i32 = arith.constant 0 : i32
    %c0_i32_0 = arith.constant 0 : i32
    %c0_i32_1 = arith.constant 0 : i32
    return %c0_i32, %c0_i32_0 : i32, i32
  }
  func.func @transform_9(%arg0: i32, %arg1: i32) -> (i32, i32, i32, i32) {
    %c0_i32 = arith.constant 0 : i32
    %c0_i32_0 = arith.constant 0 : i32
    %c0_i32_1 = arith.constant 0 : i32
    return %arg0, %c0_i32, %arg1, %c0_i32_0 : i32, i32, i32, i32
  }
  func.func @transform_10(%arg0: i32, %arg1: i32) -> (i32, i32, i32, i32) {
    %c0_i32 = arith.constant 0 : i32
    %c0_i32_0 = arith.constant 0 : i32
    %c0_i32_1 = arith.constant 0 : i32
    return %arg0, %c0_i32, %arg1, %c0_i32_0 : i32, i32, i32, i32
  }
}

</mosaic_0001>

<bundles_post_ra>
// kernel: tpu_custom_call.1
= control target key start
LH: loop header
LB: loop body
LE: loop exit
PB: predicated region body
PF: predicated region fallthrough
CT: control target
= control target key end

     0   :  { %s31534_s0 = inlined_call_operand.hbm [shape: f32[2,4,16,16], index: 0, kind: input, shape index: {}]   ;;  %s31535_s1 = inlined_call_operand.vmem [shape: f32[16,16], index: 1, kind: input, shape index: {}]   ;;  %s31536_s2 = inlined_call_operand.vmem [shape: f32[16,16], index: 2, kind: input, shape index: {}]   ;;  %s31537_s3 = inlined_call_operand.vmem [shape: f32[8,8], index: 3, kind: input, shape index: {}]   ;;  %s31538_s4 = inlined_call_operand.vmem [shape: f32[8,8], index: 4, kind: input, shape index: {}]   ;;  %s31539_s5 = inlined_call_operand.vmem [shape: f32[16,8], index: 5, kind: input, shape index: {}]   ;;  %s31540_s6 = inlined_call_operand.vmem [shape: f32[8,16], index: 6, kind: input, shape index: {}]   ;;  %s31541_s7 = inlined_call_operand.vmem [shape: f32[16,4], index: 7, kind: input, shape index: {}]   ;;  %s31542_s8 = inlined_call_operand.vmem [shape: f32[4,16], index: 8, kind: input, shape index: {}]   ;;  %s31543_s9 = inlined_call_operand.hbm [shape: f32[2,3,4,256], index: 9, kind: output, shape index: {0}]   ;;  %s31544_s10 = inlined_call_operand.hbm [shape: f32[2,3,4,256], index: 10, kind: output, shape index: {1}]  }
   0x1   :  { %31554 = sst [smem:[#allocation33_spill]] %s31534_s0 }
   0x2   :  { %16 = vsyncpa [#allocation3], 0 }
   0x3   :  { %18 = vsyncpa [#allocation3 + $0x1], 0 }
   0x4   :  { %19 = vsyncpa [#allocation4], 0 }
   0x5   :  { %21 = vsyncpa [#allocation4 + $0x1], 0 }
   0x6   :  { %22 = vsyncpa [#allocation7], 0 }
   0x7   :  { %24 = vsyncpa [#allocation7 + $0x1], 0  ;;  %s28503_s13 = smov 0   ;;  %s28505_s14 = smov 0  }
   0x8   :  { %s28507_s15 = smov 0   ;;  %s28509_s16 = smov 0  }
   0x9   :  { %s28511_s17 = smov 0   ;;  %s28513_s18 = smov 0  }
   0xa LB: > { %31555 = sst [smem:[#allocation11_spill]] %s28424_s17  ;;  %s24985_s19 = sadd.s32 4294967295, %s28428_s18   ;;  %s28428_s18 = sphi %s28513_s18, %s30_s18   ;;  %s28424_s17 = sphi %s28511_s17, %s31621_s17   ;;  %s28420_s16 = sphi %s28509_s16, %s31620_s16   ;;  %s28416_s15 = sphi %s28507_s15, %s31624_s15   ;;  %s28412_s14 = sphi %s28505_s14, %s31623_s14   ;;  %s28408_s13 = sphi %s28503_s13, %s31622_s13  }
   0xb   : > { %s24986_s20 = sadd.s32 4294967294, %s28428_s18   ;;  %s42_s21 = sadd.s32 1, %s28424_s17 }
   0xc   : > { %s51_s22 = sadd.s32 1, %s28416_s15  ;;  %p44_p0 = scmp.ge.s32.totalorder %s42_s21, 2 }
   0xd   : > { %p58_p1 = scmp.ne.s32.totalorder %s28416_s15, %s28412_s14  ;;  %p59_p2 = scmp.eq.s32.totalorder %s28428_s18, 0 }
   0xe   : > { %p64_p3 = scmp.ne.s32.totalorder %s28412_s14, %s28408_s13  ;;  %s31626_s21 = smov (%p44_p0, %s42_s21), 0 }
   0xf   : > { %31556 = sst [smem:[#allocation12_spill]] %s31626_s21  ;;  %p28544_p4 = por %p59_p2, %p58_p1 }
  0x10   : > { %p65_p5 = scmp.eq.s32.totalorder %s24985_s19, 0  ;;  %s46_s24 = ssub.s32 %s28424_s17, %s31626_s21 }
  0x11   : > { %p258_p6 = scmp.eq.s32.totalorder %s24985_s19, 1  ;;  %p49_p7 = scmp.eq.s32.totalorder %s46_s24, 0 }
  0x12   : > { %p28550_p8 = por %p65_p5, %p64_p3  ;;  %p264_p10 = scmp.eq.s32.totalorder %s24986_s20, 1 }
  0x13   : > { %p28554_p9 = por %p258_p6, %p58_p1  ;;  %p28219_p13 = scmp.lt.s32.totalorder %s28428_s18, 2 }
  0x14   : > { %s28559_s27 = scalar_select %p49_p7, %s28416_s15, %s51_s22  }
  0x15   : > { %s31559_s26 = scalar_select %p28554_p9, 1, 0 }
  0x16   : > { %p28561_p11 = por %p264_p10, %p64_p3  ;;  %s336_s29 = sand.u32 1, %s28416_s15  }
  0x17   : > { %s24989_s30 = sshll.u32 %s336_s29, 6  ;;  %s24998_s11 = sshll.u32 %s28424_s17, 10 }
  0x18   : > { %s31560_s28 = scalar_select %p28561_p11, 1, 0 }
  0x19   : > { %s31561_s0 = sld [smem:[#allocation33_spill]]  ;;  %s340_s20 = scalar_lea.vmem [#allocation2], %s24989_s30 }
  0x1a   : > { %s350_s22 = sshll.u32 %s340_s20, 4  ;;  %p28578_p0 = pnand %p28219_p13, %p28544_p4  ;;  %s28574_s22 = int_to_ptr.vmem [resolvable:$true] %s350_s22 }
  0x1b   : > { %s28583_s17 = scalar_lea.sflag [#allocation3], %s336_s29 }
  0x1c   : > { %p28286_p3 = pneg %p28578_p0 }
  0x1f   : > { %s28572_s24 = scalar_lea.hbm %s31561_s0, %s24998_s11  ;;  %s28289_s23 = scalar_lea.hbm %s31561_s0, 2048 }
  0x20   : > { %s28284_s11 = scalar_lea.hbm %s28572_s24, 1024  ;;  %p28290_p4 = scmp.lt.u32.totalorder %s28572_s24, %s31561_s0 }
  0x21   : > { %p28285_p2 = scmp.ne.s32.totalorder %s28572_s24, %s28284_s11  ;;  %p28291_p7 = scmp.lt.u32.totalorder %s28289_s23, %s28284_s11 }
  0x22   : > { %p28293_p13 = scmp.lt.u32.totalorder %s28284_s11, %s28572_s24 }
  0x23   : > { %p28287_p5 = pnand %p28286_p3, %p28285_p2  ;;  %p28292_p10 = por %p28291_p7, %p28290_p4 }
  0x25   : > { %p28288_p6 = pneg %p28287_p5  ;;  %p28294_p12 = por %p28293_p13, %p28292_p10 }
  0x27   : > { %p28295_p1 = pnand %p28294_p12, %p28288_p6 }
  0x29   : > { %28298 = shalt.err (!%p28295_p1)
}
  0x2a   : > { %s28299_s29 = scalar_lea.vmem %s28574_s22, 1024  ;;  %s28430_s30 = smov [#allocation2]  }
  0x2b   : > { %p28300_p2 = scmp.ne.s32.totalorder %s28574_s22, %s28299_s29  ;;  %s28304_s12 = sshll.u32 %s28430_s30, 4  ;;  %s28305_s12 = int_to_ptr.vmem [resolvable:$false] %s28304_s12 }
  0x2c   : > { %s28306_s19 = scalar_lea.vmem %s28305_s12, 2048  ;;  %p28307_p9 = scmp.lt.s32.totalorder %s28574_s22, %s28305_s12 }
  0x2d   : > { %p28302_p5 = pnand %p28300_p2, %p28286_p3  ;;  %p28308_p4 = scmp.lt.s32.totalorder %s28306_s19, %s28299_s29 }
  0x2f   : > { %p28303_p11 = pneg %p28302_p5  ;;  %p28309_p7 = por %p28308_p4, %p28307_p9 }
  0x31   : > { %p28310_p10 = pnand %p28309_p7, %p28303_p11 }
  0x33   : > { %28313 = shalt.err (!%p28310_p10)
}
  0x34   : > { %s28431_s11 = smov 128   ;;  %s28432_s23 = smov 8  }
  0x35   : > { %28211 = dma.hbm_to_vmem [thread:$0]  (!%p28578_p0), %s28572_s24, 1024, %s28574_s22, %s28583_s17, %s28431_s11, %s28431_s11, %s28432_s23  }
  0x36   : > { %p358_p12 = scmp.lt.s32.totalorder %s28428_s18, 3  ;;  %p31563_p1 = scmp.ge.s32.totalorder %s28428_s18, 1 }
  0x38   : > { %p359_p3 = pnand %p31563_p1, %p358_p12 }
  0x3a   : > { %362 = sbr.rel (%p359_p3) target bundleno = 2873 (0xb39), region = 56 }
  0x41   : > { %s28615_s20 = sand.u32 1, %s28412_s14  }
  0x42   : > { %s24993_s29 = sshll.u32 %s28615_s20, 6  ;;  %s365_s30 = scalar_lea.sflag [#allocation3], %s28615_s20 }
  0x43   : > { %s368_s12 = scalar_lea.vmem [#allocation2], %s24993_s29 }
  0x44   : > { %28395 = dma.done.wait (%p28550_p8), %s365_s30, 1024  }
  0x45   : > { %28397 = vsyncadd (%p28550_p8), %s365_s30, 4294966272  ;;  %vm421_vm0 = vcmask 130048   ;;  %v419_v0 = vld [vmem:[%s31536_s2] sm:$0xff]  ;;  %v420_v1 = vld [vmem:[%s31536_s2 + $0x8] sm:$0xff]  ;;  %vm3249_vm1 = vcmask 64512   ;;  %vm28435_vm2 = vmmov 0  }
  0x46   : > { %v411_v2 = vld [vmem:[%s368_s12] sm:$0xff]  ;;  %v447_v3 = vand.u32 4294901760, %v419_v0  ;;  %v450_v4 = vand.u32 4294901760, %v420_v1  ;;  %v412_v6 = vld [vmem:[%s368_s12 + $0x8] sm:$0xff]  ;;  %v413_v7 = vld [vmem:[%s368_s12 + $0x10] sm:$0xff]  ;;  %vm10080_vm3 = vcmask 1041409  }
  0x47   : > { %v423_v5 = vsel %vm421_vm0, %v411_v2, 0  ;;  %v414_v8 = vld [vmem:[%s368_s12 + $0x18] sm:$0xff]  ;;  %v426_v10 = vsel %vm421_vm0, %v412_v6, 0  ;;  %v429_v11 = vsel %vm421_vm0, %v413_v7, 0  ;;  %v415_v13 = vld [vmem:[%s368_s12 + $0x20] sm:$0xff]  ;;  %v416_v14 = vld [vmem:[%s368_s12 + $0x28] sm:$0xff] }
  0x48   : > { %v28630_v9 = vand.u32 4294901760, %v423_v5  ;;  %v432_v12 = vsel %vm421_vm0, %v414_v8, 0  ;;  %v28635_v15 = vpack.c.bf16 %v450_v4, %v447_v3  ;;  %v28637_v16 = vand.u32 4294901760, %v426_v10  ;;  %v417_v19 = vld [vmem:[%s368_s12 + $0x30] sm:$0xff]  ;;  %v418_v20 = vld [vmem:[%s368_s12 + $0x38] sm:$0xff]  ;;  %v1206_v8 = vld [vmem:[%s31535_s1] sm:$0xff] }
  0x49   : > { %v28639_v17 = vand.u32 4294901760, %v429_v11  ;;  %v28641_v18 = vand.u32 4294901760, %v432_v12  ;;  %v435_v22 = vsel %vm421_vm0, %v415_v13, 0  ;;  %v438_v23 = vsel %vm421_vm0, %v416_v14, 0  ;;  %s28433_s12 = smov 120   ;;  %s28437_s17 = smov 16  }
  0x4a   : > { %v28644_v21 = vsub.f32 %v423_v5, %v28630_v9  ;;  %v441_v24 = vsel %vm421_vm0, %v417_v19, 0  ;;  %27520 = vmatprep.subr.bf16.mxu0 %v28635_v15  ;;  %v28651_v25 = vsub.f32 %v426_v10, %v28637_v16  ;;  %v28659_v28 = vand.u32 4294901760, %v435_v22  ;;  %s28438_s21 = smov 32   ;;  %s28439_s24 = smov 48  }
  0x4b   : > { %v28654_v26 = vsub.f32 %v429_v11, %v28639_v17  ;;  %v28657_v27 = vsub.f32 %v432_v12, %v28641_v18  ;;  %27522 = vmatpush3.bf16.msra.mxu0 %v28635_v15  ;;  %v28663_v30 = vand.u32 4294901760, %v438_v23  ;;  %v28665_v31 = vand.u32 4294901760, %v441_v24  ;;  %s28440_s22 = smov 64   ;;  %s28441_s25 = smov 80  }
  0x4c   : > { %v515_v29 = vand.u32 4294901760, %v28644_v21  ;;  %v444_v32 = vsel %vm421_vm0, %v418_v20, 0  ;;  %v525_v33 = vand.u32 4294901760, %v28651_v25  ;;  %v28672_v36 = vsub.f32 %v435_v22, %v28659_v28  ;;  %s28442_s19 = smov 96   ;;  %s31551_s11 = smov 112  }
  0x4d   : > { %v535_v34 = vand.u32 4294901760, %v28654_v26  ;;  %v545_v35 = vand.u32 4294901760, %v28657_v27  ;;  %v28678_v38 = vsub.f32 %v438_v23, %v28663_v30  ;;  %v28681_v39 = vsub.f32 %v441_v24, %v28665_v31  ;;  %s31550_s23 = smul.u32 24, %s28615_s20  ;;  %p31614_p9 = scmp.ne.s32.totalorder %s31559_s26, 0 }
  0x4e   : > { %v516_v37 = vsub.f32 %v28644_v21, %v515_v29  ;;  %v28683_v40 = vand.u32 4294901760, %v444_v32  ;;  %v526_v41 = vsub.f32 %v28651_v25, %v525_v33  ;;  %v555_v44 = vand.u32 4294901760, %v28672_v36  ;;  %s28200_s30 = smul.u32 384, %s28420_s16 }
  0x4f   : > { %v536_v42 = vsub.f32 %v28654_v26, %v535_v34  ;;  %v546_v43 = vsub.f32 %v28657_v27, %v545_v35  ;;  %v565_v46 = vand.u32 4294901760, %v28678_v38  ;;  %v575_v47 = vand.u32 4294901760, %v28681_v39  ;;  %s30716_s29 = scalar_lea.vmem [#allocation5], %s31550_s23 }
  0x50   : > { %v517_v45 = vand.u32 4294901760, %v516_v37  ;;  %v28698_v48 = vsub.f32 %v444_v32, %v28683_v40  ;;  %v527_v49 = vand.u32 4294901760, %v526_v41  ;;  %v556_v51 = vsub.f32 %v28672_v36, %v555_v44 }
  0x51   : > { %v537_v50 = vand.u32 4294901760, %v536_v42  ;;  %v595_v52 = vsub.f32 %v419_v0, %v447_v3  ;;  %v547_v53 = vand.u32 4294901760, %v546_v43  ;;  %v566_v54 = vsub.f32 %v28678_v38, %v565_v46 }
  0x52   : > { %25891 = vmatprep.mubr.f32.mxu0 %v517_v45  ;;  %v585_v55 = vand.u32 4294901760, %v28698_v48  ;;  %v602_v56 = vsub.f32 %v420_v1, %v450_v4  ;;  %v557_v57 = vand.u32 4294901760, %v556_v51  ;;  %v576_v58 = vsub.f32 %v28681_v39, %v575_v47 }
  0x53   : > { %25892 = vmatmul.mubr.f32.vlgmr.msra.gmra.mrb[0].mxu0 %v527_v49  ;;  %v596_v59 = vand.u32 4294901760, %v595_v52  ;;  %v567_v62 = vand.u32 4294901760, %v566_v54  ;;  %vm10083_vm4 = vcmask 1042434   ;;  %vm10086_vm5 = vcmask 1043459  }
  0x54   : > { %25894 = vmatprep.mubr.f32.mxu0 %v537_v50  ;;  %v603_v60 = vand.u32 4294901760, %v602_v56  ;;  %v586_v63 = vsub.f32 %v28698_v48, %v585_v55  ;;  %v577_v2 = vand.u32 4294901760, %v576_v58  ;;  %v27527_v6 = vpack.c.bf16 %v602_v56, %v595_v52 }
  0x55   : > { %v597_v61 = vsub.f32 %v595_v52, %v596_v59  ;;  %vm13003_vm6 = vcmask 1043456   ;;  %vm13000_vm7 = vcmask 31744   ;;  %vm10541_vm8 = vcmask 261120  }
  0x56   : > { %v604_v0 = vsub.f32 %v602_v56, %v603_v60  ;;  %v587_v1 = vand.u32 4294901760, %v586_v63  ;;  %v27535_v7 = vpack.c.bf16 %v603_v60, %v596_v59  ;;  %vm10545_vm9 = vcmask 392192  }
  0x57   : > { %25895 = vmatmul.mubr.f32.gmra.mrb[2].mxu0 %v547_v53  ;;  %v598_v3 = vand.u32 4294901760, %v597_v61  ;;  %vm10549_vm10 = vcmask 523264   ;;  %vm10553_vm11 = vcmask 654336   ;;  %vm10557_vm12 = vcmask 785408  }
  0x58   : > { %25897 = vmatprep.mubr.f32.mxu0 %v557_v57  ;;  %v605_v5 = vand.u32 4294901760, %v604_v0  ;;  %vm10561_vm13 = vcmask 916480  }
  0x5a   : > { %v27523_v4 = vpack.c.bf16 %v605_v5, %v598_v3 }
  0x5b   : > { %25898 = vmatmul.mubr.f32.gmra.mrb[4].mxu0 %v567_v62 }
  0x5c   : > { %25900 = vmatprep.mubr.f32.mxu0 %v577_v2  ;;  %27524 = vmatprep.subr.bf16.mxu0 %v27523_v4 }
  0x5d   : > { %27526 = vmatpush3.bf16.msra.mxu0 %v27523_v4 }
  0x5e   : > { %27528 = vmatprep.subr.bf16.mxu0 %v27527_v6 }
  0x5f   : > { %25901 = vmatmul.mubr.f32.gmra.mrb[6].mxu0 %v587_v1 }
  0x60   : > { %25907 = vmatprep.mubr.f32.mxu0 %v28630_v9 }
  0x63   : > { %25908 = vmatmul.mubr.f32.vlgmr.msra.gmra.mrb[0].mxu0 %v28637_v16 }
  0x64   : > { %25910 = vmatprep.mubr.f32.mxu0 %v28639_v17  ;;  %27530 = vmatpush3.bf16.msra.mxu0 %v27527_v6 }
  0x65   : > { %27532 = vmatprep.subr.bf16.mxu0 %v28635_v15 }
  0x67   : > { %25911 = vmatmul.mubr.f32.gmra.mrb[2].mxu0 %v28641_v18 }
  0x68   : > { %25913 = vmatprep.mubr.f32.mxu0 %v28659_v28 }
  0x6b   : > { %25914 = vmatmul.mubr.f32.gmra.mrb[4].mxu0 %v28663_v30 }
  0x6c   : > { %25916 = vmatprep.mubr.f32.mxu0 %v28665_v31 }
  0x6f   : > { %25917 = vmatmul.mubr.f32.gmra.mrb[6].mxu0 %v28683_v40 }
  0x70   : > { %25923 = vmatprep.mubr.f32.mxu0 %v28644_v21 }
  0x73   : > { %25924 = vmatmul.mubr.f32.vlgmr.msra.gmra.mrb[0].mxu0 %v28651_v25 }
  0x74   : > { %25926 = vmatprep.mubr.f32.mxu0 %v28654_v26  ;;  %27534 = vmatpush3.bf16.msra.mxu0 %v28635_v15 }
  0x75   : > { %27536 = vmatprep.subr.bf16.mxu0 %v27535_v7 }
  0x77   : > { %25927 = vmatmul.mubr.f32.gmra.mrb[2].mxu0 %v28657_v27 }
  0x78   : > { %25929 = vmatprep.mubr.f32.mxu0 %v28672_v36 }
  0x7b   : > { %25930 = vmatmul.mubr.f32.gmra.mrb[4].mxu0 %v28678_v38 }
  0x7c   : > { %25932 = vmatprep.mubr.f32.mxu0 %v28681_v39 }
  0x7f   : > { %25933 = vmatmul.mubr.f32.gmra.mrb[6].mxu0 %v28698_v48 }
  0x80   : > { %25939 = vmatprep.mubr.f32.mxu0 %v515_v29 }
  0x83   : > { %25940 = vmatmul.mubr.f32.vlgmr.msra.gmra.mrb[0].mxu0 %v525_v33 }
  0x84   : > { %25942 = vmatprep.mubr.f32.mxu0 %v535_v34  ;;  %27538 = vmatpush3.bf16.msra.mxu0 %v27535_v7 }
  0x85   : > { %27540 = vmatprep.subr.bf16.mxu0 %v28635_v15 }
  0x87   : > { %25943 = vmatmul.mubr.f32.gmra.mrb[2].mxu0 %v545_v35 }
  0x88   : > { %25945 = vmatprep.mubr.f32.mxu0 %v555_v44 }
  0x8b   : > { %25946 = vmatmul.mubr.f32.gmra.mrb[4].mxu0 %v565_v46 }
  0x8c   : > { %25948 = vmatprep.mubr.f32.mxu0 %v575_v47 }
  0x8f   : > { %25949 = vmatmul.mubr.f32.gmra.mrb[6].mxu0 %v585_v55 }
  0x90   : > { %25955 = vmatprep.mubr.f32.mxu0 %v28630_v9 }
  0x93   : > { %25956 = vmatmul.mubr.f32.vlgmr.msra.gmra.mrb[0].mxu0 %v28637_v16 }
  0x94   : > { %25958 = vmatprep.mubr.f32.mxu0 %v28639_v17  ;;  %27542 = vmatpush3.bf16.msra.mxu0 %v28635_v15  ;;  %v1207_v15 = vld [vmem:[%s31535_s1 + $0x8] sm:$0xff] }
  0x97   : > { %25959 = vmatmul.mubr.f32.gmra.mrb[2].mxu0 %v28641_v18 }
  0x98   : > { %25961 = vmatprep.mubr.f32.mxu0 %v28659_v28 }
  0x9b   : > { %25962 = vmatmul.mubr.f32.gmra.mrb[4].mxu0 %v28663_v30 }
  0x9c   : > { %25964 = vmatprep.mubr.f32.mxu0 %v28665_v31 }
  0x9f   : > { %25965 = vmatmul.mubr.f32.gmra.mrb[6].mxu0 %v28683_v40 }
  0xa0   : > { %25971 = vmatprep.mubr.f32.mxu0 %v28630_v9  ;;  %v1209_v9 = vsel %vm421_vm0, %v1206_v8, 0 }
  0xa1   : > { %v28765_v10 = vand.u32 4294901760, %v1209_v9 }
  0xa3   : > { %25972 = vmatmul.mubr.f32.vlgmr.msra.gmra.mrb[0].mxu0 %v28637_v16  ;;  %v28768_v11 = vsub.f32 %v1209_v9, %v28765_v10  ;;  %v1212_v16 = vsel %vm421_vm0, %v1207_v15, 0 }
  0xa4   : > { %25974 = vmatprep.mubr.f32.mxu0 %v28639_v17  ;;  %v28782_v17 = vand.u32 4294901760, %v1212_v16 }
  0xa5   : > { %v28771_v12 = vand.u32 4294901760, %v28768_v11 }
  0xa7   : > { %25975 = vmatmul.mubr.f32.gmra.mrb[2].mxu0 %v28641_v18  ;;  %v1284_v13 = vsub.f32 %v28768_v11, %v28771_v12  ;;  %v28785_v18 = vsub.f32 %v1212_v16, %v28782_v17 }
  0xa8   : > { %25977 = vmatprep.mubr.f32.mxu0 %v28659_v28 }
  0xa9   : > { %v28775_v14 = vand.u32 4294901760, %v1284_v13  ;;  %v28788_v19 = vand.u32 4294901760, %v28785_v18 }
  0xab   : > { %25978 = vmatmul.mubr.f32.gmra.mrb[4].mxu0 %v28663_v30  ;;  %25987 = vmatprep.mubr.f32.mxu1 %v28775_v14  ;;  %v1294_v24 = vsub.f32 %v28785_v18, %v28788_v19 }
  0xac   : > { %25980 = vmatprep.mubr.f32.mxu0 %v28665_v31 }
  0xad   : > { %v28795_v34 = vand.u32 4294901760, %v1294_v24 }
  0xaf   : > { %25981 = vmatmul.mubr.f32.gmra.mrb[6].mxu0 %v28683_v40 }
 0x176   : > { %v25973_v20 = vpop.f32.mrb[0].mxu0 }
 0x177   : > { %v1218_v21 = vand.u32 4294901760, %v25973_v20  ;;  %v1160_v22 = vpop.f32.mrb[1].mxu0 }
 0x178   : > { %v1215_v23 = vand.u32 4294901760, %v1160_v22 }
 0x179   : > { %v1310_v25 = vsub.f32 %v25973_v20, %v1218_v21 }
 0x17a   : > { %v28792_v26 = vpack.c.bf16 %v1218_v21, %v1215_v23  ;;  %v1303_v27 = vsub.f32 %v1160_v22, %v1215_v23  ;;  %v25976_v28 = vpop.f32.mrb[2].mxu0 }
 0x17b   : > { %v1311_v29 = vand.u32 4294901760, %v1310_v25  ;;  %v1720_v30 = vand.u32 4294901760, %v25976_v28  ;;  %v1172_v31 = vpop.f32.mrb[3].mxu0 }
 0x17c   : > { %v1304_v32 = vand.u32 4294901760, %v1303_v27  ;;  %v1717_v33 = vand.u32 4294901760, %v1172_v31  ;;  %27544 = vmatprep.subr.bf16.mxu1 %v28792_v26  ;;  %v27551_v35 = vpack.c.bf16 %v1310_v25, %v1303_v27 }
 0x17d   : > { %v1312_v36 = vsub.f32 %v1310_v25, %v1311_v29  ;;  %v1812_v37 = vsub.f32 %v25976_v28, %v1720_v30  ;;  %27546 = vmatpush3.bf16.msra.mxu1 %v28792_v26 }
 0x17e   : > { %v1305_v38 = vsub.f32 %v1303_v27, %v1304_v32  ;;  %v28798_v39 = vpack.c.bf16 %v1720_v30, %v1717_v33  ;;  %v1805_v40 = vsub.f32 %v1172_v31, %v1717_v33  ;;  %v25979_v41 = vpop.f32.mrb[4].mxu0  ;;  %v27559_v42 = vpack.c.bf16 %v1311_v29, %v1304_v32 }
 0x17f   : > { %v1813_v43 = vand.u32 4294901760, %v1812_v37  ;;  %v2222_v44 = vand.u32 4294901760, %v25979_v41  ;;  %v1184_v45 = vpop.f32.mrb[5].mxu0  ;;  %v1313_v46 = vand.u32 4294901760, %v1312_v36 }
 0x180   : > { %v1806_v47 = vand.u32 4294901760, %v1805_v40  ;;  %v2219_v48 = vand.u32 4294901760, %v1184_v45  ;;  %25988 = vmatmul.mubr.f32.vlgmr.msra.gmra.mrb[0].mxu1 %v28795_v34  ;;  %v1306_v49 = vand.u32 4294901760, %v1305_v38  ;;  %v28801_v50 = vpack.c.bf16 %v1812_v37, %v1805_v40 }
 0x181   : > { %v1814_v51 = vsub.f32 %v1812_v37, %v1813_v43  ;;  %v2314_v52 = vsub.f32 %v25979_v41, %v2222_v44  ;;  %25994 = vmatprep.mubr.f32.mxu1 %v28765_v10 }
 0x182   : > { %v1807_v53 = vsub.f32 %v1805_v40, %v1806_v47  ;;  %v28804_v54 = vpack.c.bf16 %v2222_v44, %v2219_v48  ;;  %v2307_v55 = vsub.f32 %v1184_v45, %v2219_v48  ;;  %v25982_v56 = vpop.f32.mrb[6].mxu0  ;;  %v27547_v57 = vpack.c.bf16 %v1313_v46, %v1306_v49 }
 0x183   : > { %v2315_v58 = vand.u32 4294901760, %v2314_v52  ;;  %v2724_v59 = vand.u32 4294901760, %v25982_v56  ;;  %v1196_v60 = vpop.f32.mrb[7].mxu0  ;;  %v1815_v61 = vand.u32 4294901760, %v1814_v51  ;;  %v27583_v62 = vpack.c.bf16 %v1813_v43, %v1806_v47 }
 0x184   : > { %v2308_v63 = vand.u32 4294901760, %v2307_v55  ;;  %v2721_v0 = vand.u32 4294901760, %v1196_v60  ;;  %27548 = vmatprep.subr.bf16.mxu1 %v27547_v57  ;;  %v1808_v2 = vand.u32 4294901760, %v1807_v53  ;;  %v28806_v3 = vpack.c.bf16 %v2314_v52, %v2307_v55 }
 0x185   : > { %v2316_v5 = vsub.f32 %v2314_v52, %v2315_v58  ;;  %v2816_v1 = vsub.f32 %v25982_v56, %v2724_v59  ;;  %27550 = vmatpush3.bf16.msra.mxu1 %v27547_v57 }
 0x186   : > { %v2309_v4 = vsub.f32 %v2307_v55, %v2308_v63  ;;  %v28808_v6 = vpack.c.bf16 %v2724_v59, %v2721_v0  ;;  %v2809_v7 = vsub.f32 %v1196_v60, %v2721_v0  ;;  %27552 = vmatprep.subr.bf16.mxu1 %v27551_v35  ;;  %v27571_v8 = vpack.c.bf16 %v1815_v61, %v1808_v2 }
 0x187   : > { %v2817_v9 = vand.u32 4294901760, %v2816_v1  ;;  %v2317_v13 = vand.u32 4294901760, %v2316_v5  ;;  %v28810_v15 = vpack.c.bf16 %v2315_v58, %v2308_v63 }
 0x188   : > { %v2810_v16 = vand.u32 4294901760, %v2809_v7  ;;  %25995 = vmatmul.mubr.f32.vlgmr.msra.gmra.mrb[0].mxu1 %v28782_v17  ;;  %v2310_v20 = vand.u32 4294901760, %v2309_v4  ;;  %v28813_v21 = vpack.c.bf16 %v2816_v1, %v2809_v7 }
 0x189   : > { %v2818_v22 = vsub.f32 %v2816_v1, %v2817_v9  ;;  %27554 = vmatpush3.bf16.msra.mxu1 %v27551_v35  ;;  %26001 = vmatprep.mubr.f32.mxu1 %v28768_v11 }
 0x18a   : > { %v2811_v23 = vsub.f32 %v2809_v7, %v2810_v16  ;;  %27556 = vmatprep.subr.bf16.mxu1 %v28792_v26  ;;  %v27595_v24 = vpack.c.bf16 %v2317_v13, %v2310_v20  ;;  %v28817_v25 = vpack.c.bf16 %v2817_v9, %v2810_v16 }
 0x18b   : > { %v2819_v27 = vand.u32 4294901760, %v2818_v22 }
 0x18c   : > { %v2812_v28 = vand.u32 4294901760, %v2811_v23 }
 0x18e   : > { %v28819_v29 = vpack.c.bf16 %v2819_v27, %v2812_v28 }
 0x190   : > { %26002 = vmatmul.mubr.f32.vlgmr.msra.gmra.mrb[0].mxu1 %v28785_v18 }
 0x191   : > { %27558 = vmatpush3.bf16.msra.mxu1 %v28792_v26  ;;  %26008 = vmatprep.mubr.f32.mxu1 %v28771_v12 }
 0x192   : > { %27560 = vmatprep.subr.bf16.mxu1 %v27559_v42 }
 0x198   : > { %26009 = vmatmul.mubr.f32.vlgmr.msra.gmra.mrb[0].mxu1 %v28788_v19 }
 0x199   : > { %27562 = vmatpush3.bf16.msra.mxu1 %v27559_v42  ;;  %26015 = vmatprep.mubr.f32.mxu1 %v28765_v10 }
 0x19a   : > { %27564 = vmatprep.subr.bf16.mxu1 %v28792_v26 }
 0x1a0   : > { %26016 = vmatmul.mubr.f32.vlgmr.msra.gmra.mrb[0].mxu1 %v28782_v17 }
 0x1a1   : > { %27566 = vmatpush3.bf16.msra.mxu1 %v28792_v26  ;;  %26022 = vmatprep.mubr.f32.mxu1 %v28765_v10 }
 0x1a2   : > { %27568 = vmatprep.subr.bf16.mxu1 %v28798_v39 }
 0x1a8   : > { %26023 = vmatmul.mubr.f32.vlgmr.msra.gmra.mrb[0].mxu1 %v28782_v17 }
 0x1a9   : > { %27570 = vmatpush3.bf16.msra.mxu1 %v28798_v39  ;;  %26029 = vmatprep.mubr.f32.mxu1 %v28775_v14 }
 0x1aa   : > { %27572 = vmatprep.subr.bf16.mxu1 %v27571_v8 }
 0x1ac   : > { %26030 = vmatmul.mubr.f32.vlgmr.msra.gmra.mrb[2].mxu1 %v28795_v34 }
 0x1ad   : > { %27574 = vmatpush3.bf16.msra.mxu1 %v27571_v8  ;;  %26036 = vmatprep.mubr.f32.mxu1 %v28765_v10 }
 0x1ae   : > { %27576 = vmatprep.subr.bf16.mxu1 %v28801_v50 }
 0x1b4   : > { %26037 = vmatmul.mubr.f32.vlgmr.msra.gmra.mrb[2].mxu1 %v28782_v17 }
 0x1b5   : > { %27578 = vmatpush3.bf16.msra.mxu1 %v28801_v50  ;;  %26043 = vmatprep.mubr.f32.mxu1 %v28768_v11 }
 0x1b6   : > { %27580 = vmatprep.subr.bf16.mxu1 %v28798_v39 }
 0x1bc   : > { %26044 = vmatmul.mubr.f32.vlgmr.msra.gmra.mrb[2].mxu1 %v28785_v18 }
 0x1bd   : > { %27582 = vmatpush3.bf16.msra.mxu1 %v28798_v39  ;;  %26050 = vmatprep.mubr.f32.mxu1 %v28771_v12 }
 0x1be   : > { %27584 = vmatprep.subr.bf16.mxu1 %v27583_v62 }
 0x1c4   : > { %26051 = vmatmul.mubr.f32.vlgmr.msra.gmra.mrb[2].mxu1 %v28788_v19 }
 0x1c5   : > { %27586 = vmatpush3.bf16.msra.mxu1 %v27583_v62  ;;  %26057 = vmatprep.mubr.f32.mxu1 %v28765_v10 }
 0x1c6   : > { %27588 = vmatprep.subr.bf16.mxu1 %v28798_v39 }
 0x1cc   : > { %26058 = vmatmul.mubr.f32.vlgmr.msra.gmra.mrb[2].mxu1 %v28782_v17 }
 0x1cd   : > { %27590 = vmatpush3.bf16.msra.mxu1 %v28798_v39  ;;  %26064 = vmatprep.mubr.f32.mxu1 %v28765_v10 }
 0x1ce   : > { %27592 = vmatprep.subr.bf16.mxu1 %v28804_v54 }
 0x1d4   : > { %26065 = vmatmul.mubr.f32.vlgmr.msra.gmra.mrb[2].mxu1 %v28782_v17 }
 0x1d5   : > { %27594 = vmatpush3.bf16.msra.mxu1 %v28804_v54  ;;  %26071 = vmatprep.mubr.f32.mxu1 %v28775_v14 }
 0x1d6   : > { %27596 = vmatprep.subr.bf16.mxu1 %v27595_v24 }
 0x1d8   : > { %26072 = vmatmul.mubr.f32.vlgmr.msra.gmra.mrb[4].mxu1 %v28795_v34 }
 0x1d9   : > { %27598 = vmatpush3.bf16.msra.mxu1 %v27595_v24  ;;  %26078 = vmatprep.mubr.f32.mxu1 %v28765_v10 }
 0x1da   : > { %27600 = vmatprep.subr.bf16.mxu1 %v28806_v3 }
 0x1e0   : > { %26079 = vmatmul.mubr.f32.vlgmr.msra.gmra.mrb[4].mxu1 %v28782_v17 }
 0x1e1   : > { %27602 = vmatpush3.bf16.msra.mxu1 %v28806_v3  ;;  %26085 = vmatprep.mubr.f32.mxu1 %v28768_v11 }
 0x1e2   : > { %27604 = vmatprep.subr.bf16.mxu1 %v28804_v54 }
 0x1e8   : > { %26086 = vmatmul.mubr.f32.vlgmr.msra.gmra.mrb[4].mxu1 %v28785_v18 }
 0x1e9   : > { %27606 = vmatpush3.bf16.msra.mxu1 %v28804_v54  ;;  %26092 = vmatprep.mubr.f32.mxu1 %v28771_v12 }
 0x1ea   : > { %27608 = vmatprep.subr.bf16.mxu1 %v28810_v15 }
 0x1f0   : > { %26093 = vmatmul.mubr.f32.vlgmr.msra.gmra.mrb[4].mxu1 %v28788_v19 }
 0x1f1   : > { %27610 = vmatpush3.bf16.msra.mxu1 %v28810_v15  ;;  %26099 = vmatprep.mubr.f32.mxu1 %v28765_v10 }
 0x1f2   : > { %27612 = vmatprep.subr.bf16.mxu1 %v28804_v54 }
 0x1f8   : > { %26100 = vmatmul.mubr.f32.vlgmr.msra.gmra.mrb[4].mxu1 %v28782_v17 }
 0x1f9   : > { %27614 = vmatpush3.bf16.msra.mxu1 %v28804_v54  ;;  %26106 = vmatprep.mubr.f32.mxu1 %v28765_v10 }
 0x1fa   : > { %27616 = vmatprep.subr.bf16.mxu1 %v28808_v6 }
 0x200   : > { %26107 = vmatmul.mubr.f32.vlgmr.msra.gmra.mrb[4].mxu1 %v28782_v17 }
 0x201   : > { %27618 = vmatpush3.bf16.msra.mxu1 %v28808_v6  ;;  %26113 = vmatprep.mubr.f32.mxu1 %v28775_v14 }
 0x202   : > { %27620 = vmatprep.subr.bf16.mxu1 %v28819_v29 }
 0x204   : > { %26114 = vmatmul.mubr.f32.vlgmr.msra.gmra.mrb[6].mxu1 %v28795_v34 }
 0x205   : > { %27622 = vmatpush3.bf16.msra.mxu1 %v28819_v29  ;;  %26120 = vmatprep.mubr.f32.mxu1 %v28765_v10 }
 0x206   : > { %27624 = vmatprep.subr.bf16.mxu1 %v28813_v21 }
 0x20c   : > { %26121 = vmatmul.mubr.f32.vlgmr.msra.gmra.mrb[6].mxu1 %v28782_v17 }
 0x20d   : > { %27626 = vmatpush3.bf16.msra.mxu1 %v28813_v21  ;;  %26127 = vmatprep.mubr.f32.mxu1 %v28768_v11  ;;  %v3248_v11 = vld [vmem:[%s31540_s6] sm:$0xff] }
 0x20e   : > { %27628 = vmatprep.subr.bf16.mxu1 %v28808_v6 }
 0x214   : > { %26128 = vmatmul.mubr.f32.vlgmr.msra.gmra.mrb[6].mxu1 %v28785_v18 }
 0x215   : > { %27630 = vmatpush3.bf16.msra.mxu1 %v28808_v6  ;;  %26134 = vmatprep.mubr.f32.mxu1 %v28771_v12  ;;  %v28900_v12 = vand.u32 4294901760, %v3248_v11 }
 0x216   : > { %27632 = vmatprep.subr.bf16.mxu1 %v28817_v25 }
 0x217   : > { %26151 = vmatprep.subr.mxu0 %v28900_v12  ;;  %v28963_v57 = vsub.f32 %v3248_v11, %v28900_v12 }
 0x218   : > { %26152 = vmatpush3.msra.mxu0 %v28900_v12 }
 0x219   : > { %v28969_v59 = vand.u32 4294901760, %v28963_v57 }
 0x21b   : > { %v3464_v62 = vsub.f32 %v28963_v57, %v28969_v59 }
 0x21c   : > { %26135 = vmatmul.mubr.f32.vlgmr.msra.gmra.mrb[6].mxu1 %v28788_v19 }
 0x21d   : > { %27634 = vmatpush3.bf16.msra.mxu1 %v28817_v25  ;;  %26141 = vmatprep.mubr.f32.mxu1 %v28765_v10  ;;  %v3465_v0 = vand.u32 4294901760, %v3464_v62 }
 0x21e   : > { %27636 = vmatprep.subr.bf16.mxu1 %v28808_v6 }
 0x21f   : > { %26171 = vmatprep.subr.mxu0 %v3465_v0 }
 0x224   : > { %26142 = vmatmul.mubr.f32.vlgmr.msra.gmra.mrb[6].mxu1 %v28782_v17 }
 0x225   : > { %27638 = vmatpush3.bf16.msra.mxu1 %v28808_v6  ;;  %26148 = vmatprep.mubr.f32.mxu1 %v28765_v10 }
 0x22c   : > { %26149 = vmatmul.mubr.f32.vlgmr.msra.gmra.mrb[6].mxu1 %v28782_v17 }
 0x27b   : > { %v26024_v14 = vpop.f32.mrb[0].mxu1 }
 0x27c   : > { %v3250_v18 = vsel %vm3249_vm1, %v26024_v14, 0  ;;  %v28905_v19 = vpop.f32.mrb[1].mxu1 }
 0x27d   : > { %v28907_v26 = vand.u32 4294901760, %v3250_v18  ;;  %3226 = vrot.lane.b32.xlu0 %v28905_v19, %s28433_s12 }
 0x27f   : > { %v28912_v10 = vsub.f32 %v3250_v18, %v28907_v26 }
 0x281   : > { %v3342_v17 = vand.u32 4294901760, %v28912_v10 }
 0x283   : > { %v3343_v30 = vsub.f32 %v28912_v10, %v3342_v17 }
 0x285   : > { %v3344_v31 = vand.u32 4294901760, %v3343_v30 }
 0x287   : > { %26153 = vmatprep.mubr.f32.mxu0 %v3344_v31 }
 0x2a7   : > { %v26066_v32 = vpop.f32.mrb[2].mxu1 }
 0x2a8   : > { %v3252_v33 = vsel %vm3249_vm1, %v26066_v32, 0  ;;  %v28919_v34 = vpop.f32.mrb[3].mxu1 }
 0x2a9   : > { %v28921_v35 = vand.u32 4294901760, %v3252_v33  ;;  %3228 = vrot.lane.b32.xlu0 %v28919_v34, %s28433_s12 }
 0x2ab   : > { %v28926_v36 = vsub.f32 %v3252_v33, %v28921_v35 }
 0x2ad   : > { %v3352_v37 = vand.u32 4294901760, %v28926_v36  ;;  %3238 = vrot.lane.b32.xlu0 %v26024_v14, %s28433_s12 }
 0x2af   : > { %v3353_v38 = vsub.f32 %v28926_v36, %v3352_v37 }
 0x2b1   : > { %v3354_v39 = vand.u32 4294901760, %v3353_v38 }
 0x2b3   : > { %26154 = vmatmul.mubr.f32.vlgmr.msra.gmra.mrb[8].mxu0 %v3354_v39 }
 0x2b4   : > { %26172 = vmatpush3.msra.mxu0 %v3465_v0 }
 0x2b5   : > { %26191 = vmatprep.subr.mxu0 %v28963_v57 }
 0x2d3   : > { %v26108_v40 = vpop.f32.mrb[4].mxu1 }
 0x2d4   : > { %v3254_v41 = vsel %vm3249_vm1, %v26108_v40, 0  ;;  %3242 = vrot.lane.b32.xlu0 %v26108_v40, %s28433_s12  ;;  %v28935_v42 = vpop.f32.mrb[5].mxu1 }
 0x2d5   : > { %v28937_v43 = vand.u32 4294901760, %v3254_v41  ;;  %3230 = vrot.lane.b32.xlu1 %v28935_v42, %s28433_s12 }
 0x2d7   : > { %v28942_v44 = vsub.f32 %v3254_v41, %v28937_v43 }
 0x2d9   : > { %v3362_v45 = vand.u32 4294901760, %v28942_v44 }
 0x2db   : > { %v3363_v46 = vsub.f32 %v28942_v44, %v3362_v45 }
 0x2dd   : > { %v3364_v47 = vand.u32 4294901760, %v3363_v46 }
 0x2df   : > { %26156 = vmatprep.mubr.f32.mxu0 %v3364_v47 }
 0x2ef   : > { %v3227_v48 = vpop.permute.xlu0 %3226 }
 0x2f0   : > { %v3258_v49 = vsel %vm3249_vm1, %v3227_v48, 0 }
 0x2f1   : > { %v28949_v50 = vand.u32 4294901760, %v3258_v49 }
 0x2f3   : > { %v28952_v51 = vsub.f32 %v3258_v49, %v28949_v50 }
 0x2f5   : > { %v3382_v56 = vand.u32 4294901760, %v28952_v51 }
 0x2f7   : > { %v3383_v61 = vsub.f32 %v28952_v51, %v3382_v56 }
 0x2f9   : > { %v3384_v3 = vand.u32 4294901760, %v3383_v61 }
 0x2ff   : > { %v26150_v52 = vpop.f32.mrb[6].mxu1 }
 0x300   : > { %v3256_v53 = vsel %vm3249_vm1, %v26150_v52, 0  ;;  %v28955_v54 = vpop.f32.mrb[7].mxu1 }
 0x301   : > { %v28957_v55 = vand.u32 4294901760, %v3256_v53  ;;  %3232 = vrot.lane.b32.xlu1 %v28955_v54, %s28433_s12 }
 0x303   : > { %v28966_v58 = vsub.f32 %v3256_v53, %v28957_v55 }
 0x305   : > { %3240 = vrot.lane.b32.xlu1 %v26066_v32, %s28433_s12  ;;  %v3372_v60 = vand.u32 4294901760, %v28966_v58 }
 0x307   : > { %v3373_v63 = vsub.f32 %v28966_v58, %v3372_v60 }
 0x309   : > { %3244 = vrot.lane.b32.xlu1 %v26150_v52, %s28433_s12  ;;  %v3374_v2 = vand.u32 4294901760, %v3373_v63  ;;  %s28436_s12 = smov 124  }
 0x30b   : > { %26157 = vmatmul.mubr.f32.gmra.mrb[10].mxu0 %v3374_v2 }
 0x30c   : > { %26159 = vmatprep.mubr.f32.mxu0 %v3384_v3 }
 0x31b   : > { %v3229_v5 = vpop.permute.xlu0 %3228 }
 0x31c   : > { %v3260_v1 = vsel %vm3249_vm1, %v3229_v5, 0 }
 0x31d   : > { %v28984_v4 = vand.u32 4294901760, %v3260_v1 }
 0x31f   : > { %v28987_v6 = vsub.f32 %v3260_v1, %v28984_v4  ;;  %v3239_v24 = vpop.permute.xlu0 %3238 }
 0x320   : > { %v3266_v25 = vsel %vm3249_vm1, %v3239_v24, 0 }
 0x321   : > { %v3392_v7 = vand.u32 4294901760, %v28987_v6  ;;  %v29004_v28 = vand.u32 4294901760, %v3266_v25 }
 0x323   : > { %v3393_v8 = vsub.f32 %v28987_v6, %v3392_v7  ;;  %v29008_v11 = vsub.f32 %v3266_v25, %v29004_v28 }
 0x325   : > { %v3394_v9 = vand.u32 4294901760, %v3393_v8  ;;  %v3422_v32 = vand.u32 4294901760, %v29008_v11 }
 0x327   : > { %26160 = vmatmul.mubr.f32.gmra.mrb[12].mxu0 %v3394_v9  ;;  %v3423_v48 = vsub.f32 %v29008_v11, %v3422_v32 }
 0x329   : > { %v3424_v2 = vand.u32 4294901760, %v3423_v48 }
 0x346   : > { %v3243_v27 = vpop.permute.xlu0 %3242 }
 0x347   : > { %v3231_v13 = vpop.permute.xlu1 %3230  ;;  %v3270_v29 = vsel %vm3249_vm1, %v3243_v27, 0 }
 0x348   : > { %v3262_v15 = vsel %vm3249_vm1, %v3231_v13, 0  ;;  %v29010_v14 = vand.u32 4294901760, %v3270_v29 }
 0x349   : > { %v28994_v16 = vand.u32 4294901760, %v3262_v15 }
 0x34a   : > { %v29017_v33 = vsub.f32 %v3270_v29, %v29010_v14 }
 0x34b   : > { %v28997_v20 = vsub.f32 %v3262_v15, %v28994_v16 }
 0x34c   : > { %v3442_v47 = vand.u32 4294901760, %v29017_v33 }
 0x34d   : > { %v3402_v21 = vand.u32 4294901760, %v28997_v20 }
 0x34e   : > { %v3443_v3 = vsub.f32 %v29017_v33, %v3442_v47 }
 0x34f   : > { %v3403_v22 = vsub.f32 %v28997_v20, %v3402_v21 }
 0x350   : > { %v3444_v13 = vand.u32 4294901760, %v3443_v3 }
 0x351   : > { %v3404_v23 = vand.u32 4294901760, %v3403_v22 }
 0x353   : > { %26162 = vmatprep.mubr.f32.mxu0 %v3404_v23 }
 0x373   : > { %v3233_v18 = vpop.permute.xlu1 %3232 }
 0x374   : > { %v3264_v30 = vsel %vm3249_vm1, %v3233_v18, 0 }
 0x375   : > { %v29013_v31 = vand.u32 4294901760, %v3264_v30 }
 0x377   : > { %v29020_v38 = vsub.f32 %v3264_v30, %v29013_v31  ;;  %v3241_v39 = vpop.permute.xlu1 %3240 }
 0x378   : > { %v3268_v40 = vsel %vm3249_vm1, %v3241_v39, 0 }
 0x379   : > { %v3412_v41 = vand.u32 4294901760, %v29020_v38  ;;  %v29024_v46 = vand.u32 4294901760, %v3268_v40 }
 0x37b   : > { %v3431_v49 = vsub.f32 %v3268_v40, %v29024_v46  ;;  %v3245_v52 = vpop.permute.xlu1 %3244  ;;  %v3413_v53 = vsub.f32 %v29020_v38, %v3412_v41 }
 0x37c   : > { %v3272_v61 = vsel %vm3249_vm1, %v3245_v52, 0 }
 0x37d   : > { %v3432_v62 = vand.u32 4294901760, %v3431_v49  ;;  %v29033_v63 = vand.u32 4294901760, %v3272_v61  ;;  %v3414_v0 = vand.u32 4294901760, %v3413_v53 }
 0x37f   : > { %v3451_v5 = vsub.f32 %v3272_v61, %v29033_v63  ;;  %26163 = vmatmul.mubr.f32.gmra.mrb[14].mxu0 %v3414_v0  ;;  %v3433_v1 = vsub.f32 %v3431_v49, %v3432_v62 }
 0x380   : > { %26165 = vmatprep.mubr.f32.mxu0 %v3424_v2 }
 0x381   : > { %v3452_v8 = vand.u32 4294901760, %v3451_v5  ;;  %v3434_v9 = vand.u32 4294901760, %v3433_v1 }
 0x383   : > { %26166 = vmatmul.mubr.f32.gmra.mrb[16].mxu0 %v3434_v9  ;;  %v3453_v15 = vsub.f32 %v3451_v5, %v3452_v8 }
 0x384   : > { %26168 = vmatprep.mubr.f32.mxu0 %v3444_v13 }
 0x385   : > { %v3454_v22 = vand.u32 4294901760, %v3453_v15  ;;  %v10603_v15 = vsel %vm3249_vm1, %v28905_v19, 0 }
 0x387   : > { %26169 = vmatmul.mubr.f32.gmra.mrb[18].mxu0 %v3454_v22 }
 0x388   : > { %26173 = vmatprep.mubr.f32.mxu0 %v28907_v26 }
 0x38b   : > { %26174 = vmatmul.mubr.f32.vlgmr.msra.gmra.mrb[8].mxu0 %v28921_v35 }
 0x38c   : > { %26176 = vmatprep.mubr.f32.mxu0 %v28937_v43  ;;  %26192 = vmatpush3.msra.mxu0 %v28963_v57 }
 0x38d   : > { %26211 = vmatprep.subr.mxu0 %v28900_v12 }
 0x38f   : > { %26177 = vmatmul.mubr.f32.gmra.mrb[10].mxu0 %v28957_v55 }
 0x390   : > { %26179 = vmatprep.mubr.f32.mxu0 %v28949_v50 }
 0x393   : > { %26180 = vmatmul.mubr.f32.gmra.mrb[12].mxu0 %v28984_v4 }
 0x394   : > { %26182 = vmatprep.mubr.f32.mxu0 %v28994_v16 }
 0x397   : > { %26183 = vmatmul.mubr.f32.gmra.mrb[14].mxu0 %v29013_v31 }
 0x398   : > { %26185 = vmatprep.mubr.f32.mxu0 %v29004_v28 }
 0x39b   : > { %26186 = vmatmul.mubr.f32.gmra.mrb[16].mxu0 %v29024_v46 }
 0x39c   : > { %26188 = vmatprep.mubr.f32.mxu0 %v29010_v14 }
 0x39f   : > { %26189 = vmatmul.mubr.f32.gmra.mrb[18].mxu0 %v29033_v63 }
 0x3a0   : > { %26193 = vmatprep.mubr.f32.mxu0 %v28912_v10 }
 0x3a3   : > { %26194 = vmatmul.mubr.f32.vlgmr.msra.gmra.mrb[8].mxu0 %v28926_v36 }
 0x3a4   : > { %26196 = vmatprep.mubr.f32.mxu0 %v28942_v44  ;;  %26212 = vmatpush3.msra.mxu0 %v28900_v12 }
 0x3a5   : > { %26231 = vmatprep.subr.mxu0 %v28969_v59 }
 0x3a7   : > { %26197 = vmatmul.mubr.f32.gmra.mrb[10].mxu0 %v28966_v58 }
 0x3a8   : > { %26199 = vmatprep.mubr.f32.mxu0 %v28952_v51 }
 0x3ab   : > { %26200 = vmatmul.mubr.f32.gmra.mrb[12].mxu0 %v28987_v6 }
 0x3ac   : > { %26202 = vmatprep.mubr.f32.mxu0 %v28997_v20 }
 0x3af   : > { %26203 = vmatmul.mubr.f32.gmra.mrb[14].mxu0 %v29020_v38 }
 0x3b0   : > { %26205 = vmatprep.mubr.f32.mxu0 %v29008_v11 }
 0x3b3   : > { %26206 = vmatmul.mubr.f32.gmra.mrb[16].mxu0 %v3431_v49 }
 0x3b4   : > { %26208 = vmatprep.mubr.f32.mxu0 %v29017_v33 }
 0x3b7   : > { %26209 = vmatmul.mubr.f32.gmra.mrb[18].mxu0 %v3451_v5 }
 0x3b8   : > { %26213 = vmatprep.mubr.f32.mxu0 %v3342_v17 }
 0x3bb   : > { %26214 = vmatmul.mubr.f32.vlgmr.msra.gmra.mrb[8].mxu0 %v3352_v37 }
 0x3bc   : > { %26216 = vmatprep.mubr.f32.mxu0 %v3362_v45  ;;  %26232 = vmatpush3.msra.mxu0 %v28969_v59 }
 0x3bd   : > { %26251 = vmatprep.subr.mxu0 %v28900_v12 }
 0x3bf   : > { %26217 = vmatmul.mubr.f32.gmra.mrb[10].mxu0 %v3372_v60 }
 0x3c0   : > { %26219 = vmatprep.mubr.f32.mxu0 %v3382_v56 }
 0x3c3   : > { %26220 = vmatmul.mubr.f32.gmra.mrb[12].mxu0 %v3392_v7 }
 0x3c4   : > { %26222 = vmatprep.mubr.f32.mxu0 %v3402_v21 }
 0x3c7   : > { %26223 = vmatmul.mubr.f32.gmra.mrb[14].mxu0 %v3412_v41 }
 0x3c8   : > { %26225 = vmatprep.mubr.f32.mxu0 %v3422_v32 }
 0x3cb   : > { %26226 = vmatmul.mubr.f32.gmra.mrb[16].mxu0 %v3432_v62 }
 0x3cc   : > { %26228 = vmatprep.mubr.f32.mxu0 %v3442_v47 }
 0x3cf   : > { %26229 = vmatmul.mubr.f32.gmra.mrb[18].mxu0 %v3452_v8 }
 0x3d0   : > { %26233 = vmatprep.mubr.f32.mxu0 %v28907_v26 }
 0x3d3   : > { %26234 = vmatmul.mubr.f32.vlgmr.msra.gmra.mrb[8].mxu0 %v28921_v35 }
 0x3d4   : > { %26236 = vmatprep.mubr.f32.mxu0 %v28937_v43  ;;  %26252 = vmatpush3.msra.mxu0 %v28900_v12  ;;  %v3246_v12 = vld [vmem:[%s31539_s5] sm:$0xff] }
 0x3d7   : > { %26237 = vmatmul.mubr.f32.gmra.mrb[10].mxu0 %v28957_v55 }
 0x3d8   : > { %26239 = vmatprep.mubr.f32.mxu0 %v28949_v50 }
 0x3db   : > { %26240 = vmatmul.mubr.f32.gmra.mrb[12].mxu0 %v28984_v4 }
 0x3dc   : > { %26242 = vmatprep.mubr.f32.mxu0 %v28994_v16 }
 0x3df   : > { %26243 = vmatmul.mubr.f32.gmra.mrb[14].mxu0 %v29013_v31 }
 0x3e0   : > { %26245 = vmatprep.mubr.f32.mxu0 %v29004_v28 }
 0x3e3   : > { %26246 = vmatmul.mubr.f32.gmra.mrb[16].mxu0 %v29024_v46 }
 0x3e4   : > { %26248 = vmatprep.mubr.f32.mxu0 %v29010_v14 }
 0x3e7   : > { %26249 = vmatmul.mubr.f32.gmra.mrb[18].mxu0 %v29033_v63 }
 0x3e8   : > { %26253 = vmatprep.mubr.f32.mxu0 %v28907_v26  ;;  %v4194_v26 = vsel %vm3249_vm1, %v3246_v12, 0  ;;  %v10602_v12 = vld [vmem:[%s31538_s4] sm:$0xff] }
 0x3e9   : > { %v29110_v10 = vand.u32 4294901760, %v4194_v26  ;;  %v29275_v19 = vand.u32 4294901760, %v10602_v12 }
 0x3eb   : > { %26254 = vmatmul.mubr.f32.vlgmr.msra.gmra.mrb[8].mxu0 %v28921_v35  ;;  %v29113_v17 = vsub.f32 %v4194_v26, %v29110_v10  ;;  %v29271_v26 = vand.u32 4294901760, %v10603_v15 }
 0x3ec   : > { %26256 = vmatprep.mubr.f32.mxu0 %v28937_v43  ;;  %v3247_v43 = vld [vmem:[%s31539_s5 + $0x8] sm:$0xff] }
 0x3ed   : > { %v29116_v35 = vand.u32 4294901760, %v29113_v17  ;;  %v4197_v44 = vsel %vm3249_vm1, %v3247_v43, 0  ;;  %v10607_v43 = vsel %vm3249_vm1, %v28935_v42, 0  ;;  %v10719_v42 = vsub.f32 %v10602_v12, %v29275_v19 }
 0x3ee   : > { %v29128_v45 = vand.u32 4294901760, %v4197_v44 }
 0x3ef   : > { %26257 = vmatmul.mubr.f32.gmra.mrb[10].mxu0 %v28957_v55  ;;  %v4268_v36 = vsub.f32 %v29113_v17, %v29116_v35 }
 0x3f0   : > { %26259 = vmatprep.mubr.f32.mxu0 %v28949_v50  ;;  %v29131_v50 = vsub.f32 %v4197_v44, %v29128_v45 }
 0x3f1   : > { %v29120_v37 = vand.u32 4294901760, %v4268_v36  ;;  %v10605_v36 = vsel %vm3249_vm1, %v28919_v34, 0  ;;  %v29288_v34 = vand.u32 4294901760, %v10607_v43 }
 0x3f2   : > { %v29134_v51 = vand.u32 4294901760, %v29131_v50 }
 0x3f3   : > { %26260 = vmatmul.mubr.f32.gmra.mrb[12].mxu0 %v28984_v4  ;;  %26273 = vmatprep.mubr.f32.mxu1 %v29120_v37 }
 0x3f4   : > { %26262 = vmatprep.mubr.f32.mxu0 %v28994_v16  ;;  %v4278_v55 = vsub.f32 %v29131_v50, %v29134_v51 }
 0x3f6   : > { %v29138_v59 = vand.u32 4294901760, %v4278_v55  ;;  %v29282_v55 = vand.u32 4294901760, %v10605_v36 }
 0x3f7   : > { %26263 = vmatmul.mubr.f32.gmra.mrb[14].mxu0 %v29013_v31 }
 0x3f8   : > { %26265 = vmatprep.mubr.f32.mxu0 %v29004_v28 }
 0x3fb   : > { %26266 = vmatmul.mubr.f32.gmra.mrb[16].mxu0 %v29024_v46 }
 0x3fc   : > { %26268 = vmatprep.mubr.f32.mxu0 %v29010_v14 }
 0x3ff   : > { %26269 = vmatmul.mubr.f32.gmra.mrb[18].mxu0 %v29033_v63 }
 0x400   : > { %26453 = vmatprep.mubr.f32.mxu0 %v29120_v37 }
 0x4be   : > { %v26255_v56 = vpop.f32.mrb[8].mxu0 }
 0x4bf   : > { %v4123_v57 = vpop.f32.mrb[9].mxu0  ;;  %v29166_v33 = vand.u32 4294901760, %v26255_v56 }
 0x4c0   : > { %v4200_v58 = vand.u32 4294901760, %v4123_v57 }
 0x4c1   : > { %v4776_v38 = vsub.f32 %v26255_v56, %v29166_v33  ;;  %v29286_v56 = vsub.f32 %v10603_v15, %v29271_v26 }
 0x4c2   : > { %v4287_v60 = vsub.f32 %v4123_v57, %v4200_v58  ;;  %v29140_v4 = vpop.f32.mrb[10].mxu0  ;;  %26271 = vmatprep.subr.mxu1 %v4200_v58  ;;  %v10609_v57 = vsel %vm3249_vm1, %v28955_v54, 0 }
 0x4c3   : > { %v29142_v6 = vpop.f32.mrb[11].mxu0  ;;  %26272 = vmatpush3.msra.mxu1 %v4200_v58  ;;  %v4777_v39 = vand.u32 4294901760, %v4776_v38  ;;  %v29250_v9 = vand.u32 4294901760, %v29140_v4  ;;  %v10679_v54 = vand.u32 4294901760, %v29286_v56 }
 0x4c4   : > { %26274 = vmatmul.mubr.f32.vlgmr.msra.gmra.mrb[8].mxu1 %v29138_v59  ;;  %v4288_v7 = vand.u32 4294901760, %v4287_v60  ;;  %v29204_v53 = vand.u32 4294901760, %v29142_v6 }
 0x4c5   : > { %26278 = vmatprep.mubr.f32.mxu1 %v29110_v10  ;;  %v4778_v41 = vsub.f32 %v4776_v38, %v4777_v39  ;;  %v5754_v13 = vsub.f32 %v29140_v4, %v29250_v9  ;;  %v29299_v4 = vand.u32 4294901760, %v10609_v57 }
 0x4c6   : > { %v29146_v16 = vpop.f32.mrb[12].mxu0  ;;  %v4289_v20 = vsub.f32 %v4287_v60, %v4288_v7  ;;  %v5265_v61 = vsub.f32 %v29142_v6, %v29204_v53  ;;  %v29302_v6 = vsub.f32 %v10607_v43, %v29288_v34 }
 0x4c7   : > { %v29148_v21 = vpop.f32.mrb[13].mxu0  ;;  %v4779_v47 = vand.u32 4294901760, %v4778_v41  ;;  %v29263_v22 = vand.u32 4294901760, %v5754_v13 }
 0x4c8   : > { %v4290_v23 = vand.u32 4294901760, %v4289_v20  ;;  %v5266_v62 = vand.u32 4294901760, %v5265_v61  ;;  %v6156_v41 = vand.u32 4294901760, %v29148_v21 }
 0x4c9   : > { %v5756_v44 = vsub.f32 %v5754_v13, %v29263_v22 }
 0x4ca   : > { %v29150_v24 = vpop.f32.mrb[14].mxu0  ;;  %26276 = vmatprep.subr.mxu1 %v4290_v23  ;;  %v5267_v0 = vsub.f32 %v5265_v61, %v5266_v62 }
 0x4cb   : > { %v4159_v25 = vpop.f32.mrb[15].mxu0  ;;  %26277 = vmatpush3.msra.mxu1 %v4290_v23  ;;  %v29312_v23 = vsub.f32 %v10609_v57, %v29299_v4 }
 0x4cc   : > { %v7134_v27 = vand.u32 4294901760, %v4159_v25  ;;  %26279 = vmatmul.mubr.f32.vlgmr.msra.gmra.mrb[8].mxu1 %v29128_v45  ;;  %26281 = vmatprep.subr.mxu1 %v4287_v60  ;;  %v5268_v3 = vand.u32 4294901760, %v5267_v0 }
 0x4cd   : > { %26282 = vmatpush3.msra.mxu1 %v4287_v60  ;;  %26283 = vmatprep.mubr.f32.mxu1 %v29113_v17  ;;  %v29297_v60 = vsub.f32 %v10605_v36, %v29282_v55 }
 0x4ce   : > { %v7221_v28 = vsub.f32 %v4159_v25, %v7134_v27  ;;  %v29154_v29 = vpop.f32.mrb[16].mxu0  ;;  %26286 = vmatprep.subr.mxu1 %v4200_v58  ;;  %26451 = vmatprep.subr.mxu0 %v7134_v27  ;;  %v10680_v25 = vsub.f32 %v29286_v56, %v10679_v54 }
 0x4cf   : > { %v4171_v11 = vpop.f32.mrb[17].mxu0  ;;  %26452 = vmatpush3.msra.mxu0 %v7134_v27  ;;  %v10689_v20 = vand.u32 4294901760, %v29297_v60 }
 0x4d0   : > { %26454 = vmatmul.mubr.f32.vlgmr.msra.gmra.mrb[20].mxu0 %v29138_v59  ;;  %v7222_v14 = vand.u32 4294901760, %v7221_v28  ;;  %v29176_v40 = vand.u32 4294901760, %v4171_v11 }
 0x4d1   : > { %26458 = vmatprep.mubr.f32.mxu0 %v29110_v10 }
 0x4d2   : > { %v29158_v18 = vpop.f32.mrb[18].mxu0  ;;  %v7223_v30 = vsub.f32 %v7221_v28, %v7222_v14  ;;  %v8199_v46 = vsub.f32 %v4171_v11, %v29176_v40  ;;  %v10690_v11 = vsub.f32 %v29297_v60, %v10689_v20 }
 0x4d3   : > { %v29160_v31 = vpop.f32.mrb[19].mxu0 }
 0x4d4   : > { %26284 = vmatmul.mubr.f32.vlgmr.msra.gmra.mrb[8].mxu1 %v29131_v50  ;;  %v7224_v32 = vand.u32 4294901760, %v7223_v30  ;;  %v8200_v48 = vand.u32 4294901760, %v8199_v46  ;;  %v29219_v63 = vand.u32 4294901760, %v29160_v31  ;;  %v10681_v30 = vand.u32 4294901760, %v10680_v25 }
 0x4d5   : > { %26287 = vmatpush3.msra.mxu1 %v4200_v58  ;;  %26288 = vmatprep.mubr.f32.mxu1 %v29116_v35 }
 0x4d6   : > { %26291 = vmatprep.subr.mxu1 %v4288_v7  ;;  %26456 = vmatprep.subr.mxu0 %v7224_v32  ;;  %v8201_v49 = vsub.f32 %v8199_v46, %v8200_v48  ;;  %v9177_v2 = vsub.f32 %v29160_v31, %v29219_v63 }
 0x4d7   : > { %26457 = vmatpush3.msra.mxu0 %v7224_v32 }
 0x4d8   : > { %26459 = vmatmul.mubr.f32.vlgmr.msra.gmra.mrb[20].mxu0 %v29128_v45  ;;  %26461 = vmatprep.subr.mxu0 %v7221_v28  ;;  %v8202_v52 = vand.u32 4294901760, %v8201_v49  ;;  %v9178_v5 = vand.u32 4294901760, %v9177_v2  ;;  %v6645_v49 = vand.u32 4294901760, %v29146_v16 }
 0x4d9   : > { %26462 = vmatpush3.msra.mxu0 %v7221_v28  ;;  %26463 = vmatprep.mubr.f32.mxu0 %v29113_v17 }
 0x4da   : > { %26466 = vmatprep.subr.mxu0 %v7134_v27  ;;  %v9179_v1 = vsub.f32 %v9177_v2, %v9178_v5 }
 0x4dc   : > { %26289 = vmatmul.mubr.f32.vlgmr.msra.gmra.mrb[8].mxu1 %v29134_v51  ;;  %v9180_v8 = vand.u32 4294901760, %v9179_v1 }
 0x4dd   : > { %26292 = vmatpush3.msra.mxu1 %v4288_v7  ;;  %26293 = vmatprep.mubr.f32.mxu1 %v29110_v10  ;;  %v29305_v7 = vand.u32 4294901760, %v10719_v42 }
 0x4de   : > { %26296 = vmatprep.subr.mxu1 %v4200_v58 }
 0x4df   : > { %v10721_v28 = vsub.f32 %v10719_v42, %v29305_v7 }
 0x4e0   : > { %26464 = vmatmul.mubr.f32.vlgmr.msra.gmra.mrb[20].mxu0 %v29131_v50 }
 0x4e1   : > { %26467 = vmatpush3.msra.mxu0 %v7134_v27  ;;  %26468 = vmatprep.mubr.f32.mxu0 %v29116_v35  ;;  %v10722_v32 = vand.u32 4294901760, %v10721_v28 }
 0x4e2   : > { %26471 = vmatprep.subr.mxu0 %v7222_v14 }
 0x4e4   : > { %26294 = vmatmul.mubr.f32.vlgmr.msra.gmra.mrb[8].mxu1 %v29128_v45 }
 0x4e5   : > { %26297 = vmatpush3.msra.mxu1 %v4200_v58  ;;  %26298 = vmatprep.mubr.f32.mxu1 %v29110_v10  ;;  %v5757_v58 = vand.u32 4294901760, %v5756_v44 }
 0x4e6   : > { %26301 = vmatprep.subr.mxu1 %v29166_v33 }
 0x4e8   : > { %26469 = vmatmul.mubr.f32.vlgmr.msra.gmra.mrb[20].mxu0 %v29134_v51 }
 0x4e9   : > { %26472 = vmatpush3.msra.mxu0 %v7222_v14  ;;  %26473 = vmatprep.mubr.f32.mxu0 %v29110_v10  ;;  %v10709_v14 = vand.u32 4294901760, %v29312_v23 }
 0x4ea   : > { %26476 = vmatprep.subr.mxu0 %v7134_v27 }
 0x4ec   : > { %26299 = vmatmul.mubr.f32.vlgmr.msra.gmra.mrb[8].mxu1 %v29128_v45 }
 0x4ed   : > { %26302 = vmatpush3.msra.mxu1 %v29166_v33  ;;  %26303 = vmatprep.mubr.f32.mxu1 %v29120_v37 }
 0x4ee   : > { %26306 = vmatprep.subr.mxu1 %v4779_v47 }
 0x4f0   : > { %26304 = vmatmul.mubr.f32.vlgmr.msra.gmra.mrb[10].mxu1 %v29138_v59  ;;  %26474 = vmatmul.mubr.f32.vlgmr.msra.gmra.mrb[20].mxu0 %v29128_v45 }
 0x4f1   : > { %26307 = vmatpush3.msra.mxu1 %v4779_v47  ;;  %26477 = vmatpush3.msra.mxu0 %v7134_v27  ;;  %v10699_v27 = vand.u32 4294901760, %v29302_v6 }
 0x4f2   : > { %26311 = vmatprep.subr.mxu1 %v4776_v38  ;;  %26511 = vmatprep.subr.mxu0 %v29176_v40 }
 0x4f3   : > { %26308 = vmatprep.mubr.f32.mxu1 %v29110_v10  ;;  %26478 = vmatprep.mubr.f32.mxu0 %v29110_v10  ;;  %v10700_v31 = vsub.f32 %v29302_v6, %v10699_v27 }
 0x4f8   : > { %26309 = vmatmul.mubr.f32.vlgmr.msra.gmra.mrb[10].mxu1 %v29128_v45  ;;  %26479 = vmatmul.mubr.f32.vlgmr.msra.gmra.mrb[20].mxu0 %v29128_v45 }
 0x4f9   : > { %26312 = vmatpush3.msra.mxu1 %v4776_v38  ;;  %26512 = vmatpush3.msra.mxu0 %v29176_v40  ;;  %v10710_v38 = vsub.f32 %v29312_v23, %v10709_v14 }
 0x4fa   : > { %26316 = vmatprep.subr.mxu1 %v29166_v33  ;;  %26516 = vmatprep.subr.mxu0 %v8202_v52 }
 0x4fb   : > { %26513 = vmatprep.mubr.f32.mxu0 %v29120_v37  ;;  %26313 = vmatprep.mubr.f32.mxu1 %v29113_v17 }
 0x4fc   : > { %26514 = vmatmul.mubr.f32.vlgmr.msra.gmra.mrb[22].mxu0 %v29138_v59 }
 0x4fd   : > { %26517 = vmatpush3.msra.mxu0 %v8202_v52  ;;  %26518 = vmatprep.mubr.f32.mxu0 %v29110_v10  ;;  %v6732_v52 = vsub.f32 %v29146_v16, %v6645_v49  ;;  %v29387_v16 = vand.u32 4294901760, %v29150_v24 }
 0x4fe   : > { %26521 = vmatprep.subr.mxu0 %v8199_v46 }
 0x500   : > { %26314 = vmatmul.mubr.f32.vlgmr.msra.gmra.mrb[10].mxu1 %v29131_v50 }
 0x501   : > { %26317 = vmatpush3.msra.mxu1 %v29166_v33  ;;  %26318 = vmatprep.mubr.f32.mxu1 %v29116_v35 }
 0x502   : > { %26321 = vmatprep.subr.mxu1 %v4777_v39 }
 0x504   : > { %26519 = vmatmul.mubr.f32.vlgmr.msra.gmra.mrb[22].mxu0 %v29128_v45 }
 0x505   : > { %26522 = vmatpush3.msra.mxu0 %v8199_v46  ;;  %26523 = vmatprep.mubr.f32.mxu0 %v29113_v17  ;;  %v6243_v46 = vsub.f32 %v29148_v21, %v6156_v41 }
 0x506   : > { %26526 = vmatprep.subr.mxu0 %v29176_v40 }
 0x507   : > { %v6244_v47 = vand.u32 4294901760, %v6243_v46 }
 0x508   : > { %26319 = vmatmul.mubr.f32.vlgmr.msra.gmra.mrb[10].mxu1 %v29134_v51 }
 0x509   : > { %26322 = vmatpush3.msra.mxu1 %v4777_v39  ;;  %26323 = vmatprep.mubr.f32.mxu1 %v29110_v10  ;;  %v10701_v39 = vand.u32 4294901760, %v10700_v31  ;;  %v6245_v21 = vsub.f32 %v6243_v46, %v6244_v47 }
 0x50a   : > { %26326 = vmatprep.subr.mxu1 %v29166_v33 }
 0x50c   : > { %26524 = vmatmul.mubr.f32.vlgmr.msra.gmra.mrb[22].mxu0 %v29131_v50 }
 0x50d   : > { %26527 = vmatpush3.msra.mxu0 %v29176_v40  ;;  %26528 = vmatprep.mubr.f32.mxu0 %v29116_v35 }
 0x50e   : > { %26531 = vmatprep.subr.mxu0 %v8200_v48 }
 0x510   : > { %26324 = vmatmul.mubr.f32.vlgmr.msra.gmra.mrb[10].mxu1 %v29128_v45 }
 0x511   : > { %26327 = vmatpush3.msra.mxu1 %v29166_v33  ;;  %26328 = vmatprep.mubr.f32.mxu1 %v29110_v10  ;;  %v10691_v33 = vand.u32 4294901760, %v10690_v11 }
 0x512   : > { %26331 = vmatprep.subr.mxu1 %v29204_v53 }
 0x514   : > { %26529 = vmatmul.mubr.f32.vlgmr.msra.gmra.mrb[22].mxu0 %v29134_v51 }
 0x515   : > { %26532 = vmatpush3.msra.mxu0 %v8200_v48  ;;  %26533 = vmatprep.mubr.f32.mxu0 %v29110_v10  ;;  %v6246_v48 = vand.u32 4294901760, %v6245_v21 }
 0x516   : > { %26536 = vmatprep.subr.mxu0 %v29176_v40 }
 0x518   : > { %26329 = vmatmul.mubr.f32.vlgmr.msra.gmra.mrb[10].mxu1 %v29128_v45 }
 0x519   : > { %26332 = vmatpush3.msra.mxu1 %v29204_v53  ;;  %26333 = vmatprep.mubr.f32.mxu1 %v29120_v37 }
 0x51a   : > { %26336 = vmatprep.subr.mxu1 %v5268_v3 }
 0x51c   : > { %26334 = vmatmul.mubr.f32.vlgmr.msra.gmra.mrb[12].mxu1 %v29138_v59  ;;  %26534 = vmatmul.mubr.f32.vlgmr.msra.gmra.mrb[22].mxu0 %v29128_v45 }
 0x51d   : > { %26337 = vmatpush3.msra.mxu1 %v5268_v3  ;;  %26537 = vmatpush3.msra.mxu0 %v29176_v40  ;;  %v10711_v40 = vand.u32 4294901760, %v10710_v38 }
 0x51e   : > { %26341 = vmatprep.subr.mxu1 %v5265_v61  ;;  %26571 = vmatprep.subr.mxu0 %v29219_v63 }
 0x51f   : > { %26338 = vmatprep.mubr.f32.mxu1 %v29110_v10  ;;  %26538 = vmatprep.mubr.f32.mxu0 %v29110_v10 }
 0x524   : > { %26339 = vmatmul.mubr.f32.vlgmr.msra.gmra.mrb[12].mxu1 %v29128_v45  ;;  %26539 = vmatmul.mubr.f32.vlgmr.msra.gmra.mrb[22].mxu0 %v29128_v45 }
 0x525   : > { %26342 = vmatpush3.msra.mxu1 %v5265_v61  ;;  %26572 = vmatpush3.msra.mxu0 %v29219_v63 }
 0x526   : > { %26346 = vmatprep.subr.mxu1 %v29204_v53  ;;  %26576 = vmatprep.subr.mxu0 %v9180_v8 }
 0x527   : > { %26573 = vmatprep.mubr.f32.mxu0 %v29120_v37  ;;  %26343 = vmatprep.mubr.f32.mxu1 %v29113_v17 }
 0x528   : > { %26574 = vmatmul.mubr.f32.vlgmr.msra.gmra.mrb[24].mxu0 %v29138_v59 }
 0x529   : > { %26577 = vmatpush3.msra.mxu0 %v9180_v8  ;;  %26578 = vmatprep.mubr.f32.mxu0 %v29110_v10 }
 0x52a   : > { %26581 = vmatprep.subr.mxu0 %v9177_v2 }
 0x52c   : > { %26344 = vmatmul.mubr.f32.vlgmr.msra.gmra.mrb[12].mxu1 %v29131_v50 }
 0x52d   : > { %26347 = vmatpush3.msra.mxu1 %v29204_v53  ;;  %26348 = vmatprep.mubr.f32.mxu1 %v29116_v35 }
 0x52e   : > { %26351 = vmatprep.subr.mxu1 %v5266_v62 }
 0x530   : > { %26579 = vmatmul.mubr.f32.vlgmr.msra.gmra.mrb[24].mxu0 %v29128_v45 }
 0x531   : > { %26582 = vmatpush3.msra.mxu0 %v9177_v2  ;;  %26583 = vmatprep.mubr.f32.mxu0 %v29113_v17 }
 0x532   : > { %26586 = vmatprep.subr.mxu0 %v29219_v63 }
 0x534   : > { %26349 = vmatmul.mubr.f32.vlgmr.msra.gmra.mrb[12].mxu1 %v29134_v51 }
 0x535   : > { %26352 = vmatpush3.msra.mxu1 %v5266_v62  ;;  %26353 = vmatprep.mubr.f32.mxu1 %v29110_v10 }
 0x536   : > { %26356 = vmatprep.subr.mxu1 %v29204_v53 }
 0x538   : > { %26584 = vmatmul.mubr.f32.vlgmr.msra.gmra.mrb[24].mxu0 %v29131_v50 }
 0x539   : > { %26587 = vmatpush3.msra.mxu0 %v29219_v63  ;;  %26588 = vmatprep.mubr.f32.mxu0 %v29116_v35 }
 0x53a   : > { %26591 = vmatprep.subr.mxu0 %v9178_v5 }
 0x53c   : > { %26354 = vmatmul.mubr.f32.vlgmr.msra.gmra.mrb[12].mxu1 %v29128_v45 }
 0x53d   : > { %26357 = vmatpush3.msra.mxu1 %v29204_v53  ;;  %26358 = vmatprep.mubr.f32.mxu1 %v29110_v10  ;;  %v6733_v53 = vand.u32 4294901760, %v6732_v52 }
 0x53e   : > { %26361 = vmatprep.subr.mxu1 %v29250_v9 }
 0x53f   : > { %v6734_v61 = vsub.f32 %v6732_v52, %v6733_v53 }
 0x540   : > { %26589 = vmatmul.mubr.f32.vlgmr.msra.gmra.mrb[24].mxu0 %v29134_v51 }
 0x541   : > { %26592 = vmatpush3.msra.mxu0 %v9178_v5  ;;  %26593 = vmatprep.mubr.f32.mxu0 %v29110_v10  ;;  %v6735_v62 = vand.u32 4294901760, %v6734_v61 }
 0x542   : > { %26596 = vmatprep.subr.mxu0 %v29219_v63 }
 0x544   : > { %26359 = vmatmul.mubr.f32.vlgmr.msra.gmra.mrb[12].mxu1 %v29128_v45 }
 0x545   : > { %26362 = vmatpush3.msra.mxu1 %v29250_v9  ;;  %26363 = vmatprep.mubr.f32.mxu1 %v29120_v37 }
 0x546   : > { %26366 = vmatprep.subr.mxu1 %v5757_v58 }
 0x548   : > { %26364 = vmatmul.mubr.f32.vlgmr.msra.gmra.mrb[14].mxu1 %v29138_v59  ;;  %26594 = vmatmul.mubr.f32.vlgmr.msra.gmra.mrb[24].mxu0 %v29128_v45 }
 0x549   : > { %26367 = vmatpush3.msra.mxu1 %v5757_v58  ;;  %26597 = vmatpush3.msra.mxu0 %v29219_v63  ;;  %v7710_v63 = vsub.f32 %v29150_v24, %v29387_v16 }
 0x54a   : > { %26371 = vmatprep.subr.mxu1 %v5754_v13  ;;  %26368 = vmatprep.mubr.f32.mxu1 %v29110_v10 }
 0x54b   : > { %26598 = vmatprep.mubr.f32.mxu0 %v29110_v10  ;;  %26631 = vmatprep.subr.mxu0 %v29275_v19  ;;  %v7711_v3 = vand.u32 4294901760, %v7710_v63 }
 0x54d   : > { %v7712_v5 = vsub.f32 %v7710_v63, %v7711_v3 }
 0x54f   : > { %v7713_v1 = vand.u32 4294901760, %v7712_v5 }
 0x550   : > { %26369 = vmatmul.mubr.f32.vlgmr.msra.gmra.mrb[14].mxu1 %v29128_v45  ;;  %26599 = vmatmul.mubr.f32.vlgmr.msra.gmra.mrb[24].mxu0 %v29128_v45 }
 0x551   : > { %26372 = vmatpush3.msra.mxu1 %v5754_v13  ;;  %26633 = vmatprep.mubr.f32.mxu0 %v10681_v30  ;;  %v29416_v13 = vand.u32 4294901760, %v29154_v29 }
 0x552   : > { %26376 = vmatprep.subr.mxu1 %v29250_v9  ;;  %26632 = vmatpush3.msra.mxu0 %v29275_v19 }
 0x553   : > { %26373 = vmatprep.mubr.f32.mxu1 %v29113_v17  ;;  %26639 = vmatprep.subr.mxu0 %v10722_v32  ;;  %v29423_v15 = vsub.f32 %v29154_v29, %v29416_v13 }
 0x554   : > { %26634 = vmatmul.mubr.f32.vlgmr.msra.gmra.mrb[26].mxu0 %v10691_v33 }
 0x555   : > { %26636 = vmatprep.mubr.f32.mxu0 %v10701_v39  ;;  %26640 = vmatpush3.msra.mxu0 %v10722_v32 }
 0x556   : > { %26647 = vmatprep.subr.mxu0 %v10719_v42 }
 0x558   : > { %26374 = vmatmul.mubr.f32.vlgmr.msra.gmra.mrb[14].mxu1 %v29131_v50  ;;  %26637 = vmatmul.mubr.f32.gmra.mrb[28].mxu0 %v10711_v40 }
 0x559   : > { %26377 = vmatpush3.msra.mxu1 %v29250_v9  ;;  %26641 = vmatprep.mubr.f32.mxu0 %v29271_v26 }
 0x55a   : > { %26381 = vmatprep.subr.mxu1 %v29263_v22  ;;  %26378 = vmatprep.mubr.f32.mxu1 %v29116_v35 }
 0x55c   : > { %26642 = vmatmul.mubr.f32.vlgmr.msra.gmra.mrb[26].mxu0 %v29282_v55 }
 0x55d   : > { %26644 = vmatprep.mubr.f32.mxu0 %v29288_v34  ;;  %26648 = vmatpush3.msra.mxu0 %v10719_v42 }
 0x55e   : > { %26655 = vmatprep.subr.mxu0 %v29275_v19 }
 0x560   : > { %26379 = vmatmul.mubr.f32.vlgmr.msra.gmra.mrb[14].mxu1 %v29134_v51  ;;  %26645 = vmatmul.mubr.f32.gmra.mrb[28].mxu0 %v29299_v4 }
 0x561   : > { %26382 = vmatpush3.msra.mxu1 %v29263_v22  ;;  %26649 = vmatprep.mubr.f32.mxu0 %v29286_v56  ;;  %v29427_v22 = vand.u32 4294901760, %v29423_v15 }
 0x562   : > { %26386 = vmatprep.subr.mxu1 %v29250_v9  ;;  %26383 = vmatprep.mubr.f32.mxu1 %v29110_v10 }
 0x563   : > { %v8690_v12 = vsub.f32 %v29423_v15, %v29427_v22 }
 0x564   : > { %26650 = vmatmul.mubr.f32.vlgmr.msra.gmra.mrb[26].mxu0 %v29297_v60 }
 0x565   : > { %26652 = vmatprep.mubr.f32.mxu0 %v29302_v6  ;;  %26656 = vmatpush3.msra.mxu0 %v29275_v19 }
 0x566   : > { %26663 = vmatprep.subr.mxu0 %v29305_v7 }
 0x568   : > { %26384 = vmatmul.mubr.f32.vlgmr.msra.gmra.mrb[14].mxu1 %v29128_v45  ;;  %26653 = vmatmul.mubr.f32.gmra.mrb[28].mxu0 %v29312_v23 }
 0x569   : > { %26387 = vmatpush3.msra.mxu1 %v29250_v9  ;;  %26657 = vmatprep.mubr.f32.mxu0 %v10679_v54  ;;  %v31548_v9 = vmov 0.0  }
 0x56a   : > { %26391 = vmatprep.subr.mxu1 %v6156_v41  ;;  %26388 = vmatprep.mubr.f32.mxu1 %v29110_v10 }
 0x56c   : > { %26658 = vmatmul.mubr.f32.vlgmr.msra.gmra.mrb[26].mxu0 %v10689_v20 }
 0x56d   : > { %26660 = vmatprep.mubr.f32.mxu0 %v10699_v27  ;;  %26664 = vmatpush3.msra.mxu0 %v29305_v7 }
 0x56e   : > { %26671 = vmatprep.subr.mxu0 %v29275_v19 }
 0x570   : > { %26389 = vmatmul.mubr.f32.vlgmr.msra.gmra.mrb[14].mxu1 %v29128_v45  ;;  %26661 = vmatmul.mubr.f32.gmra.mrb[28].mxu0 %v10709_v14 }
 0x571   : > { %26392 = vmatpush3.msra.mxu1 %v6156_v41  ;;  %26665 = vmatprep.mubr.f32.mxu0 %v29271_v26 }
 0x572   : > { %26396 = vmatprep.subr.mxu1 %v6246_v48  ;;  %26393 = vmatprep.mubr.f32.mxu1 %v29120_v37 }
 0x574   : > { %26394 = vmatmul.mubr.f32.vlgmr.msra.gmra.mrb[16].mxu1 %v29138_v59  ;;  %26666 = vmatmul.mubr.f32.vlgmr.msra.gmra.mrb[26].mxu0 %v29282_v55 }
 0x575   : > { %26397 = vmatpush3.msra.mxu1 %v6246_v48  ;;  %26668 = vmatprep.mubr.f32.mxu0 %v29288_v34 }
 0x576   : > { %26401 = vmatprep.subr.mxu1 %v6243_v46  ;;  %26398 = vmatprep.mubr.f32.mxu1 %v29110_v10 }
 0x577   : > { %26672 = vmatpush3.msra.mxu0 %v29275_v19 }
 0x578   : > { %26669 = vmatmul.mubr.f32.gmra.mrb[28].mxu0 %v29299_v4  ;;  %26739 = vmatprep.subr.mxu0 %v31548_v9 }
 0x579   : > { %26673 = vmatprep.mubr.f32.mxu0 %v29271_v26 }
 0x57c   : > { %26399 = vmatmul.mubr.f32.vlgmr.msra.gmra.mrb[16].mxu1 %v29128_v45  ;;  %26674 = vmatmul.mubr.f32.vlgmr.msra.gmra.mrb[26].mxu0 %v29282_v55 }
 0x57d   : > { %26402 = vmatpush3.msra.mxu1 %v6243_v46  ;;  %26676 = vmatprep.mubr.f32.mxu0 %v29288_v34 }
 0x57e   : > { %26406 = vmatprep.subr.mxu1 %v6156_v41  ;;  %26403 = vmatprep.mubr.f32.mxu1 %v29113_v17 }
 0x580   : > { %26677 = vmatmul.mubr.f32.gmra.mrb[28].mxu0 %v29299_v4 }
 0x581   : > { %26741 = vmatprep.mubr.msk.f32.mxu0 %vm28435_vm2, %v31548_v9 }
 0x584   : > { %26404 = vmatmul.mubr.f32.vlgmr.msra.gmra.mrb[16].mxu1 %v29131_v50 }
 0x585   : > { %26407 = vmatpush3.msra.mxu1 %v6156_v41  ;;  %26408 = vmatprep.mubr.f32.mxu1 %v29116_v35 }
 0x586   : > { %26411 = vmatprep.subr.mxu1 %v6244_v47 }
 0x58c   : > { %26409 = vmatmul.mubr.f32.vlgmr.msra.gmra.mrb[16].mxu1 %v29134_v51 }
 0x58d   : > { %26412 = vmatpush3.msra.mxu1 %v6244_v47  ;;  %26413 = vmatprep.mubr.f32.mxu1 %v29110_v10 }
 0x58e   : > { %26416 = vmatprep.subr.mxu1 %v6156_v41 }
 0x594   : > { %26414 = vmatmul.mubr.f32.vlgmr.msra.gmra.mrb[16].mxu1 %v29128_v45 }
 0x595   : > { %26417 = vmatpush3.msra.mxu1 %v6156_v41  ;;  %26418 = vmatprep.mubr.f32.mxu1 %v29110_v10 }
 0x596   : > { %26421 = vmatprep.subr.mxu1 %v6645_v49 }
 0x59c   : > { %26419 = vmatmul.mubr.f32.vlgmr.msra.gmra.mrb[16].mxu1 %v29128_v45 }
 0x59d   : > { %26422 = vmatpush3.msra.mxu1 %v6645_v49  ;;  %26423 = vmatprep.mubr.f32.mxu1 %v29120_v37 }
 0x59e   : > { %26426 = vmatprep.subr.mxu1 %v6735_v62 }
 0x5a0   : > { %26424 = vmatmul.mubr.f32.vlgmr.msra.gmra.mrb[18].mxu1 %v29138_v59 }
 0x5a1   : > { %26427 = vmatpush3.msra.mxu1 %v6735_v62  ;;  %26428 = vmatprep.mubr.f32.mxu1 %v29110_v10 }
 0x5a2   : > { %26431 = vmatprep.subr.mxu1 %v6732_v52 }
 0x5a8   : > { %26429 = vmatmul.mubr.f32.vlgmr.msra.gmra.mrb[18].mxu1 %v29128_v45 }
 0x5a9   : > { %26432 = vmatpush3.msra.mxu1 %v6732_v52  ;;  %26433 = vmatprep.mubr.f32.mxu1 %v29113_v17 }
 0x5aa   : > { %26436 = vmatprep.subr.mxu1 %v6645_v49 }
 0x5b0   : > { %26434 = vmatmul.mubr.f32.vlgmr.msra.gmra.mrb[18].mxu1 %v29131_v50 }
 0x5b1   : > { %26437 = vmatpush3.msra.mxu1 %v6645_v49  ;;  %26438 = vmatprep.mubr.f32.mxu1 %v29116_v35 }
 0x5b2   : > { %26441 = vmatprep.subr.mxu1 %v6733_v53 }
 0x5b8   : > { %26439 = vmatmul.mubr.f32.vlgmr.msra.gmra.mrb[18].mxu1 %v29134_v51 }
 0x5b9   : > { %26442 = vmatpush3.msra.mxu1 %v6733_v53  ;;  %26443 = vmatprep.mubr.f32.mxu1 %v29110_v10 }
 0x5ba   : > { %26446 = vmatprep.subr.mxu1 %v6645_v49 }
 0x5bf   : > { %v29393_v0 = vpop.f32.mrb[8].mxu1 }
 0x5c0   : > { %v29395_v2 = vpop.f32.mrb[9].mxu1  ;;  %26444 = vmatmul.mubr.f32.vlgmr.msra.gmra.mrb[18].mxu1 %v29128_v45  ;;  %v10364_v26 = vrot.slane %v29393_v0, 2  ;;  %v10418_v36 = vrot.slane %v29393_v0, 4  ;;  %v10478_v43 = vrot.slane %v29393_v0, 6  ;;  %v10337_v44 = vrot.slane %v29393_v0, 1 }
 0x5c1   : > { %26447 = vmatpush3.msra.mxu1 %v6645_v49  ;;  %26448 = vmatprep.mubr.f32.mxu1 %v29110_v10  ;;  %v10103_v29 = vrot.slane %v29395_v2, 1  ;;  %v10157_v19 = vrot.slane %v29395_v2, 3  ;;  %v10214_v55 = vrot.slane %v29395_v2, 5  ;;  %v10274_v56 = vrot.slane %v29395_v2, 7 }
 0x5c2   : > { %26481 = vmatprep.subr.mxu1 %v29387_v16  ;;  %v10130_v34 = vrot.slane %v29395_v2, 2  ;;  %v10184_v57 = vrot.slane %v29395_v2, 4  ;;  %v10244_v58 = vrot.slane %v29395_v2, 6  ;;  %v10391_v60 = vrot.slane %v29393_v0, 3 }
 0x5c3   : > { %v10448_v4 = vrot.slane %v29393_v0, 5  ;;  %v10508_v6 = vrot.slane %v29393_v0, 7 }
 0x5c8   : > { %26449 = vmatmul.mubr.f32.vlgmr.msra.gmra.mrb[18].mxu1 %v29128_v45 }
 0x5c9   : > { %26482 = vmatpush3.msra.mxu1 %v29387_v16  ;;  %26483 = vmatprep.mubr.f32.mxu1 %v29120_v37 }
 0x5ca   : > { %26486 = vmatprep.subr.mxu1 %v7713_v1 }
 0x5cb   : > { %v29403_v24 = vpop.f32.mrb[20].mxu0 }
 0x5cc   : > { %v29405_v8 = vpop.f32.mrb[21].mxu0  ;;  %26484 = vmatmul.mubr.f32.vlgmr.msra.gmra.mrb[20].mxu1 %v29138_v59 }
 0x5cd   : > { %26487 = vmatpush3.msra.mxu1 %v7713_v1  ;;  %26488 = vmatprep.mubr.f32.mxu1 %v29110_v10 }
 0x5ce   : > { %26491 = vmatprep.subr.mxu1 %v7710_v63 }
 0x5d4   : > { %26489 = vmatmul.mubr.f32.vlgmr.msra.gmra.mrb[20].mxu1 %v29128_v45 }
 0x5d5   : > { %26492 = vmatpush3.msra.mxu1 %v7710_v63  ;;  %26493 = vmatprep.mubr.f32.mxu1 %v29113_v17 }
 0x5d6   : > { %26496 = vmatprep.subr.mxu1 %v29387_v16 }
 0x5dc   : > { %26494 = vmatmul.mubr.f32.vlgmr.msra.gmra.mrb[20].mxu1 %v29131_v50 }
 0x5dd   : > { %26497 = vmatpush3.msra.mxu1 %v29387_v16  ;;  %26498 = vmatprep.mubr.f32.mxu1 %v29116_v35 }
 0x5de   : > { %26501 = vmatprep.subr.mxu1 %v7711_v3 }
 0x5e4   : > { %26499 = vmatmul.mubr.f32.vlgmr.msra.gmra.mrb[20].mxu1 %v29134_v51 }
 0x5e5   : > { %26502 = vmatpush3.msra.mxu1 %v7711_v3  ;;  %26503 = vmatprep.mubr.f32.mxu1 %v29110_v10 }
 0x5e6   : > { %26506 = vmatprep.subr.mxu1 %v29387_v16 }
 0x5eb   : > { %v26330_v42 = vpop.f32.mrb[10].mxu1 }
 0x5ec   : > { %v5167_v54 = vpop.f32.mrb[11].mxu1  ;;  %26504 = vmatmul.mubr.f32.vlgmr.msra.gmra.mrb[20].mxu1 %v29128_v45  ;;  %v10365_v7 = vrot.slane %v26330_v42, 1  ;;  %v10419_v20 = vrot.slane %v26330_v42, 3  ;;  %v10479_v23 = vrot.slane %v26330_v42, 5  ;;  %v29449_v25 = vsel %vm10080_vm3, %v26330_v42, %v10337_v44 }
 0x5ed   : > { %26507 = vmatpush3.msra.mxu1 %v29387_v16  ;;  %26508 = vmatprep.mubr.f32.mxu1 %v29110_v10  ;;  %v29454_v27 = vsel %vm10080_vm3, %v5167_v54, %v10103_v29  ;;  %v10158_v28 = vrot.slane %v5167_v54, 2  ;;  %v10215_v11 = vrot.slane %v5167_v54, 4  ;;  %v10275_v14 = vrot.slane %v5167_v54, 6 }
 0x5ee   : > { %26541 = vmatprep.subr.mxu1 %v29416_v13  ;;  %v10366_v30 = vsel %vm10080_vm3, %v10365_v7, %v10364_v26  ;;  %v29459_v31 = vsel %vm10080_vm3, %v10419_v20, %v10418_v36  ;;  %v29462_v32 = vsel %vm10080_vm3, %v10479_v23, %v10478_v43  ;;  %v10131_v33 = vrot.slane %v5167_v54, 1 }
 0x5ef   : > { %v29465_v38 = vsel %vm10080_vm3, %v10158_v28, %v10157_v19  ;;  %v29468_v39 = vsel %vm10080_vm3, %v10215_v11, %v10214_v55  ;;  %v29471_v40 = vsel %vm10080_vm3, %v10275_v14, %v10274_v56  ;;  %v10185_v41 = vrot.slane %v5167_v54, 3 }
 0x5f0   : > { %v10132_v46 = vsel %vm10080_vm3, %v10131_v33, %v10130_v34  ;;  %v10245_v47 = vrot.slane %v5167_v54, 5  ;;  %v10079_v21 = vrot.slane %v5167_v54, 7  ;;  %v10392_v48 = vrot.slane %v26330_v42, 2 }
 0x5f1   : > { %v10186_v49 = vsel %vm10080_vm3, %v10185_v41, %v10184_v57  ;;  %v10449_v52 = vrot.slane %v26330_v42, 4  ;;  %v10509_v53 = vrot.slane %v26330_v42, 6  ;;  %v10316_v61 = vrot.slane %v26330_v42, 7 }
 0x5f2   : > { %v29476_v62 = vsel %vm10080_vm3, %v10245_v47, %v10244_v58  ;;  %v29480_v16 = vsel %vm10080_vm3, %v10079_v21, %v29395_v2  ;;  %v29483_v63 = vsel %vm10080_vm3, %v10392_v48, %v10391_v60  ;;  %v8691_v26 = vand.u32 4294901760, %v8690_v12 }
 0x5f3   : > { %v29486_v3 = vsel %vm10080_vm3, %v10449_v52, %v10448_v4  ;;  %v29489_v5 = vsel %vm10080_vm3, %v10509_v53, %v10508_v6  ;;  %v29493_v1 = vsel %vm10080_vm3, %v10316_v61, %v29393_v0  ;;  %v29514_v0 = vand.u32 4294901760, %v29158_v18 }
 0x5f4   : > { %26509 = vmatmul.mubr.f32.vlgmr.msra.gmra.mrb[20].mxu1 %v29128_v45 }
 0x5f5   : > { %26542 = vmatpush3.msra.mxu1 %v29416_v13  ;;  %26543 = vmatprep.mubr.f32.mxu1 %v29120_v37  ;;  %v9666_v12 = vsub.f32 %v29158_v18, %v29514_v0 }
 0x5f6   : > { %26546 = vmatprep.subr.mxu1 %v8691_v26 }
 0x5f7   : > { %v29498_v2 = vpop.f32.mrb[22].mxu0 }
 0x5f8   : > { %v29500_v36 = vpop.f32.mrb[23].mxu0  ;;  %26544 = vmatmul.mubr.f32.vlgmr.msra.gmra.mrb[22].mxu1 %v29138_v59 }
 0x5f9   : > { %26547 = vmatpush3.msra.mxu1 %v8691_v26  ;;  %26548 = vmatprep.mubr.f32.mxu1 %v29110_v10 }
 0x5fa   : > { %26551 = vmatprep.subr.mxu1 %v29423_v15 }
 0x600   : > { %26549 = vmatmul.mubr.f32.vlgmr.msra.gmra.mrb[22].mxu1 %v29128_v45 }
 0x601   : > { %26552 = vmatpush3.msra.mxu1 %v29423_v15  ;;  %26553 = vmatprep.mubr.f32.mxu1 %v29113_v17  ;;  %v9667_v15 = vand.u32 4294901760, %v9666_v12 }
 0x602   : > { %26556 = vmatprep.subr.mxu1 %v29416_v13 }
 0x603   : > { %v9668_v19 = vsub.f32 %v9666_v12, %v9667_v15 }
 0x608   : > { %26554 = vmatmul.mubr.f32.vlgmr.msra.gmra.mrb[22].mxu1 %v29131_v50 }
 0x609   : > { %26557 = vmatpush3.msra.mxu1 %v29416_v13  ;;  %26558 = vmatprep.mubr.f32.mxu1 %v29116_v35 }
 0x60a   : > { %26561 = vmatprep.subr.mxu1 %v29427_v22 }
 0x610   : > { %26559 = vmatmul.mubr.f32.vlgmr.msra.gmra.mrb[22].mxu1 %v29134_v51 }
 0x611   : > { %26562 = vmatpush3.msra.mxu1 %v29427_v22  ;;  %26563 = vmatprep.mubr.f32.mxu1 %v29110_v10 }
 0x612   : > { %26566 = vmatprep.subr.mxu1 %v29416_v13 }
 0x617   : > { %v26360_v29 = vpop.f32.mrb[12].mxu1 }
 0x618   : > { %v5656_v43 = vpop.f32.mrb[13].mxu1  ;;  %26564 = vmatmul.mubr.f32.vlgmr.msra.gmra.mrb[22].mxu1 %v29128_v45  ;;  %v29524_v44 = vsel %vm10083_vm4, %v26360_v29, %v10366_v30  ;;  %v10421_v55 = vrot.slane %v26360_v29, 2  ;;  %v10481_v18 = vrot.slane %v26360_v29, 4  ;;  %v10339_v56 = vrot.slane %v26360_v29, 7 }
 0x619   : > { %26567 = vmatpush3.msra.mxu1 %v29416_v13  ;;  %26568 = vmatprep.mubr.f32.mxu1 %v29110_v10  ;;  %v10105_v22 = vrot.slane %v5656_v43, 7  ;;  %v10160_v34 = vrot.slane %v5656_v43, 1  ;;  %v10217_v57 = vrot.slane %v5656_v43, 3  ;;  %v10277_v42 = vrot.slane %v5656_v43, 5 }
 0x61a   : > { %26601 = vmatprep.subr.mxu1 %v29514_v0  ;;  %v29531_v58 = vsel %vm10083_vm4, %v10421_v55, %v29459_v31  ;;  %v29535_v60 = vsel %vm10083_vm4, %v10481_v18, %v29462_v32  ;;  %v29538_v4 = vsel %vm10083_vm4, %v5656_v43, %v10132_v46  ;;  %v10187_v13 = vrot.slane %v5656_v43, 2 }
 0x61b   : > { %v29542_v6 = vsel %vm10083_vm4, %v10105_v22, %v29454_v27  ;;  %v10161_v54 = vsel %vm10083_vm4, %v10160_v34, %v29465_v38  ;;  %v29548_v7 = vsel %vm10083_vm4, %v10217_v57, %v29468_v39  ;;  %v29552_v20 = vsel %vm10083_vm4, %v10277_v42, %v29471_v40 }
 0x61c   : > { %v29555_v23 = vsel %vm10083_vm4, %v10187_v13, %v10186_v49  ;;  %v10247_v28 = vrot.slane %v5656_v43, 4  ;;  %v10082_v11 = vrot.slane %v5656_v43, 6  ;;  %v29559_v27 = vsel %vm10083_vm4, %v10339_v56, %v29449_v25 }
 0x61d   : > { %v10394_v14 = vrot.slane %v26360_v29, 1  ;;  %v10451_v30 = vrot.slane %v26360_v29, 3  ;;  %v10511_v31 = vrot.slane %v26360_v29, 5  ;;  %v10318_v32 = vrot.slane %v26360_v29, 6 }
 0x61e   : > { %v29563_v33 = vsel %vm10083_vm4, %v10247_v28, %v29476_v62  ;;  %v29567_v38 = vsel %vm10083_vm4, %v10082_v11, %v29480_v16  ;;  %v9669_v46 = vand.u32 4294901760, %v9668_v19 }
 0x61f   : > { %v10395_v39 = vsel %vm10083_vm4, %v10394_v14, %v29483_v63  ;;  %v29573_v40 = vsel %vm10083_vm4, %v10451_v30, %v29486_v3  ;;  %v29577_v25 = vsel %vm10083_vm4, %v10511_v31, %v29489_v5  ;;  %v29581_v41 = vsel %vm10083_vm4, %v10318_v32, %v29493_v1 }
 0x620   : > { %26569 = vmatmul.mubr.f32.vlgmr.msra.gmra.mrb[22].mxu1 %v29128_v45 }
 0x621   : > { %26602 = vmatpush3.msra.mxu1 %v29514_v0  ;;  %26603 = vmatprep.mubr.f32.mxu1 %v29120_v37  ;;  %v10601_v37 = vld [vmem:[%s31537_s3] sm:$0xff] }
 0x622   : > { %26606 = vmatprep.subr.mxu1 %v9669_v46 }
 0x623   : > { %v29586_v47 = vpop.f32.mrb[24].mxu0 }
 0x624   : > { %v29588_v21 = vpop.f32.mrb[25].mxu0  ;;  %26604 = vmatmul.mubr.f32.vlgmr.msra.gmra.mrb[24].mxu1 %v29138_v59  ;;  %v11187_v59 = vsel %vm3249_vm1, %v10601_v37, 0 }
 0x625   : > { %26607 = vmatpush3.msra.mxu1 %v9669_v46  ;;  %26608 = vmatprep.mubr.f32.mxu1 %v29110_v10  ;;  %v29602_v48 = vand.u32 4294901760, %v11187_v59 }
 0x626   : > { %26611 = vmatprep.subr.mxu1 %v9666_v12 }
 0x62c   : > { %26609 = vmatmul.mubr.f32.vlgmr.msra.gmra.mrb[24].mxu1 %v29128_v45 }
 0x62d   : > { %26612 = vmatpush3.msra.mxu1 %v9666_v12  ;;  %26613 = vmatprep.mubr.f32.mxu1 %v29113_v17  ;;  %v29608_v17 = vsub.f32 %v11187_v59, %v29602_v48 }
 0x62e   : > { %26616 = vmatprep.subr.mxu1 %v29514_v0 }
 0x634   : > { %26614 = vmatmul.mubr.f32.vlgmr.msra.gmra.mrb[24].mxu1 %v29131_v50  ;;  %v29611_v50 = vand.u32 4294901760, %v29608_v17 }
 0x635   : > { %26617 = vmatpush3.msra.mxu1 %v29514_v0  ;;  %26618 = vmatprep.mubr.f32.mxu1 %v29116_v35 }
 0x636   : > { %26621 = vmatprep.subr.mxu1 %v9667_v15  ;;  %v11258_v13 = vsub.f32 %v29608_v17, %v29611_v50 }
 0x63c   : > { %26619 = vmatmul.mubr.f32.vlgmr.msra.gmra.mrb[24].mxu1 %v29134_v51 }
 0x63d   : > { %26622 = vmatpush3.msra.mxu1 %v9667_v15  ;;  %26623 = vmatprep.mubr.f32.mxu1 %v29110_v10 }
 0x63e   : > { %26626 = vmatprep.subr.mxu1 %v29514_v0 }
 0x643   : > { %v26390_v35 = vpop.f32.mrb[14].mxu1 }
 0x644   : > { %v6145_v49 = vpop.f32.mrb[15].mxu1  ;;  %26624 = vmatmul.mubr.f32.vlgmr.msra.gmra.mrb[24].mxu1 %v29128_v45  ;;  %v10368_v52 = vrot.slane %v26390_v35, 7  ;;  %v10423_v53 = vrot.slane %v26390_v35, 1  ;;  %v10483_v61 = vrot.slane %v26390_v35, 3  ;;  %v10341_v51 = vrot.slane %v26390_v35, 6 }
 0x645   : > { %26627 = vmatpush3.msra.mxu1 %v29514_v0  ;;  %26628 = vmatprep.mubr.f32.mxu1 %v29110_v10  ;;  %v10107_v62 = vrot.slane %v6145_v49, 6  ;;  %v29617_v16 = vsel %vm10086_vm5, %v6145_v49, %v10161_v54  ;;  %v10219_v63 = vrot.slane %v6145_v49, 2  ;;  %v10279_v3 = vrot.slane %v6145_v49, 4 }
 0x646   : > { %26679 = vmatprep.subr.mxu1 %v31548_v9  ;;  %v29622_v5 = vsel %vm10086_vm5, %v10368_v52, %v29524_v44  ;;  %v29626_v1 = vsel %vm10086_vm5, %v10423_v53, %v29531_v58  ;;  %v29630_v26 = vsel %vm10086_vm5, %v10483_v61, %v29535_v60  ;;  %v10134_v10 = vrot.slane %v6145_v49, 7 }
 0x647   : > { %31564 = vst [vmem:[#allocation13_spill] sm:$0xff] %v29630_v26  ;;  %v29634_v0 = vsel %vm10086_vm5, %v10107_v62, %v29542_v6  ;;  %v29638_v12 = vsel %vm10086_vm5, %v10219_v63, %v29548_v7  ;;  %v29642_v15 = vsel %vm10086_vm5, %v10279_v3, %v29552_v20  ;;  %v10189_v29 = vrot.slane %v6145_v49, 1 }
 0x648   : > { %v29646_v19 = vsel %vm10086_vm5, %v10134_v10, %v29538_v4  ;;  %v10249_v43 = vrot.slane %v6145_v49, 3  ;;  %v10085_v44 = vrot.slane %v6145_v49, 5  ;;  %v29650_v55 = vsel %vm10086_vm5, %v10341_v51, %v29559_v27 }
 0x649   : > { %31565 = vst [vmem:[#allocation14_spill] sm:$0xff] %v29646_v19  ;;  %31566 = vst [vmem:[#allocation15_spill] sm:$0xff] %v29650_v55  ;;  %v29654_v18 = vsel %vm10086_vm5, %v10189_v29, %v29555_v23  ;;  %v29657_v56 = vsel %vm10086_vm5, %v26390_v35, %v10395_v39  ;;  %v10453_v22 = vrot.slane %v26390_v35, 2  ;;  %v10513_v34 = vrot.slane %v26390_v35, 4 }
 0x64a   : > { %31567 = vst [vmem:[#allocation16_spill] sm:$0xff] %v29654_v18  ;;  %31568 = vst [vmem:[#allocation17_spill] sm:$0xff] %v29657_v56  ;;  %v29661_v57 = vsel %vm10086_vm5, %v10249_v43, %v29563_v33  ;;  %v29665_v42 = vsel %vm10086_vm5, %v10085_v44, %v29567_v38  ;;  %v10320_v58 = vrot.slane %v26390_v35, 5  ;;  %v29684_v20 = vand.u32 4294901760, %v11258_v13 }
 0x64b   : > { %31569 = vst [vmem:[#allocation18_spill] sm:$0xff] %v29661_v57  ;;  %31570 = vst [vmem:[#allocation19_spill] sm:$0xff] %v29665_v42  ;;  %v29669_v60 = vsel %vm10086_vm5, %v10453_v22, %v29573_v40  ;;  %v29673_v4 = vsel %vm10086_vm5, %v10513_v34, %v29577_v25  ;;  %v10345_v53 = vrot.slane %v29403_v24, 7  ;;  %v10194_v61 = vrot.slane %v29405_v8, 2 }
 0x64c   : > { %31571 = vst [vmem:[#allocation20_spill] sm:$0xff] %v29669_v60  ;;  %31572 = vst [vmem:[#allocation21_spill] sm:$0xff] %v29673_v4  ;;  %26629 = vmatmul.mubr.f32.vlgmr.msra.gmra.mrb[24].mxu1 %v29128_v45  ;;  %v29680_v6 = vsel %vm10086_vm5, %v10320_v58, %v29581_v41  ;;  %v10400_v51 = vrot.slane %v29403_v24, 1  ;;  %v10458_v62 = vrot.slane %v29403_v24, 3  ;;  %v10518_v63 = vrot.slane %v29403_v24, 5 }
 0x64d   : > { %31573 = vst [vmem:[#allocation22_spill] sm:$0xff] %v29680_v6  ;;  %26681 = vmatprep.mubr.msk.f32.mxu1 %vm28435_vm2, %v31548_v9  ;;  %v10254_v3 = vrot.slane %v29405_v8, 4  ;;  %v10111_v10 = vrot.slane %v29405_v8, 7 }
 0x64f   : > { %v26675_v54 = vpop.f32.mrb[26].mxu0 }
 0x650   : > { %v11164_v7 = vpop.f32.mrb[27].mxu0  ;;  %v29718_v40 = vand.u32 4294901760, %v26675_v54 }
 0x651   : > { %v11190_v23 = vand.u32 4294901760, %v11164_v7 }
 0x652   : > { %v11713_v46 = vsub.f32 %v26675_v54, %v29718_v40 }
 0x653   : > { %v11267_v28 = vsub.f32 %v11164_v7, %v11190_v23  ;;  %v29686_v11 = vpop.f32.mrb[28].mxu0  ;;  %26680 = vmatpush3.msra.mxu1 %v11190_v23 }
 0x654   : > { %v11176_v45 = vpop.f32.mrb[29].mxu0  ;;  %26682 = vmatmul.mubr.f32.vlgmr.msra.gmra.mrb[26].mxu1 %v29684_v20  ;;  %26684 = vmatprep.subr.mxu1 %v31548_v9  ;;  %v11714_v37 = vand.u32 4294901760, %v11713_v46  ;;  %v29754_v49 = vand.u32 4294901760, %v29686_v11 }
 0x655   : > { %v11268_v27 = vand.u32 4294901760, %v11267_v28  ;;  %v12082_v14 = vand.u32 4294901760, %v11176_v45  ;;  %26686 = vmatprep.mubr.msk.f32.mxu1 %vm28435_vm2, %v31548_v9 }
 0x656   : > { %v11715_v59 = vsub.f32 %v11713_v46, %v11714_v37  ;;  %v29763_v52 = vsub.f32 %v29686_v11, %v29754_v49 }
 0x657   : > { %v11269_v30 = vsub.f32 %v11267_v28, %v11268_v27  ;;  %v12159_v31 = vsub.f32 %v11176_v45, %v12082_v14  ;;  %26740 = vmatpush3.msra.mxu0 %v12082_v14 }
 0x658   : > { %26742 = vmatmul.mubr.f32.vlgmr.msra.gmra.mrb[30].mxu0 %v29684_v20  ;;  %26744 = vmatprep.subr.mxu0 %v31548_v9  ;;  %v11716_v35 = vand.u32 4294901760, %v11715_v59 }
 0x659   : > { %v11270_v32 = vand.u32 4294901760, %v11269_v30  ;;  %v12160_v33 = vand.u32 4294901760, %v12159_v31  ;;  %26746 = vmatprep.mubr.msk.f32.mxu0 %vm28435_vm2, %v31548_v9 }
 0x65b   : > { %v12161_v38 = vsub.f32 %v12159_v31, %v12160_v33  ;;  %26685 = vmatpush3.msra.mxu1 %v11270_v32 }
 0x65c   : > { %26687 = vmatmul.mubr.f32.vlgmr.msra.gmra.mrb[26].mxu1 %v29602_v48  ;;  %26689 = vmatprep.subr.mxu1 %v31548_v9 }
 0x65d   : > { %v12162_v39 = vand.u32 4294901760, %v12161_v38  ;;  %26690 = vmatpush3.msra.mxu1 %v11267_v28  ;;  %26691 = vmatprep.mubr.msk.f32.mxu1 %vm28435_vm2, %v31548_v9 }
 0x65e   : > { %26694 = vmatprep.subr.mxu1 %v31548_v9 }
 0x65f   : > { %26745 = vmatpush3.msra.mxu0 %v12162_v39 }
 0x660   : > { %26747 = vmatmul.mubr.f32.vlgmr.msra.gmra.mrb[30].mxu0 %v29602_v48  ;;  %26749 = vmatprep.subr.mxu0 %v31548_v9 }
 0x661   : > { %26750 = vmatpush3.msra.mxu0 %v12159_v31  ;;  %26751 = vmatprep.mubr.msk.f32.mxu0 %vm28435_vm2, %v31548_v9 }
 0x662   : > { %26754 = vmatprep.subr.mxu0 %v31548_v9 }
 0x664   : > { %26692 = vmatmul.mubr.f32.vlgmr.msra.gmra.mrb[26].mxu1 %v29608_v17 }
 0x665   : > { %26695 = vmatpush3.msra.mxu1 %v11190_v23  ;;  %26696 = vmatprep.mubr.msk.f32.mxu1 %vm28435_vm2, %v31548_v9 }
 0x666   : > { %26699 = vmatprep.subr.mxu1 %v31548_v9 }
 0x668   : > { %26752 = vmatmul.mubr.f32.vlgmr.msra.gmra.mrb[30].mxu0 %v29608_v17 }
 0x669   : > { %26755 = vmatpush3.msra.mxu0 %v12082_v14  ;;  %26756 = vmatprep.mubr.msk.f32.mxu0 %vm28435_vm2, %v31548_v9 }
 0x66a   : > { %26759 = vmatprep.subr.mxu0 %v31548_v9 }
 0x66c   : > { %26697 = vmatmul.mubr.f32.vlgmr.msra.gmra.mrb[26].mxu1 %v29611_v50 }
 0x66d   : > { %26700 = vmatpush3.msra.mxu1 %v11268_v27  ;;  %26701 = vmatprep.mubr.msk.f32.mxu1 %vm28435_vm2, %v31548_v9 }
 0x66e   : > { %26704 = vmatprep.subr.mxu1 %v31548_v9 }
 0x66f   : > { %v29720_v25 = vpop.f32.mrb[16].mxu1 }
 0x670   : > { %v29722_v41 = vpop.f32.mrb[17].mxu1  ;;  %26757 = vmatmul.mubr.f32.vlgmr.msra.gmra.mrb[30].mxu0 %v29611_v50  ;;  %v10343_v54 = vrot.slane %v29720_v25, 1  ;;  %v10397_v7 = vrot.slane %v29720_v25, 3  ;;  %v10455_v45 = vrot.slane %v29720_v25, 5  ;;  %v10515_v27 = vrot.slane %v29720_v25, 7 }
 0x671   : > { %26760 = vmatpush3.msra.mxu0 %v12160_v33  ;;  %26761 = vmatprep.mubr.msk.f32.mxu0 %vm28435_vm2, %v31548_v9  ;;  %v10136_v28 = vrot.slane %v29722_v41, 2  ;;  %v10191_v11 = vrot.slane %v29722_v41, 4  ;;  %v10109_v30 = vrot.slane %v29722_v41, 1  ;;  %v10163_v31 = vrot.slane %v29722_v41, 3 }
 0x672   : > { %26764 = vmatprep.subr.mxu0 %v31548_v9  ;;  %v10221_v32 = vrot.slane %v29722_v41, 5  ;;  %v10281_v38 = vrot.slane %v29722_v41, 7  ;;  %v10370_v39 = vrot.slane %v29720_v25, 2 }
 0x674   : > { %26702 = vmatmul.mubr.f32.vlgmr.msra.gmra.mrb[26].mxu1 %v29602_v48 }
 0x675   : > { %26705 = vmatpush3.msra.mxu1 %v11190_v23  ;;  %26706 = vmatprep.mubr.msk.f32.mxu1 %vm28435_vm2, %v31548_v9 }
 0x676   : > { %26709 = vmatprep.subr.mxu1 %v31548_v9 }
 0x678   : > { %26762 = vmatmul.mubr.f32.vlgmr.msra.gmra.mrb[30].mxu0 %v29602_v48 }
 0x679   : > { %26765 = vmatpush3.msra.mxu0 %v12082_v14  ;;  %26766 = vmatprep.mubr.msk.f32.mxu0 %vm28435_vm2, %v31548_v9  ;;  %v10251_v14 = vrot.slane %v29722_v41, 6 }
 0x67a   : > { %26799 = vmatprep.subr.mxu0 %v31548_v9 }
 0x67c   : > { %26707 = vmatmul.mubr.f32.vlgmr.msra.gmra.mrb[26].mxu1 %v29602_v48 }
 0x67d   : > { %26710 = vmatpush3.msra.mxu1 %v29718_v40  ;;  %26711 = vmatprep.mubr.msk.f32.mxu1 %vm28435_vm2, %v31548_v9 }
 0x67e   : > { %26714 = vmatprep.subr.mxu1 %v31548_v9 }
 0x680   : > { %26712 = vmatmul.mubr.f32.vlgmr.msra.gmra.mrb[28].mxu1 %v29684_v20  ;;  %26767 = vmatmul.mubr.f32.vlgmr.msra.gmra.mrb[30].mxu0 %v29602_v48 }
 0x681   : > { %26715 = vmatpush3.msra.mxu1 %v11716_v35  ;;  %26716 = vmatprep.mubr.msk.f32.mxu1 %vm28435_vm2, %v31548_v9 }
 0x682   : > { %26719 = vmatprep.subr.mxu1 %v31548_v9  ;;  %26801 = vmatprep.mubr.msk.f32.mxu0 %vm28435_vm2, %v31548_v9 }
 0x688   : > { %26717 = vmatmul.mubr.f32.vlgmr.msra.gmra.mrb[28].mxu1 %v29602_v48 }
 0x689   : > { %26720 = vmatpush3.msra.mxu1 %v11713_v46  ;;  %26721 = vmatprep.mubr.msk.f32.mxu1 %vm28435_vm2, %v31548_v9  ;;  %v10425_v46 = vrot.slane %v29720_v25, 4 }
 0x68a   : > { %26724 = vmatprep.subr.mxu1 %v31548_v9 }
 0x690   : > { %26722 = vmatmul.mubr.f32.vlgmr.msra.gmra.mrb[28].mxu1 %v29608_v17 }
 0x691   : > { %26725 = vmatpush3.msra.mxu1 %v29718_v40  ;;  %26726 = vmatprep.mubr.msk.f32.mxu1 %vm28435_vm2, %v31548_v9 }
 0x692   : > { %26729 = vmatprep.subr.mxu1 %v31548_v9 }
 0x698   : > { %26727 = vmatmul.mubr.f32.vlgmr.msra.gmra.mrb[28].mxu1 %v29611_v50 }
 0x699   : > { %26730 = vmatpush3.msra.mxu1 %v11714_v37  ;;  %26731 = vmatprep.mubr.msk.f32.mxu1 %vm28435_vm2, %v31548_v9  ;;  %v10485_v37 = vrot.slane %v29720_v25, 6 }
 0x69a   : > { %26734 = vmatprep.subr.mxu1 %v31548_v9 }
 0x69b   : > { %v26450_v33 = vpop.f32.mrb[18].mxu1 }
 0x69c   : > { %v7123_v59 = vpop.f32.mrb[19].mxu1  ;;  %v10344_v35 = vsel %vm10080_vm3, %v26450_v33, %v10343_v54  ;;  %v10398_v23 = vrot.slane %v26450_v33, 2  ;;  %v10456_v58 = vrot.slane %v26450_v33, 4  ;;  %v10516_v13 = vrot.slane %v26450_v33, 6 }
 0x69d   : > { %v10137_v34 = vrot.slane %v7123_v59, 1  ;;  %v10192_v22 = vrot.slane %v7123_v59, 3  ;;  %v10252_v44 = vrot.slane %v7123_v59, 5  ;;  %v29800_v43 = vsel %vm10083_vm4, %v10345_v53, %v10344_v35 }
 0x69e   : > { %v10399_v29 = vsel %vm10080_vm3, %v10398_v23, %v10397_v7  ;;  %v10457_v9 = vsel %vm10080_vm3, %v10456_v58, %v10455_v45  ;;  %v10517_v6 = vsel %vm10080_vm3, %v10516_v13, %v10515_v27  ;;  %v10110_v4 = vsel %vm10080_vm3, %v7123_v59, %v10109_v30 }
 0x69f   : > { %v10138_v60 = vsel %vm10080_vm3, %v10137_v34, %v10136_v28  ;;  %v10193_v54 = vsel %vm10080_vm3, %v10192_v22, %v10191_v11  ;;  %v10253_v56 = vsel %vm10080_vm3, %v10252_v44, %v10251_v14  ;;  %v10401_v55 = vsel %vm10083_vm4, %v10400_v51, %v10399_v29 }
 0x6a0   : > { %26732 = vmatmul.mubr.f32.vlgmr.msra.gmra.mrb[28].mxu1 %v29602_v48  ;;  %v29813_v53 = vsel %vm10083_vm4, %v29405_v8, %v10138_v60  ;;  %v29816_v58 = vsel %vm10083_vm4, %v10194_v61, %v10193_v54  ;;  %v29819_v13 = vsel %vm10083_vm4, %v10254_v3, %v10253_v56  ;;  %v29822_v34 = vsel %vm10083_vm4, %v10458_v62, %v10457_v9 }
 0x6a1   : > { %26735 = vmatpush3.msra.mxu1 %v29718_v40  ;;  %v31574_v44 = vmov 0.0   ;;  %v10519_v51 = vsel %vm10083_vm4, %v10518_v63, %v10517_v6  ;;  %v29829_v29 = vsel %vm10083_vm4, %v10111_v10, %v10110_v4  ;;  %v10164_v60 = vrot.slane %v7123_v59, 2 }
 0x6a2   : > { %26736 = vmatprep.mubr.msk.f32.mxu1 %vm28435_vm2, %v31574_v44  ;;  %v10222_v22 = vrot.slane %v7123_v59, 4  ;;  %26769 = vmatprep.subr.mxu1 %v31574_v44  ;;  %v10282_v61 = vrot.slane %v7123_v59, 6  ;;  %v10371_v56 = vrot.slane %v26450_v33, 1  ;;  %v10426_v3 = vrot.slane %v26450_v33, 3 }
 0x6a3   : > { %v10486_v7 = vrot.slane %v26450_v33, 5  ;;  %v10165_v9 = vsel %vm10080_vm3, %v10164_v60, %v10163_v31  ;;  %v10322_v62 = vrot.slane %v26450_v33, 7  ;;  %v10088_v23 = vrot.slane %v7123_v59, 7 }
 0x6a4   : > { %v10223_v40 = vsel %vm10080_vm3, %v10222_v22, %v10221_v32  ;;  %v31575_v28 = vrot.slane %v29405_v8, 1  ;;  %v31576_v4 = vrot.slane %v29405_v8, 3  ;;  %v10283_v10 = vsel %vm10080_vm3, %v10282_v61, %v10281_v38 }
 0x6a5   : > { %v10372_v11 = vsel %vm10080_vm3, %v10371_v56, %v10370_v39  ;;  %v31577_v45 = vrot.slane %v29405_v8, 5  ;;  %v10427_v30 = vsel %vm10080_vm3, %v10426_v3, %v10425_v46  ;;  %v10487_v31 = vsel %vm10080_vm3, %v10486_v7, %v10485_v37 }
 0x6a6   : > { %v10167_v6 = vsel %vm10083_vm4, %v31575_v28, %v10165_v9  ;;  %v29840_v63 = vsel %vm10083_vm4, %v31576_v4, %v10223_v40  ;;  %v29851_v14 = vsel %vm10083_vm4, %v29403_v24, %v10372_v11  ;;  %v31578_v32 = vrot.slane %v29403_v24, 2 }
 0x6a7   : > { %v29847_v27 = vsel %vm10083_vm4, %v31577_v45, %v10283_v10  ;;  %v31579_v38 = vrot.slane %v29403_v24, 4  ;;  %v10323_v59 = vsel %vm10080_vm3, %v10322_v62, %v29720_v25  ;;  %v10089_v35 = vsel %vm10080_vm3, %v10088_v23, %v29722_v41 }
 0x6a8   : > { %v10429_v33 = vsel %vm10083_vm4, %v31578_v32, %v10427_v30  ;;  %v31580_v54 = vand.u32 4294901760, %v29763_v52  ;;  %v31581_v37 = vrot.slane %v29403_v24, 6  ;;  %v31582_v22 = vrot.slane %v29405_v8, 6  ;;  %26737 = vmatmul.mubr.f32.vlgmr.msra.gmra.mrb[28].mxu1 %v29602_v48 }
 0x6a9   : > { %v10489_v39 = vsel %vm10083_vm4, %v31579_v38, %v10487_v31  ;;  %26770 = vmatpush3.msra.mxu1 %v29754_v49  ;;  %26771 = vmatprep.mubr.msk.f32.mxu1 %vm28435_vm2, %v31574_v44  ;;  %v10432_v38 = vrot.slane %v29498_v2, 4 }
 0x6aa   : > { %v12607_v46 = vsub.f32 %v29763_v52, %v31580_v54  ;;  %v10325_v60 = vsel %vm10083_vm4, %v31581_v37, %v10323_v59  ;;  %v10091_v61 = vsel %vm10083_vm4, %v31582_v22, %v10089_v35  ;;  %26774 = vmatprep.subr.mxu1 %v31574_v44  ;;  %v31583_v24 = vmov %v31580_v54 }
 0x6ab   : > { %v10115_v59 = vrot.slane %v29500_v36, 1  ;;  %v10169_v35 = vrot.slane %v29500_v36, 3  ;;  %v10228_v54 = vrot.slane %v29500_v36, 5  ;;  %v10288_v37 = vrot.slane %v29500_v36, 7 }
 0x6ac   : > { %v12608_v25 = vand.u32 4294901760, %v12607_v46  ;;  %26772 = vmatmul.mubr.f32.vlgmr.msra.gmra.mrb[30].mxu1 %v29684_v20  ;;  %v10349_v46 = vrot.slane %v29498_v2, 1  ;;  %v10198_v22 = vrot.slane %v29500_v36, 4 }
 0x6ad   : > { %26776 = vmatprep.mubr.msk.f32.mxu1 %vm28435_vm2, %v31574_v44 }
 0x6ae   : > { %26775 = vmatpush3.msra.mxu1 %v12608_v25  ;;  %v10435_v25 = vrot.slane %v29586_v47, 2 }
 0x6af   : > { %26779 = vmatprep.subr.mxu1 %v31574_v44 }
 0x6b4   : > { %26777 = vmatmul.mubr.f32.vlgmr.msra.gmra.mrb[30].mxu1 %v29602_v48 }
 0x6b5   : > { %26780 = vmatpush3.msra.mxu1 %v29763_v52  ;;  %26781 = vmatprep.mubr.msk.f32.mxu1 %vm28435_vm2, %v31574_v44 }
 0x6b6   : > { %26784 = vmatprep.subr.mxu1 %v31574_v44 }
 0x6bc   : > { %26782 = vmatmul.mubr.f32.vlgmr.msra.gmra.mrb[30].mxu1 %v29608_v17 }
 0x6bd   : > { %26785 = vmatpush3.msra.mxu1 %v29754_v49  ;;  %26786 = vmatprep.mubr.msk.f32.mxu1 %vm28435_vm2, %v31574_v44 }
 0x6be   : > { %26789 = vmatprep.subr.mxu1 %v31574_v44 }
 0x6c4   : > { %26787 = vmatmul.mubr.f32.vlgmr.msra.gmra.mrb[30].mxu1 %v29611_v50 }
 0x6c5   : > { %26790 = vmatpush3.msra.mxu1 %v31583_v24  ;;  %26791 = vmatprep.mubr.msk.f32.mxu1 %vm28435_vm2, %v31574_v44  ;;  %v10403_v24 = vrot.slane %v29498_v2, 3 }
 0x6c6   : > { %26794 = vmatprep.subr.mxu1 %v31574_v44 }
 0x6c7   : > { %v26510_v8 = vpop.f32.mrb[20].mxu1 }
 0x6c8   : > { %v8101_v20 = vpop.f32.mrb[21].mxu1  ;;  %v10347_v17 = vrot.slane %v26510_v8, 6  ;;  %v29900_v41 = vsel %vm10086_vm5, %v26510_v8, %v10401_v55  ;;  %v10460_v56 = vrot.slane %v26510_v8, 2  ;;  %v10520_v3 = vrot.slane %v26510_v8, 4 }
 0x6c9   : > { %v10140_v7 = vrot.slane %v8101_v20, 7  ;;  %v10196_v9 = vrot.slane %v8101_v20, 1  ;;  %v10256_v40 = vrot.slane %v8101_v20, 3  ;;  %v10113_v50 = vrot.slane %v8101_v20, 6 }
 0x6ca   : > { %v29904_v52 = vsel %vm10086_vm5, %v10347_v17, %v29800_v43  ;;  %v29908_v62 = vsel %vm10086_vm5, %v10460_v56, %v29822_v34  ;;  %v29911_v23 = vsel %vm10086_vm5, %v10520_v3, %v10519_v51  ;;  %v29914_v55 = vsel %vm10086_vm5, %v8101_v20, %v10167_v6 }
 0x6cb   : > { %31584 = vst [vmem:[#allocation23_spill] sm:$0xff] %v29911_v23  ;;  %31585 = vst [vmem:[#allocation24_spill] sm:$0xff] %v29914_v55  ;;  %v29918_v28 = vsel %vm10086_vm5, %v10140_v7, %v29813_v53  ;;  %v29922_v4 = vsel %vm10086_vm5, %v10196_v9, %v29816_v58  ;;  %v29926_v43 = vsel %vm10086_vm5, %v10256_v40, %v29819_v13  ;;  %v10226_v51 = vrot.slane %v8101_v20, 2 }
 0x6cc   : > { %v29930_v34 = vsel %vm10086_vm5, %v10113_v50, %v29829_v29  ;;  %26792 = vmatmul.mubr.f32.vlgmr.msra.gmra.mrb[30].mxu1 %v29602_v48  ;;  %v10286_v6 = vrot.slane %v8101_v20, 4  ;;  %v10374_v10 = vrot.slane %v26510_v8, 7  ;;  %v10430_v11 = vrot.slane %v26510_v8, 1 }
 0x6cd   : > { %31586 = vst [vmem:[#allocation25_spill] sm:$0xff] %v29930_v34  ;;  %26795 = vmatpush3.msra.mxu1 %v29754_v49  ;;  %26796 = vmatprep.mubr.msk.f32.mxu1 %vm28435_vm2, %v31574_v44  ;;  %v10490_v53 = vrot.slane %v26510_v8, 3  ;;  %v10326_v58 = vrot.slane %v26510_v8, 5  ;;  %v10092_v45 = vrot.slane %v8101_v20, 5  ;;  %v29939_v13 = vsel %vm10086_vm5, %v10226_v51, %v29840_v63 }
 0x6ce   : > { %26829 = vmatprep.subr.mxu1 %v31574_v44  ;;  %31587 = vst [vmem:[#allocation26_spill] sm:$0xff] %v29939_v13  ;;  %v29943_v29 = vsel %vm10086_vm5, %v10286_v6, %v29847_v27  ;;  %v29947_v30 = vsel %vm10086_vm5, %v10374_v10, %v29851_v14  ;;  %v29950_v49 = vsel %vm10086_vm5, %v10430_v11, %v10429_v33  ;;  %v12999_v27 = vld [vmem:[%s31542_s8] sm:$0xf]  ;;  %v10462_v8 = vrot.slane %v29498_v2, 5 }
 0x6cf   : > { %31588 = vst [vmem:[#allocation27_spill] sm:$0xff] %v29943_v29  ;;  %31589 = vst [vmem:[#allocation28_spill] sm:$0xff] %v29947_v30  ;;  %v29953_v31 = vsel %vm10086_vm5, %v10490_v53, %v10489_v39  ;;  %v29956_v32 = vsel %vm10086_vm5, %v10326_v58, %v10325_v60  ;;  %v29959_v63 = vsel %vm10086_vm5, %v10092_v45, %v10091_v61  ;;  %v29968_v14 = vsel %vm13003_vm6, %v12999_v27, 0 }
 0x6d0   : > { %31590 = vst [vmem:[#allocation29_spill] sm:$0xff] %v29950_v49  ;;  %31591 = vst [vmem:[#allocation30_spill] sm:$0xff] %v29953_v31  ;;  %v29971_v33 = vand.u32 4294901760, %v29968_v14  ;;  %v10492_v39 = vrot.slane %v29498_v2, 6  ;;  %v10142_v60 = vrot.slane %v29500_v36, 2  ;;  %v10258_v61 = vrot.slane %v29500_v36, 6 }
 0x6d1   : > { %31592 = vst [vmem:[#allocation31_spill] sm:$0xff] %v29956_v32  ;;  %31593 = vst [vmem:[#allocation32_spill] sm:$0xff] %v29959_v63  ;;  %v10522_v20 = vrot.slane %v29498_v2, 7  ;;  %v10117_v17 = vrot.slane %v29588_v21, 7  ;;  %v10495_v56 = vrot.slane %v29586_v47, 4  ;;  %v10351_v3 = vrot.slane %v29586_v47, 7 }
 0x6d2   : > { %26800 = vmatpush3.msra.mxu0 %v29971_v33  ;;  %v10406_v7 = vrot.slane %v29586_v47, 1  ;;  %v10172_v9 = vrot.slane %v29588_v21, 1  ;;  %v10231_v40 = vrot.slane %v29588_v21, 3  ;;  %v10291_v50 = vrot.slane %v29588_v21, 5 }
 0x6d3   : > { %26804 = vmatprep.subr.mxu0 %v31574_v44  ;;  %v10201_v51 = vrot.slane %v29588_v21, 2  ;;  %v10261_v10 = vrot.slane %v29588_v21, 4  ;;  %v10096_v11 = vrot.slane %v29588_v21, 6  ;;  %v10465_v53 = vrot.slane %v29586_v47, 3 }
 0x6d4   : > { %26797 = vmatmul.mubr.f32.vlgmr.msra.gmra.mrb[30].mxu1 %v29602_v48  ;;  %v10376_v48 = vrot.slane %v29498_v2, 2  ;;  %v10525_v58 = vrot.slane %v29586_v47, 5 }
 0x6d5   : > { %26831 = vmatprep.mubr.msk.f32.mxu1 %vm28435_vm2, %v31574_v44  ;;  %26830 = vmatpush3.msra.mxu1 %v29971_v33 }
 0x6d6   : > { %26834 = vmatprep.subr.mxu1 %v31574_v44 }
 0x6f3   : > { %v26570_v6 = vpop.f32.mrb[22].mxu1 }
 0x6f4   : > { %v9079_v45 = vpop.f32.mrb[23].mxu1  ;;  %v10377_v27 = vrot.slane %v26570_v6, 1  ;;  %v10433_v32 = vrot.slane %v26570_v6, 3  ;;  %v10493_v63 = vrot.slane %v26570_v6, 5  ;;  %v10350_v31 = vsel %vm10080_vm3, %v26570_v6, %v10349_v46 }
 0x6f5   : > { %v10116_v49 = vsel %vm10080_vm3, %v9079_v45, %v10115_v59  ;;  %v10170_v30 = vrot.slane %v9079_v45, 2  ;;  %v10229_v29 = vrot.slane %v9079_v45, 4  ;;  %v10289_v42 = vrot.slane %v9079_v45, 6 }
 0x6f6   : > { %v10118_v57 = vsel %vm10083_vm4, %v10117_v17, %v10116_v49  ;;  %v10378_v13 = vsel %vm10080_vm3, %v10377_v27, %v10376_v48  ;;  %v10434_v18 = vsel %vm10080_vm3, %v10433_v32, %v10432_v38  ;;  %v10494_v55 = vsel %vm10080_vm3, %v10493_v63, %v10492_v39 }
 0x6f7   : > { %v10171_v19 = vsel %vm10080_vm3, %v10170_v30, %v10169_v35  ;;  %v10230_v34 = vsel %vm10080_vm3, %v10229_v29, %v10228_v54  ;;  %v10290_v23 = vsel %vm10080_vm3, %v10289_v42, %v10288_v37  ;;  %v10379_v59 = vsel %vm10083_vm4, %v29586_v47, %v10378_v13 }
 0x6f8   : > { %v10173_v46 = vsel %vm10083_vm4, %v10172_v9, %v10171_v19  ;;  %v10232_v26 = vsel %vm10083_vm4, %v10231_v40, %v10230_v34  ;;  %v10292_v49 = vsel %vm10083_vm4, %v10291_v50, %v10290_v23  ;;  %v10436_v48 = vsel %vm10083_vm4, %v10435_v25, %v10434_v18 }
 0x6f9   : > { %v10496_v32 = vsel %vm10083_vm4, %v10495_v56, %v10494_v55  ;;  %v10143_v63 = vrot.slane %v9079_v45, 1  ;;  %v10199_v38 = vrot.slane %v9079_v45, 3  ;;  %v10259_v30 = vrot.slane %v9079_v45, 5 }
 0x6fa   : > { %v10094_v39 = vrot.slane %v9079_v45, 7  ;;  %v10352_v29 = vsel %vm10083_vm4, %v10351_v3, %v10350_v31  ;;  %v10404_v42 = vrot.slane %v26570_v6, 2  ;;  %v10463_v35 = vrot.slane %v26570_v6, 4 }
 0x6fb   : > { %v10144_v13 = vsel %vm10080_vm3, %v10143_v63, %v10142_v60  ;;  %v10200_v19 = vsel %vm10080_vm3, %v10199_v38, %v10198_v22  ;;  %v10260_v34 = vsel %vm10080_vm3, %v10259_v30, %v10258_v61  ;;  %v10523_v54 = vrot.slane %v26570_v6, 6 }
 0x6fc   : > { %v10145_v18 = vsel %vm10083_vm4, %v29588_v21, %v10144_v13  ;;  %v10202_v23 = vsel %vm10083_vm4, %v10201_v51, %v10200_v19  ;;  %v10262_v55 = vsel %vm10083_vm4, %v10261_v10, %v10260_v34  ;;  %v10095_v37 = vsel %vm10080_vm3, %v10094_v39, %v29500_v36 }
 0x6fd   : > { %v10097_v31 = vsel %vm10083_vm4, %v10096_v11, %v10095_v37  ;;  %v10405_v25 = vsel %vm10080_vm3, %v10404_v42, %v10403_v24  ;;  %v10464_v60 = vsel %vm10080_vm3, %v10463_v35, %v10462_v8  ;;  %v10524_v22 = vsel %vm10080_vm3, %v10523_v54, %v10522_v20 }
 0x6fe   : > { %v10407_v61 = vsel %vm10083_vm4, %v10406_v7, %v10405_v25  ;;  %v10466_v17 = vsel %vm10083_vm4, %v10465_v53, %v10464_v60  ;;  %v10526_v21 = vsel %vm10083_vm4, %v10525_v58, %v10524_v22  ;;  %v10328_v56 = vrot.slane %v26570_v6, 7 }
 0x6ff   : > { %v10330_v3 = vrot.slane %v29586_v47, 6  ;;  %v30089_v34 = vsub.f32 %v29968_v14, %v29971_v33 }
 0x700   : > { %v10329_v36 = vsel %vm10080_vm3, %v10328_v56, %v29498_v2 }
 0x701   : > { %v10331_v9 = vsel %vm10083_vm4, %v10330_v3, %v10329_v36  ;;  %v30094_v37 = vand.u32 4294901760, %v30089_v34 }
 0x703   : > { %v13087_v14 = vsub.f32 %v30089_v34, %v30094_v37 }
 0x705   : > { %v30100_v56 = vand.u32 4294901760, %v13087_v14  ;;  %v31603_v14 = vld [vmem:[#allocation27_spill] sm:$0xff] }
 0x71f   : > { %v26630_v40 = vpop.f32.mrb[24].mxu1 }
 0x720   : > { %v10057_v24 = vpop.f32.mrb[25].mxu1  ;;  %v10380_v50 = vrot.slane %v26630_v40, 7  ;;  %v10437_v8 = vrot.slane %v26630_v40, 1  ;;  %v10497_v51 = vrot.slane %v26630_v40, 3  ;;  %v10353_v20 = vrot.slane %v26630_v40, 6 }
 0x721   : > { %v10119_v10 = vrot.slane %v10057_v24, 6  ;;  %v30042_v7 = vsel %vm10086_vm5, %v10057_v24, %v10173_v46  ;;  %v10233_v11 = vrot.slane %v10057_v24, 2  ;;  %v10293_v53 = vrot.slane %v10057_v24, 4 }
 0x722   : > { %v30045_v6 = vsel %vm10086_vm5, %v10380_v50, %v10379_v59  ;;  %v30048_v47 = vsel %vm10086_vm5, %v10437_v8, %v10436_v48  ;;  %v30051_v2 = vsel %vm10086_vm5, %v10497_v51, %v10496_v32  ;;  %v10146_v58 = vrot.slane %v10057_v24, 7 }
 0x723   : > { %v10120_v45 = vsel %vm10086_vm5, %v10119_v10, %v10118_v57  ;;  %v30055_v27 = vsel %vm10086_vm5, %v10233_v11, %v10232_v26  ;;  %v30058_v46 = vsel %vm10086_vm5, %v10293_v53, %v10292_v49  ;;  %v10203_v63 = vrot.slane %v10057_v24, 1 }
 0x724   : > { %v30061_v38 = vsel %vm10086_vm5, %v10146_v58, %v10145_v18  ;;  %v10263_v59 = vrot.slane %v10057_v24, 3  ;;  %v10098_v30 = vrot.slane %v10057_v24, 5  ;;  %v30064_v48 = vsel %vm10086_vm5, %v10353_v20, %v10352_v29  ;;  %v31597_v58 = vld [vmem:[#allocation14_spill] sm:$0xff] }
 0x725   : > { %v30067_v32 = vsel %vm10086_vm5, %v10203_v63, %v10202_v23  ;;  %v30070_v57 = vsel %vm10086_vm5, %v26630_v40, %v10407_v61  ;;  %v10467_v26 = vrot.slane %v26630_v40, 2  ;;  %v10527_v39 = vrot.slane %v26630_v40, 4  ;;  %v31599_v63 = vld [vmem:[#allocation16_spill] sm:$0xff] }
 0x726   : > { %v30073_v49 = vsel %vm10086_vm5, %v10263_v59, %v10262_v55  ;;  %v30076_v42 = vsel %vm10086_vm5, %v10098_v30, %v10097_v31  ;;  %v10332_v35 = vrot.slane %v26630_v40, 5 }
 0x727   : > { %v30079_v13 = vsel %vm10086_vm5, %v10467_v26, %v10466_v17  ;;  %v30082_v29 = vsel %vm10086_vm5, %v10527_v39, %v10526_v21 }
 0x728   : > { %v30085_v19 = vsel %vm10086_vm5, %v10332_v35, %v10331_v9 }
 0x74f   : > { %v11631_v54 = vpop.f32.mrb[26].mxu1 }
 0x750   : > { %v12977_v18 = vrot.slane %v11631_v54, 4  ;;  %v26708_v23 = vpop.f32.mrb[27].mxu1 }
 0x752   : > { %v13001_v55 = vsel %vm13000_vm7, %v12977_v18, 0  ;;  %12981 = vrot.lane.b32.xlu0 %v12977_v18, %s28436_s12 }
 0x753   : > { %v13073_v31 = vand.u32 4294901760, %v13001_v55  ;;  %v12523_v25 = vpop.f32.mrb[30].mxu0 }
 0x754   : > { %v12979_v60 = vrot.slane %v12523_v25, 4  ;;  %v26768_v22 = vpop.f32.mrb[31].mxu0 }
 0x755   : > { %v13074_v61 = vsub.f32 %v13001_v55, %v13073_v31 }
 0x756   : > { %12985 = vrot.lane.b32.xlu0 %v12979_v60, %s28436_s12 }
 0x757   : > { %v13075_v17 = vand.u32 4294901760, %v13074_v61 }
 0x759   : > { %v13076_v21 = vsub.f32 %v13074_v61, %v13075_v17 }
 0x75a   : > { %12989 = vrot.lane.b32.xlu0 %v11631_v54, %s28436_s12  ;;  %v31600_v54 = vld [vmem:[#allocation26_spill] sm:$0xff] }
 0x75b   : > { %v13077_v3 = vand.u32 4294901760, %v13076_v21 }
 0x75d   : > { %26802 = vmatmul.mubr.f32.vlgmr.msra.gmra.mrb[32].mxu0 %v13077_v3  ;;  %v31606_v3 = vld [vmem:[#allocation17_spill] sm:$0xff] }
 0x75e   : > { %12993 = vrot.lane.b32.xlu0 %v12523_v25, %s28436_s12  ;;  %26805 = vmatpush3.msra.mxu0 %v30100_v56  ;;  %v31602_v25 = vld [vmem:[#allocation19_spill] sm:$0xff] }
 0x75f   : > { %26806 = vmatprep.mubr.msk.f32.mxu0 %vm28435_vm2, %v31574_v44  ;;  %26809 = vmatprep.subr.mxu0 %v31574_v44 }
 0x762   : > { %10121 = vrot.lane.b32.xlu0 %v29634_v0, %s28437_s17  ;;  %v13901_v0 = vsel %vm13000_vm7, %v12979_v60, 0 }
 0x765   : > { %26807 = vmatmul.mubr.f32.vlgmr.msra.gmra.mrb[32].mxu0 %v13073_v31 }
 0x766   : > { %10125 = vrot.lane.b32.xlu0 %v10120_v45, %s28437_s17  ;;  %26810 = vmatpush3.msra.mxu0 %v30089_v34  ;;  %v31598_v45 = vld [vmem:[#allocation24_spill] sm:$0xff] }
 0x767   : > { %26811 = vmatprep.mubr.msk.f32.mxu0 %vm28435_vm2, %v31574_v44  ;;  %26814 = vmatprep.subr.mxu0 %v31574_v44 }
 0x76a   : > { %10150 = vrot.lane.b32.xlu0 %v29918_v28, %s28438_s21 }
 0x76d   : > { %26812 = vmatmul.mubr.f32.vlgmr.msra.gmra.mrb[32].mxu0 %v13074_v61 }
 0x76e   : > { %10175 = vrot.lane.b32.xlu0 %v29617_v16, %s28439_s24  ;;  %26815 = vmatpush3.msra.mxu0 %v29971_v33  ;;  %v30128_v16 = vand.u32 4294901760, %v13901_v0 }
 0x76f   : > { %26816 = vmatprep.mubr.msk.f32.mxu0 %vm28435_vm2, %v31574_v44  ;;  %26819 = vmatprep.subr.mxu0 %v31574_v44 }
 0x770   : > { %v13970_v28 = vsub.f32 %v13901_v0, %v30128_v16 }
 0x772   : > { %10179 = vrot.lane.b32.xlu0 %v30042_v7, %s28439_s24  ;;  %v13971_v24 = vand.u32 4294901760, %v13970_v28 }
 0x774   : > { %v13972_v51 = vsub.f32 %v13970_v28, %v13971_v24 }
 0x775   : > { %26817 = vmatmul.mubr.f32.vlgmr.msra.gmra.mrb[32].mxu0 %v13075_v17  ;;  %v31605_v17 = vld [vmem:[#allocation28_spill] sm:$0xff] }
 0x776   : > { %10207 = vrot.lane.b32.xlu0 %v29922_v4, %s28440_s22  ;;  %26820 = vmatpush3.msra.mxu0 %v30094_v37  ;;  %v13973_v7 = vand.u32 4294901760, %v13972_v51 }
 0x777   : > { %26821 = vmatprep.mubr.msk.f32.mxu0 %vm28435_vm2, %v31574_v44  ;;  %26824 = vmatprep.subr.mxu0 %v31574_v44 }
 0x77a   : > { %10235 = vrot.lane.b32.xlu0 %v29638_v12, %s28441_s25 }
 0x77b   : > { %v30136_v36 = vpop.f32.mrb[28].mxu1 }
 0x77c   : > { %v12978_v9 = vrot.slane %v30136_v36, 4  ;;  %v26738_v4 = vpop.f32.mrb[29].mxu1 }
 0x77d   : > { %26822 = vmatmul.mubr.f32.vlgmr.msra.gmra.mrb[32].mxu0 %v13073_v31 }
 0x77e   : > { %v13453_v40 = vsel %vm13000_vm7, %v12978_v9, 0  ;;  %12983 = vrot.lane.b32.xlu1 %v12978_v9, %s28436_s12  ;;  %10239 = vrot.lane.b32.xlu0 %v30055_v27, %s28441_s25 }
 0x77f   : > { %v30143_v50 = vand.u32 4294901760, %v13453_v40  ;;  %26825 = vmatpush3.msra.mxu0 %v29971_v33  ;;  %26826 = vmatprep.mubr.msk.f32.mxu0 %vm28435_vm2, %v31574_v44 }
 0x780   : > { %26859 = vmatprep.subr.mxu0 %v31574_v44 }
 0x781   : > { %v13522_v12 = vsub.f32 %v13453_v40, %v30143_v50 }
 0x782   : > { %10267 = vrot.lane.b32.xlu0 %v29926_v43, %s28442_s19 }
 0x783   : > { %v13523_v8 = vand.u32 4294901760, %v13522_v12 }
 0x785   : > { %26827 = vmatmul.mubr.f32.vlgmr.msra.gmra.mrb[32].mxu0 %v13073_v31  ;;  %v13524_v20 = vsub.f32 %v13522_v12, %v13523_v8 }
 0x786   : > { %10295 = vrot.lane.b32.xlu0 %v29642_v15, %s31551_s11  ;;  %26860 = vmatpush3.msra.mxu0 %v29971_v33 }
 0x787   : > { %26861 = vmatprep.mubr.msk.f32.mxu0 %vm28435_vm2, %v31574_v44  ;;  %v13525_v10 = vand.u32 4294901760, %v13524_v20  ;;  %26864 = vmatprep.subr.mxu0 %v31574_v44 }
 0x789   : > { %26832 = vmatmul.mubr.f32.vlgmr.msra.gmra.mrb[32].mxu1 %v13525_v10  ;;  %26862 = vmatmul.mubr.f32.vlgmr.msra.gmra.mrb[34].mxu0 %v13973_v7  ;;  %v31609_v10 = vld [vmem:[#allocation30_spill] sm:$0xff] }
 0x78a   : > { %10299 = vrot.lane.b32.xlu0 %v30058_v46, %s31551_s11  ;;  %26835 = vmatpush3.msra.mxu1 %v30100_v56 }
 0x78b   : > { %26836 = vmatprep.mubr.msk.f32.mxu1 %vm28435_vm2, %v31574_v44  ;;  %26865 = vmatpush3.msra.mxu0 %v30100_v56 }
 0x78c   : > { %26866 = vmatprep.mubr.msk.f32.mxu0 %vm28435_vm2, %v31574_v44  ;;  %26839 = vmatprep.subr.mxu1 %v31574_v44 }
 0x78d   : > { %26869 = vmatprep.subr.mxu0 %v31574_v44 }
 0x78e   : > { %10357 = vrot.lane.b32.xlu0 %v29904_v52, %s28437_s17  ;;  %v31594_v52 = vld [vmem:[#allocation13_spill] sm:$0xff] }
 0x791   : > { %26837 = vmatmul.mubr.f32.vlgmr.msra.gmra.mrb[32].mxu1 %v30143_v50  ;;  %26867 = vmatmul.mubr.f32.vlgmr.msra.gmra.mrb[34].mxu0 %v30128_v16 }
 0x792   : > { %10382 = vrot.lane.b32.xlu0 %v29622_v5, %s28438_s21  ;;  %26840 = vmatpush3.msra.mxu1 %v30089_v34 }
 0x793   : > { %26841 = vmatprep.mubr.msk.f32.mxu1 %vm28435_vm2, %v31574_v44  ;;  %26870 = vmatpush3.msra.mxu0 %v30089_v34 }
 0x794   : > { %26871 = vmatprep.mubr.msk.f32.mxu0 %vm28435_vm2, %v31574_v44  ;;  %26844 = vmatprep.subr.mxu1 %v31574_v44 }
 0x795   : > { %26874 = vmatprep.subr.mxu0 %v31574_v44 }
 0x796   : > { %10386 = vrot.lane.b32.xlu0 %v30045_v6, %s28438_s21  ;;  %v31595_v6 = vld [vmem:[#allocation23_spill] sm:$0xff] }
 0x799   : > { %26842 = vmatmul.mubr.f32.vlgmr.msra.gmra.mrb[32].mxu1 %v13522_v12  ;;  %26872 = vmatmul.mubr.f32.vlgmr.msra.gmra.mrb[34].mxu0 %v13970_v28 }
 0x79a   : > { %10411 = vrot.lane.b32.xlu0 %v29900_v41, %s28439_s24  ;;  %26845 = vmatpush3.msra.mxu1 %v29971_v33 }
 0x79b   : > { %26846 = vmatprep.mubr.msk.f32.mxu1 %vm28435_vm2, %v31574_v44  ;;  %26875 = vmatpush3.msra.mxu0 %v29971_v33 }
 0x79c   : > { %26876 = vmatprep.mubr.msk.f32.mxu0 %vm28435_vm2, %v31574_v44  ;;  %26849 = vmatprep.subr.mxu1 %v31574_v44 }
 0x79d   : > { %26879 = vmatprep.subr.mxu0 %v31574_v44 }
 0x79e   : > { %10439 = vrot.lane.b32.xlu0 %v29626_v1, %s28440_s22 }
 0x7a1   : > { %26847 = vmatmul.mubr.f32.vlgmr.msra.gmra.mrb[32].mxu1 %v13523_v8  ;;  %26877 = vmatmul.mubr.f32.vlgmr.msra.gmra.mrb[34].mxu0 %v13971_v24  ;;  %v31608_v24 = vld [vmem:[#allocation20_spill] sm:$0xff] }
 0x7a2   : > { %10443 = vrot.lane.b32.xlu0 %v30048_v47, %s28440_s22  ;;  %26850 = vmatpush3.msra.mxu1 %v30094_v37 }
 0x7a3   : > { %26851 = vmatprep.mubr.msk.f32.mxu1 %vm28435_vm2, %v31574_v44  ;;  %26880 = vmatpush3.msra.mxu0 %v30094_v37 }
 0x7a4   : > { %26881 = vmatprep.mubr.msk.f32.mxu0 %vm28435_vm2, %v31574_v44  ;;  %26854 = vmatprep.subr.mxu1 %v31574_v44 }
 0x7a5   : > { %26884 = vmatprep.subr.mxu0 %v31574_v44 }
 0x7a6   : > { %10471 = vrot.lane.b32.xlu0 %v29908_v62, %s28441_s25 }
 0x7a7   : > { %v12969_v5 = vpop.f32.mrb[30].mxu1 }
 0x7a8   : > { %v12980_v1 = vrot.slane %v12969_v5, 4  ;;  %v26798_v15 = vpop.f32.mrb[31].mxu1 }
 0x7a9   : > { %26852 = vmatmul.mubr.f32.vlgmr.msra.gmra.mrb[32].mxu1 %v30143_v50  ;;  %26882 = vmatmul.mubr.f32.vlgmr.msra.gmra.mrb[34].mxu0 %v30128_v16 }
 0x7aa   : > { %v14349_v41 = vsel %vm13000_vm7, %v12980_v1, 0  ;;  %12987 = vrot.lane.b32.xlu1 %v12980_v1, %s28436_s12  ;;  %10499 = vrot.lane.b32.xlu0 %v31594_v52, %s28442_s19 }
 0x7ab   : > { %v30214_v43 = vand.u32 4294901760, %v14349_v41  ;;  %26855 = vmatpush3.msra.mxu1 %v29971_v33  ;;  %26856 = vmatprep.mubr.msk.f32.mxu1 %vm28435_vm2, %v31574_v44 }
 0x7ac   : > { %26885 = vmatpush3.msra.mxu0 %v29971_v33  ;;  %26886 = vmatprep.mubr.msk.f32.mxu0 %vm28435_vm2, %v31574_v44 }
 0x7ad   : > { %v14418_v62 = vsub.f32 %v14349_v41, %v30214_v43  ;;  %26889 = vmatprep.subr.mxu1 %v31574_v44  ;;  %26919 = vmatprep.subr.mxu0 %v31574_v44 }
 0x7ae   : > { %12991 = vrot.lane.b32.xlu1 %v30136_v36, %s28436_s12  ;;  %10503 = vrot.lane.b32.xlu0 %v30051_v2, %s28442_s19  ;;  %v31596_v2 = vld [vmem:[#allocation25_spill] sm:$0xff] }
 0x7af   : > { %v14419_v11 = vand.u32 4294901760, %v14418_v62  ;;  %v31607_v36 = vld [vmem:[#allocation29_spill] sm:$0xff] }
 0x7b1   : > { %26857 = vmatmul.mubr.f32.vlgmr.msra.gmra.mrb[32].mxu1 %v30143_v50  ;;  %26887 = vmatmul.mubr.f32.vlgmr.msra.gmra.mrb[34].mxu0 %v30128_v16  ;;  %v14420_v53 = vsub.f32 %v14418_v62, %v14419_v11 }
 0x7b2   : > { %12995 = vrot.lane.b32.xlu1 %v12969_v5, %s28436_s12  ;;  %10531 = vrot.lane.b32.xlu0 %v31595_v6, %s31551_s11 }
 0x7b3   : > { %26890 = vmatpush3.msra.mxu1 %v29971_v33  ;;  %26891 = vmatprep.mubr.msk.f32.mxu1 %vm28435_vm2, %v31574_v44  ;;  %v14421_v47 = vand.u32 4294901760, %v14420_v53 }
 0x7b4   : > { %26894 = vmatprep.subr.mxu1 %v31574_v44  ;;  %26920 = vmatpush3.msra.mxu0 %v29971_v33 }
 0x7b5   : > { %26892 = vmatmul.mubr.f32.vlgmr.msra.gmra.mrb[34].mxu1 %v14421_v47  ;;  %26921 = vmatprep.mubr.msk.f32.mxu0 %vm28435_vm2, %v31574_v44 }
 0x7b6   : > { %10123 = vrot.lane.b32.xlu1 %v31596_v2, %s28437_s17  ;;  %26895 = vmatpush3.msra.mxu1 %v30100_v56 }
 0x7b7   : > { %26896 = vmatprep.mubr.msk.f32.mxu1 %vm28435_vm2, %v31574_v44  ;;  %26899 = vmatprep.subr.mxu1 %v31574_v44 }
 0x7b8   : > { %26924 = vmatprep.subr.mxu0 %v31574_v44 }
 0x7ba   : > { %10148 = vrot.lane.b32.xlu1 %v31597_v58, %s28438_s21 }
 0x7bd   : > { %26897 = vmatmul.mubr.f32.vlgmr.msra.gmra.mrb[34].mxu1 %v30214_v43 }
 0x7be   : > { %10152 = vrot.lane.b32.xlu1 %v30061_v38, %s28438_s21  ;;  %26900 = vmatpush3.msra.mxu1 %v30089_v34 }
 0x7bf   : > { %26901 = vmatprep.mubr.msk.f32.mxu1 %vm28435_vm2, %v31574_v44  ;;  %26904 = vmatprep.subr.mxu1 %v31574_v44 }
 0x7c2   : > { %10177 = vrot.lane.b32.xlu1 %v31598_v45, %s28439_s24 }
 0x7c4   : > { %v12982_v27 = vpop.permute.xlu0 %12981 }
 0x7c5   : > { %v14797_v46 = vrot.slane %v12982_v27, 4  ;;  %26902 = vmatmul.mubr.f32.vlgmr.msra.gmra.mrb[34].mxu1 %v14418_v62 }
 0x7c6   : > { %10205 = vrot.lane.b32.xlu1 %v31599_v63, %s28440_s22  ;;  %26905 = vmatpush3.msra.mxu1 %v29971_v33 }
 0x7c7   : > { %v14798_v38 = vsel %vm13000_vm7, %v14797_v46, 0  ;;  %26906 = vmatprep.mubr.msk.f32.mxu1 %vm28435_vm2, %v31574_v44  ;;  %26909 = vmatprep.subr.mxu1 %v31574_v44 }
 0x7c8   : > { %v30266_v59 = vand.u32 4294901760, %v14798_v38  ;;  %v12986_v30 = vpop.permute.xlu0 %12985 }
 0x7ca   : > { %v14867_v26 = vsub.f32 %v14798_v38, %v30266_v59  ;;  %10209 = vrot.lane.b32.xlu1 %v30067_v32, %s28440_s22  ;;  %v31601_v32 = vld [vmem:[#allocation18_spill] sm:$0xff] }
 0x7cc   : > { %v14868_v39 = vand.u32 4294901760, %v14867_v26  ;;  %v30271_v35 = vpop.permute.xlu0 %12989 }
 0x7cd   : > { %26907 = vmatmul.mubr.f32.vlgmr.msra.gmra.mrb[34].mxu1 %v14419_v11  ;;  %v16593_v1 = vrot.slane %v30271_v35, 4  ;;  %v31611_v35 = vld [vmem:[#allocation32_spill] sm:$0xff] }
 0x7ce   : > { %10237 = vrot.lane.b32.xlu1 %v31600_v54, %s28441_s25  ;;  %v14869_v18 = vsub.f32 %v14867_v26, %v14868_v39  ;;  %26910 = vmatpush3.msra.mxu1 %v30094_v37 }
 0x7cf   : > { %26911 = vmatprep.mubr.msk.f32.mxu1 %vm28435_vm2, %v31574_v44  ;;  %26914 = vmatprep.subr.mxu1 %v31574_v44  ;;  %v16594_v15 = vsel %vm13000_vm7, %v16593_v1, 0 }
 0x7d0   : > { %v30279_v23 = vpop.permute.xlu0 %12993  ;;  %v14870_v55 = vand.u32 4294901760, %v14869_v18  ;;  %v30402_v52 = vand.u32 4294901760, %v16594_v15 }
 0x7d2   : > { %10265 = vrot.lane.b32.xlu1 %v31601_v32, %s28442_s19  ;;  %26922 = vmatmul.mubr.f32.vlgmr.msra.gmra.mrb[36].mxu0 %v14870_v55  ;;  %v30409_v62 = vsub.f32 %v16594_v15, %v30402_v52 }
 0x7d3   : > { %26925 = vmatpush3.msra.mxu0 %v30100_v56  ;;  %26926 = vmatprep.mubr.msk.f32.mxu0 %vm28435_vm2, %v31574_v44 }
 0x7d4   : > { %v10122_v31 = vpop.permute.xlu0 %10121  ;;  %26929 = vmatprep.subr.mxu0 %v31574_v44  ;;  %v16664_v58 = vand.u32 4294901760, %v30409_v62 }
 0x7d5   : > { %v30289_v60 = vsel %vm421_vm0, %v31602_v25, %v10122_v31  ;;  %26912 = vmatmul.mubr.f32.vlgmr.msra.gmra.mrb[34].mxu1 %v30214_v43 }
 0x7d6   : > { %10269 = vrot.lane.b32.xlu1 %v30073_v49, %s28442_s19  ;;  %26915 = vmatpush3.msra.mxu1 %v29971_v33  ;;  %v31604_v49 = vld [vmem:[#allocation15_spill] sm:$0xff]  ;;  %v16665_v38 = vsub.f32 %v30409_v62, %v16664_v58 }
 0x7d7   : > { %26916 = vmatprep.mubr.msk.f32.mxu1 %vm28435_vm2, %v31574_v44  ;;  %26949 = vmatprep.subr.mxu1 %v31574_v44 }
 0x7d8   : > { %v10126_v22 = vpop.permute.xlu0 %10125  ;;  %v16666_v18 = vand.u32 4294901760, %v16665_v38 }
 0x7d9   : > { %v30300_v61 = vsel %vm421_vm0, %v30076_v42, %v10126_v22  ;;  %v15695_v42 = vrot.slane %v12986_v30, 4 }
 0x7da   : > { %10297 = vrot.lane.b32.xlu1 %v31603_v14, %s31551_s11  ;;  %26927 = vmatmul.mubr.f32.vlgmr.msra.gmra.mrb[36].mxu0 %v30266_v59 }
 0x7db   : > { %26930 = vmatpush3.msra.mxu0 %v30089_v34  ;;  %26931 = vmatprep.mubr.msk.f32.mxu0 %vm28435_vm2, %v31574_v44  ;;  %v15696_v21 = vsel %vm13000_vm7, %v15695_v42, 0 }
 0x7dc   : > { %26934 = vmatprep.subr.mxu0 %v31574_v44  ;;  %v30368_v7 = vpop.permute.xlu0 %10150 }
 0x7dd   : > { %26917 = vmatmul.mubr.f32.vlgmr.msra.gmra.mrb[34].mxu1 %v30214_v43 }
 0x7de   : > { %10355 = vrot.lane.b32.xlu1 %v31604_v49, %s28437_s17  ;;  %26950 = vmatpush3.msra.mxu1 %v29971_v33 }
 0x7df   : > { %26951 = vmatprep.mubr.msk.f32.mxu1 %vm28435_vm2, %v31574_v44  ;;  %26954 = vmatprep.subr.mxu1 %v31574_v44 }
 0x7e0   : > { %v30382_v5 = vpop.permute.xlu0 %10175 }
 0x7e2   : > { %10359 = vrot.lane.b32.xlu1 %v30064_v48, %s28437_s17  ;;  %26932 = vmatmul.mubr.f32.vlgmr.msra.gmra.mrb[36].mxu0 %v14867_v26  ;;  %v30331_v48 = vand.u32 4294901760, %v15696_v21 }
 0x7e3   : > { %26935 = vmatpush3.msra.mxu0 %v29971_v33  ;;  %26936 = vmatprep.mubr.msk.f32.mxu0 %vm28435_vm2, %v31574_v44 }
 0x7e4   : > { %26939 = vmatprep.subr.mxu0 %v31574_v44  ;;  %v15765_v16 = vsub.f32 %v15696_v21, %v30331_v48 }
 0x7e6   : > { %10384 = vrot.lane.b32.xlu1 %v31605_v17, %s28438_s21 }
 0x7ea   : > { %10409 = vrot.lane.b32.xlu1 %v31606_v3, %s28439_s24  ;;  %26937 = vmatmul.mubr.f32.vlgmr.msra.gmra.mrb[36].mxu0 %v14868_v39 }
 0x7eb   : > { %26940 = vmatpush3.msra.mxu0 %v30094_v37  ;;  %26941 = vmatprep.mubr.msk.f32.mxu0 %vm28435_vm2, %v31574_v44 }
 0x7ec   : > { %26944 = vmatprep.subr.mxu0 %v31574_v44 }
 0x7ee   : > { %10413 = vrot.lane.b32.xlu1 %v30070_v57, %s28439_s24  ;;  %v15766_v57 = vand.u32 4294901760, %v15765_v16 }
 0x7f0   : > { %v12984_v0 = vpop.permute.xlu1 %12983  ;;  %v15767_v12 = vsub.f32 %v15765_v16, %v15766_v57 }
 0x7f1   : > { %v15246_v28 = vrot.slane %v12984_v0, 4  ;;  %v17491_v0 = vrot.slane %v30279_v23, 4 }
 0x7f2   : > { %10441 = vrot.lane.b32.xlu1 %v31607_v36, %s28440_s22  ;;  %26942 = vmatmul.mubr.f32.vlgmr.msra.gmra.mrb[36].mxu0 %v30266_v59  ;;  %v15768_v20 = vand.u32 4294901760, %v15767_v12 }
 0x7f3   : > { %v15247_v9 = vsel %vm13000_vm7, %v15246_v28, 0  ;;  %26945 = vmatpush3.msra.mxu0 %v29971_v33  ;;  %26946 = vmatprep.mubr.msk.f32.mxu0 %vm28435_vm2, %v31574_v44 }
 0x7f4   : > { %v30343_v4 = vand.u32 4294901760, %v15247_v9  ;;  %26979 = vmatprep.subr.mxu0 %v31574_v44 }
 0x7f6   : > { %v15316_v40 = vsub.f32 %v15247_v9, %v30343_v4  ;;  %10469 = vrot.lane.b32.xlu1 %v31608_v24, %s28441_s25  ;;  %v17492_v9 = vsel %vm13000_vm7, %v17491_v0, 0 }
 0x7f7   : > { %v30529_v23 = vand.u32 4294901760, %v17492_v9 }
 0x7f8   : > { %v15317_v50 = vand.u32 4294901760, %v15316_v40 }
 0x7f9   : > { %v30543_v12 = vsub.f32 %v17492_v9, %v30529_v23 }
 0x7fa   : > { %10473 = vrot.lane.b32.xlu1 %v30079_v13, %s28441_s25  ;;  %26947 = vmatmul.mubr.f32.vlgmr.msra.gmra.mrb[36].mxu0 %v30266_v59  ;;  %v15318_v8 = vsub.f32 %v15316_v40, %v15317_v50  ;;  %v31610_v13 = vld [vmem:[#allocation21_spill] sm:$0xff] }
 0x7fb   : > { %26980 = vmatpush3.msra.mxu0 %v29971_v33  ;;  %26981 = vmatprep.mubr.msk.f32.mxu0 %vm28435_vm2, %v31574_v44 }
 0x7fc   : > { %v15319_v51 = vand.u32 4294901760, %v15318_v8  ;;  %26984 = vmatprep.subr.mxu0 %v31574_v44 }
 0x7fe   : > { %10501 = vrot.lane.b32.xlu1 %v31609_v10, %s28442_s19  ;;  %26952 = vmatmul.mubr.f32.vlgmr.msra.gmra.mrb[36].mxu1 %v15319_v51 }
 0x7ff   : > { %26982 = vmatmul.mubr.f32.vlgmr.msra.gmra.mrb[38].mxu0 %v15768_v20  ;;  %26955 = vmatpush3.msra.mxu1 %v30100_v56  ;;  %v17562_v20 = vand.u32 4294901760, %v30543_v12 }
 0x800   : > { %26956 = vmatprep.mubr.msk.f32.mxu1 %vm28435_vm2, %v31574_v44  ;;  %26985 = vmatpush3.msra.mxu0 %v30100_v56 }
 0x801   : > { %26986 = vmatprep.mubr.msk.f32.mxu0 %vm28435_vm2, %v31574_v44  ;;  %26959 = vmatprep.subr.mxu1 %v31574_v44 }
 0x802   : > { %10529 = vrot.lane.b32.xlu1 %v31610_v13, %s31551_s11  ;;  %26989 = vmatprep.subr.mxu0 %v31574_v44 }
 0x806   : > { %10533 = vrot.lane.b32.xlu1 %v30082_v29, %s31551_s11  ;;  %26957 = vmatmul.mubr.f32.vlgmr.msra.gmra.mrb[36].mxu1 %v30343_v4  ;;  %v30388_v29 = vpop.permute.xlu0 %10179 }
 0x807   : > { %26987 = vmatmul.mubr.f32.vlgmr.msra.gmra.mrb[38].mxu0 %v30331_v48  ;;  %26960 = vmatpush3.msra.mxu1 %v30089_v34 }
 0x808   : > { %26961 = vmatprep.mubr.msk.f32.mxu1 %vm28435_vm2, %v31574_v44  ;;  %26990 = vmatpush3.msra.mxu0 %v30089_v34 }
 0x809   : > { %26991 = vmatprep.mubr.msk.f32.mxu0 %vm28435_vm2, %v31574_v44  ;;  %26964 = vmatprep.subr.mxu1 %v31574_v44 }
 0x80a   : > { %26994 = vmatprep.subr.mxu0 %v31574_v44  ;;  %v30396_v41 = vpop.permute.xlu0 %10207 }
 0x80e   : > { %26962 = vmatmul.mubr.f32.vlgmr.msra.gmra.mrb[36].mxu1 %v15316_v40  ;;  %v30411_v11 = vpop.permute.xlu0 %10235 }
 0x80f   : > { %26992 = vmatmul.mubr.f32.vlgmr.msra.gmra.mrb[38].mxu0 %v15765_v16  ;;  %26965 = vmatpush3.msra.mxu1 %v29971_v33 }
 0x810   : > { %26966 = vmatprep.mubr.msk.f32.mxu1 %vm28435_vm2, %v31574_v44  ;;  %26995 = vmatpush3.msra.mxu0 %v29971_v33 }
 0x811   : > { %26996 = vmatprep.mubr.msk.f32.mxu0 %vm28435_vm2, %v31574_v44  ;;  %26969 = vmatprep.subr.mxu1 %v31574_v44 }
 0x812   : > { %26999 = vmatprep.subr.mxu0 %v31574_v44  ;;  %v30432_v27 = vpop.permute.xlu0 %10239 }
 0x816   : > { %26967 = vmatmul.mubr.f32.vlgmr.msra.gmra.mrb[36].mxu1 %v15317_v50  ;;  %v30447_v39 = vpop.permute.xlu0 %10267 }
 0x817   : > { %26997 = vmatmul.mubr.f32.vlgmr.msra.gmra.mrb[38].mxu0 %v15766_v57  ;;  %26970 = vmatpush3.msra.mxu1 %v30094_v37 }
 0x818   : > { %26971 = vmatprep.mubr.msk.f32.mxu1 %vm28435_vm2, %v31574_v44  ;;  %27000 = vmatpush3.msra.mxu0 %v30094_v37 }
 0x819   : > { %27001 = vmatprep.mubr.msk.f32.mxu0 %vm28435_vm2, %v31574_v44  ;;  %26974 = vmatprep.subr.mxu1 %v31574_v44 }
 0x81a   : > { %27004 = vmatprep.subr.mxu0 %v31574_v44  ;;  %v30473_v22 = vpop.permute.xlu0 %10295 }
 0x81c   : > { %v12988_v43 = vpop.permute.xlu1 %12987 }
 0x81d   : > { %v16144_v53 = vrot.slane %v12988_v43, 4 }
 0x81e   : > { %26972 = vmatmul.mubr.f32.vlgmr.msra.gmra.mrb[36].mxu1 %v30343_v4  ;;  %v30489_v17 = vpop.permute.xlu0 %10299 }
 0x81f   : > { %v16145_v6 = vsel %vm13000_vm7, %v16144_v53, 0  ;;  %27002 = vmatmul.mubr.f32.vlgmr.msra.gmra.mrb[38].mxu0 %v30331_v48  ;;  %26975 = vmatpush3.msra.mxu1 %v29971_v33 }
 0x820   : > { %v30417_v47 = vand.u32 4294901760, %v16145_v6  ;;  %v30419_v2 = vpop.permute.xlu1 %12991  ;;  %26976 = vmatprep.mubr.msk.f32.mxu1 %vm28435_vm2, %v31574_v44  ;;  %27005 = vmatpush3.msra.mxu0 %v29971_v33 }
 0x821   : > { %27006 = vmatprep.mubr.msk.f32.mxu0 %vm28435_vm2, %v31574_v44  ;;  %27009 = vmatprep.subr.mxu1 %v31574_v44 }
 0x822   : > { %v30429_v45 = vsub.f32 %v16145_v6, %v30417_v47  ;;  %27039 = vmatprep.subr.mxu0 %v31574_v44  ;;  %v30498_v21 = vpop.permute.xlu0 %10357 }
 0x824   : > { %v16215_v46 = vand.u32 4294901760, %v30429_v45  ;;  %v30435_v63 = vpop.permute.xlu1 %12995 }
 0x826   : > { %26977 = vmatmul.mubr.f32.vlgmr.msra.gmra.mrb[36].mxu1 %v30343_v4  ;;  %v16216_v59 = vsub.f32 %v30429_v45, %v16215_v46  ;;  %v30515_v28 = vpop.permute.xlu0 %10382 }
 0x827   : > { %27007 = vmatmul.mubr.f32.vlgmr.msra.gmra.mrb[38].mxu0 %v30331_v48  ;;  %27010 = vmatpush3.msra.mxu1 %v29971_v33  ;;  %v17042_v48 = vrot.slane %v30419_v2, 4 }
 0x828   : > { %v10124_v30 = vpop.permute.xlu1 %10123  ;;  %27011 = vmatprep.mubr.msk.f32.mxu1 %vm28435_vm2, %v31574_v44  ;;  %27040 = vmatpush3.msra.mxu0 %v29971_v33  ;;  %v16217_v26 = vand.u32 4294901760, %v16216_v59  ;;  %v12998_v59 = vld [vmem:[%s31541_s7 + $0x8] sm:$0xff] }
 0x829   : > { %v10539_v54 = vsel %vm421_vm0, %v31611_v35, %v10124_v30  ;;  %27041 = vmatprep.mubr.msk.f32.mxu0 %vm28435_vm2, %v31574_v44  ;;  %27014 = vmatprep.subr.mxu1 %v31574_v44  ;;  %v17043_v36 = vsel %vm13000_vm7, %v17042_v48, 0 }
 0x82a   : > { %27012 = vmatmul.mubr.f32.vlgmr.msra.gmra.mrb[38].mxu1 %v16217_v26  ;;  %27044 = vmatprep.subr.mxu0 %v31574_v44  ;;  %v30457_v55 = vsel %vm10541_vm8, %v10539_v54, %v30368_v7  ;;  %v30522_v4 = vand.u32 4294901760, %v17043_v36  ;;  %v30535_v40 = vpop.permute.xlu0 %10386  ;;  %v31612_v26 = vld [vmem:[#allocation31_spill] sm:$0xff] }
 0x82b   : > { %27042 = vmatmul.mubr.f32.vlgmr.msra.gmra.mrb[40].mxu0 %v16666_v18  ;;  %27015 = vmatpush3.msra.mxu1 %v30100_v56  ;;  %v10566_v35 = vsel %vm421_vm0, %v31612_v26, %v30498_v21 }
 0x82c   : > { %v10149_v32 = vpop.permute.xlu1 %10148  ;;  %27016 = vmatprep.mubr.msk.f32.mxu1 %vm28435_vm2, %v31574_v44  ;;  %27045 = vmatpush3.msra.mxu0 %v30100_v56  ;;  %v30538_v24 = vsub.f32 %v17043_v36, %v30522_v4 }
 0x82d   : > { %v10542_v31 = vsel %vm10541_vm8, %v30289_v60, %v10149_v32  ;;  %27046 = vmatprep.mubr.msk.f32.mxu0 %vm28435_vm2, %v31574_v44  ;;  %27019 = vmatprep.subr.mxu1 %v31574_v44  ;;  %v17940_v32 = vrot.slane %v30435_v63, 4 }
 0x82e   : > { %v30470_v25 = vsel %vm10545_vm9, %v10542_v31, %v30382_v5  ;;  %27049 = vmatprep.subr.mxu0 %v31574_v44  ;;  %v17113_v8 = vand.u32 4294901760, %v30538_v24  ;;  %v30555_v10 = vpop.permute.xlu0 %10411  ;;  %v17563_v5 = vsub.f32 %v30543_v12, %v17562_v20  ;;  %v31613_v31 = vld [vmem:[#allocation22_spill] sm:$0xff] }
 0x830   : > { %v10153_v14 = vpop.permute.xlu1 %10152  ;;  %v17114_v7 = vsub.f32 %v30538_v24, %v17113_v8  ;;  %v17564_v43 = vand.u32 4294901760, %v17563_v5  ;;  %v17941_v5 = vsel %vm13000_vm7, %v17940_v32, 0 }
 0x831   : > { %v10544_v49 = vsel %vm10541_vm8, %v30300_v61, %v10153_v14 }
 0x832   : > { %27017 = vmatmul.mubr.f32.vlgmr.msra.gmra.mrb[38].mxu1 %v30417_v47  ;;  %v30480_v60 = vsel %vm10545_vm9, %v10544_v49, %v30388_v29  ;;  %v30568_v29 = vpop.permute.xlu0 %10439  ;;  %v17115_v15 = vand.u32 4294901760, %v17114_v7 }
 0x833   : > { %27047 = vmatmul.mubr.f32.vlgmr.msra.gmra.mrb[40].mxu0 %v30402_v52  ;;  %27020 = vmatpush3.msra.mxu1 %v30089_v34 }
 0x834   : > { %v30484_v42 = vpop.permute.xlu1 %10177  ;;  %27021 = vmatprep.mubr.msk.f32.mxu1 %vm28435_vm2, %v31574_v44  ;;  %27050 = vmatpush3.msra.mxu0 %v30089_v34 }
 0x835   : > { %27051 = vmatprep.mubr.msk.f32.mxu0 %vm28435_vm2, %v31574_v44  ;;  %27024 = vmatprep.subr.mxu1 %v31574_v44  ;;  %v10547_v54 = vsel %vm10545_vm9, %v30457_v55, %v30484_v42  ;;  %v18393_v55 = vsel %vm13000_vm7, %v12998_v59, 0 }
 0x836   : > { %27054 = vmatprep.subr.mxu0 %v31574_v44  ;;  %v30585_v53 = vpop.permute.xlu0 %10443  ;;  %v10551_v48 = vsel %vm10549_vm10, %v10547_v54, %v30396_v41 }
 0x838   : > { %v30495_v61 = vpop.permute.xlu1 %10205 }
 0x839   : > { %v10550_v63 = vsel %vm10549_vm10, %v30470_v25, %v30495_v61 }
 0x83a   : > { %27022 = vmatmul.mubr.f32.vlgmr.msra.gmra.mrb[38].mxu1 %v30429_v45  ;;  %v10472_v2 = vpop.permute.xlu0 %10471  ;;  %v12997_v45 = vld [vmem:[%s31541_s7] sm:$0xff] }
 0x83b   : > { %27052 = vmatmul.mubr.f32.vlgmr.msra.gmra.mrb[40].mxu0 %v30409_v62  ;;  %27025 = vmatpush3.msra.mxu1 %v29971_v33  ;;  %v18390_v30 = vsel %vm13000_vm7, %v12997_v45, 0 }
 0x83c   : > { %v30502_v3 = vpop.permute.xlu1 %10209  ;;  %27026 = vmatprep.mubr.msk.f32.mxu1 %vm28435_vm2, %v31574_v44  ;;  %27055 = vmatpush3.msra.mxu0 %v29971_v33  ;;  %v30630_v42 = vand.u32 4294901760, %v18390_v30 }
 0x83d   : > { %27056 = vmatprep.mubr.msk.f32.mxu0 %vm28435_vm2, %v31574_v44  ;;  %27029 = vmatprep.subr.mxu1 %v31574_v44 }
 0x83e   : > { %27059 = vmatprep.subr.mxu0 %v31574_v44  ;;  %v30604_v38 = vpop.permute.xlu0 %10499 }
 0x840   : > { %v30513_v16 = vpop.permute.xlu1 %10237 }
 0x841   : > { %v10555_v0 = vsel %vm10553_vm11, %v10551_v48, %v30513_v16  ;;  %v30653_v16 = vand.u32 4294901760, %v18393_v55 }
 0x842   : > { %27027 = vmatmul.mubr.f32.vlgmr.msra.gmra.mrb[38].mxu1 %v16215_v46  ;;  %v30633_v21 = vpop.permute.xlu0 %10503 }
 0x843   : > { %27057 = vmatmul.mubr.f32.vlgmr.msra.gmra.mrb[40].mxu0 %v16664_v58  ;;  %27030 = vmatpush3.msra.mxu1 %v30094_v37 }
 0x844   : > { %v30524_v57 = vpop.permute.xlu1 %10265  ;;  %27031 = vmatprep.mubr.msk.f32.mxu1 %vm28435_vm2, %v31574_v44  ;;  %27060 = vmatpush3.msra.mxu0 %v30094_v37 }
 0x845   : > { %27061 = vmatprep.mubr.msk.f32.mxu0 %vm28435_vm2, %v31574_v44  ;;  %27034 = vmatprep.subr.mxu1 %v31574_v44 }
 0x846   : > { %27064 = vmatprep.subr.mxu0 %v31574_v44 }
 0x848   : > { %v30540_v50 = vpop.permute.xlu1 %10269 }
 0x84a   : > { %27032 = vmatmul.mubr.f32.vlgmr.msra.gmra.mrb[38].mxu1 %v30417_v47 }
 0x84b   : > { %27062 = vmatmul.mubr.f32.vlgmr.msra.gmra.mrb[40].mxu0 %v30402_v52  ;;  %27035 = vmatpush3.msra.mxu1 %v29971_v33 }
 0x84c   : > { %v30549_v51 = vpop.permute.xlu1 %10297  ;;  %27036 = vmatprep.mubr.msk.f32.mxu1 %vm28435_vm2, %v31574_v44  ;;  %27065 = vmatpush3.msra.mxu0 %v29971_v33 }
 0x84d   : > { %27066 = vmatprep.mubr.msk.f32.mxu0 %vm28435_vm2, %v31574_v44  ;;  %27069 = vmatprep.subr.mxu1 %v31574_v44 }
 0x84e   : > { %27099 = vmatprep.subr.mxu0 %v31574_v44 }
 0x850   : > { %v10356_v13 = vpop.permute.xlu1 %10355 }
 0x851   : > { %v10565_v14 = vsel %vm421_vm0, %v31613_v31, %v10356_v13 }
 0x852   : > { %27037 = vmatmul.mubr.f32.vlgmr.msra.gmra.mrb[38].mxu1 %v30417_v47  ;;  %v10568_v9 = vsel %vm10541_vm8, %v10565_v14, %v30515_v28  ;;  %v30659_v28 = vsub.f32 %v18390_v30, %v30630_v42 }
 0x853   : > { %27067 = vmatmul.mubr.f32.vlgmr.msra.gmra.mrb[40].mxu0 %v30402_v52  ;;  %27070 = vmatpush3.msra.mxu1 %v29971_v33 }
 0x854   : > { %v30572_v1 = vpop.permute.xlu1 %10359  ;;  %27071 = vmatprep.mubr.msk.f32.mxu1 %vm28435_vm2, %v31574_v44  ;;  %27100 = vmatpush3.msra.mxu0 %v29971_v33 }
 0x855   : > { %27101 = vmatprep.mubr.msk.f32.mxu0 %vm28435_vm2, %v31574_v44  ;;  %27074 = vmatprep.subr.mxu1 %v31574_v44  ;;  %v10567_v25 = vsel %vm421_vm0, %v30085_v19, %v30572_v1  ;;  %v30670_v1 = vand.u32 4294901760, %v17941_v5 }
 0x856   : > { %27072 = vmatmul.mubr.f32.vlgmr.msra.gmra.mrb[40].mxu1 %v17115_v15  ;;  %27104 = vmatprep.subr.mxu0 %v31574_v44  ;;  %v10559_v15 = vsel %vm10557_vm12, %v10555_v0, %v30447_v39  ;;  %v10532_v39 = vpop.permute.xlu0 %10531 }
 0x857   : > { %27102 = vmatmul.mubr.f32.vlgmr.msra.gmra.mrb[42].mxu0 %v17564_v43  ;;  %27075 = vmatpush3.msra.mxu1 %v30100_v56  ;;  %v30702_v45 = vsub.f32 %v17941_v5, %v30670_v1 }
 0x858   : > { %v10385_v52 = vpop.permute.xlu1 %10384  ;;  %v13449_v62 = vpop.f32.mrb[32].mxu0  ;;  %27076 = vmatprep.mubr.msk.f32.mxu1 %vm28435_vm2, %v31574_v44  ;;  %27105 = vmatpush3.msra.mxu0 %v30100_v56 }
 0x859   : > { %v26828_v6 = vpop.f32.mrb[33].mxu0  ;;  %27106 = vmatprep.mubr.msk.f32.mxu0 %vm28435_vm2, %v31574_v44  ;;  %27079 = vmatprep.subr.mxu1 %v31574_v44  ;;  %v10569_v49 = vsel %vm10541_vm8, %v10566_v35, %v10385_v52  ;;  %v18396_v36 = vsel %vm13003_vm6, %v13449_v62, 0  ;;  %v10563_v62 = vsel %vm10561_vm13, %v10559_v15, %v30549_v51  ;;  %v30709_v51 = vand.u32 4294901760, %v30659_v28 }
 0x85a   : > { %27109 = vmatprep.subr.mxu0 %v31574_v44  ;;  %v10572_v13 = vsel %vm10545_vm9, %v10569_v49, %v30555_v10  ;;  %v10554_v10 = vsel %vm10553_vm11, %v10550_v63, %v30411_v11  ;;  %v30665_v19 = vand.u32 4294901760, %v18396_v36 }
 0x85b   : > { %v18467_v31 = vsub.f32 %v30659_v28, %v30709_v51 }
 0x85c   : > { %v10410_v47 = vpop.permute.xlu1 %10409 }
 0x85d   : > { %v10571_v41 = vsel %vm10545_vm9, %v10568_v9, %v10410_v47  ;;  %v30696_v47 = vsub.f32 %v18393_v55, %v30653_v16 }
 0x85e   : > { %27077 = vmatmul.mubr.f32.vlgmr.msra.gmra.mrb[40].mxu1 %v30522_v4 }
 0x85f   : > { %27107 = vmatmul.mubr.f32.vlgmr.msra.gmra.mrb[42].mxu0 %v30529_v23  ;;  %27080 = vmatpush3.msra.mxu1 %v30089_v34  ;;  %v30731_v35 = vand.u32 4294901760, %v30696_v47 }
 0x860   : > { %v10414_v58 = vpop.permute.xlu1 %10413  ;;  %27081 = vmatprep.mubr.msk.f32.mxu1 %vm28435_vm2, %v31574_v44  ;;  %27110 = vmatpush3.msra.mxu0 %v30089_v34 }
 0x861   : > { %27111 = vmatprep.mubr.msk.f32.mxu0 %vm28435_vm2, %v31574_v44  ;;  %27084 = vmatprep.subr.mxu1 %v31574_v44  ;;  %v18477_v55 = vsub.f32 %v30696_v47, %v30731_v35 }
 0x862   : > { %27114 = vmatprep.subr.mxu0 %v31574_v44 }
 0x863   : > { %v30760_v48 = vand.u32 4294901760, %v18477_v55 }
 0x864   : > { %v10442_v46 = vpop.permute.xlu1 %10441 }
 0x865   : > { %v10575_v61 = vsel %vm10549_vm10, %v10572_v13, %v10442_v46 }
 0x866   : > { %27082 = vmatmul.mubr.f32.vlgmr.msra.gmra.mrb[40].mxu1 %v30538_v24  ;;  %v10570_v24 = vsel %vm10541_vm8, %v10567_v25, %v30535_v40  ;;  %v10578_v11 = vsel %vm10553_vm11, %v10575_v61, %v10472_v2  ;;  %v10552_v40 = vsel %vm10549_vm10, %v30480_v60, %v30502_v3  ;;  %v30699_v2 = vsub.f32 %v18396_v36, %v30665_v19 }
 0x867   : > { %27112 = vmatmul.mubr.f32.vlgmr.msra.gmra.mrb[42].mxu0 %v30543_v12  ;;  %27085 = vmatpush3.msra.mxu1 %v29971_v33  ;;  %v10573_v12 = vsel %vm10545_vm9, %v10570_v24, %v10414_v58  ;;  %v10556_v46 = vsel %vm10553_vm11, %v10552_v40, %v30432_v27 }
 0x868   : > { %v10470_v18 = vpop.permute.xlu1 %10469  ;;  %27086 = vmatprep.mubr.msk.f32.mxu1 %vm28435_vm2, %v31574_v44  ;;  %27115 = vmatpush3.msra.mxu0 %v29971_v33  ;;  %v10576_v60 = vsel %vm10549_vm10, %v10573_v12, %v30585_v53  ;;  %v30728_v27 = vand.u32 4294901760, %v30699_v2 }
 0x869   : > { %27116 = vmatprep.mubr.msk.f32.mxu0 %vm28435_vm2, %v31574_v44  ;;  %27119 = vmatprep.subr.mxu0 %v31574_v44 }
 0x86a   : > { %27089 = vmatprep.subr.mxu1 %v31574_v44  ;;  %v18488_v49 = vsub.f32 %v30699_v2, %v30728_v27 }
 0x86c   : > { %v10474_v7 = vpop.permute.xlu1 %10473  ;;  %v18489_v63 = vand.u32 4294901760, %v18488_v49 }
 0x86d   : > { %v10579_v59 = vsel %vm10553_vm11, %v10576_v60, %v10474_v7 }
 0x86e   : > { %27087 = vmatmul.mubr.f32.vlgmr.msra.gmra.mrb[40].mxu1 %v17113_v8  ;;  %v10574_v8 = vsel %vm10549_vm10, %v10571_v41, %v30568_v29  ;;  %v10558_v29 = vsel %vm10557_vm12, %v10554_v10, %v30524_v57  ;;  %v10582_v54 = vsel %vm10557_vm12, %v10579_v59, %v30633_v21  ;;  %v30755_v21 = vand.u32 4294901760, %v18467_v31 }
 0x86f   : > { %27117 = vmatmul.mubr.f32.vlgmr.msra.gmra.mrb[42].mxu0 %v17562_v20  ;;  %27090 = vmatpush3.msra.mxu1 %v30094_v37  ;;  %v10577_v20 = vsel %vm10553_vm11, %v10574_v8, %v10470_v18  ;;  %v10562_v53 = vsel %vm10561_vm13, %v10558_v29, %v30473_v22  ;;  %v18011_v22 = vand.u32 4294901760, %v30702_v45 }
 0x870   : > { %v10502_v43 = vpop.permute.xlu1 %10501  ;;  %27120 = vmatpush3.msra.mxu0 %v30094_v37  ;;  %27091 = vmatprep.mubr.msk.f32.mxu1 %vm28435_vm2, %v31574_v44  ;;  %v10580_v57 = vsel %vm10557_vm12, %v10577_v20, %v30604_v38  ;;  %v10560_v38 = vsel %vm10557_vm12, %v10556_v46, %v30540_v50 }
 0x871   : > { %v10581_v52 = vsel %vm10557_vm12, %v10578_v11, %v10502_v43  ;;  %27121 = vmatprep.mubr.msk.f32.mxu0 %vm28435_vm2, %v31574_v44  ;;  %27124 = vmatprep.subr.mxu0 %v31574_v44  ;;  %v10564_v18 = vsel %vm10561_vm13, %v10560_v38, %v30489_v17  ;;  %v18012_v17 = vsub.f32 %v30702_v45, %v18011_v22 }
 0x872   : > { %v10584_v6 = vsel %vm10561_vm13, %v10581_v52, %v10532_v39  ;;  %27094 = vmatprep.subr.mxu1 %v31574_v44 }
 0x873   : > { %v10593_v58 = vcombine.low %v10563_v62, %v10584_v6  ;;  %v18013_v0 = vand.u32 4294901760, %v18012_v17 }
 0x874   : > { %v10530_v3 = vpop.permute.xlu1 %10529 }
 0x875   : > { %10599 = vst [vmem:[%s30716_s29 + $0x8] sm:$0xff] %v10593_v58  ;;  %v10583_v30 = vsel %vm10561_vm13, %v10580_v57, %v10530_v3 }
 0x876   : > { %v10592_v26 = vcombine.low %v10562_v53, %v10583_v30  ;;  %27092 = vmatmul.mubr.f32.vlgmr.msra.gmra.mrb[40].mxu1 %v30522_v4 }
 0x877   : > { %27122 = vmatmul.mubr.f32.vlgmr.msra.gmra.mrb[42].mxu0 %v30529_v23  ;;  %27095 = vmatpush3.msra.mxu1 %v29971_v33 }
 0x878   : > { %10598 = vst [vmem:[%s30716_s29] sm:$0xff] %v10592_v26  ;;  %27125 = vmatpush3.msra.mxu0 %v29971_v33  ;;  %v10534_v50 = vpop.permute.xlu1 %10533  ;;  %27096 = vmatprep.mubr.msk.f32.mxu1 %vm28435_vm2, %v31574_v44 }
 0x879   : > { %27159 = vmatprep.subr.mxu0 %v30665_v19  ;;  %v10585_v32 = vsel %vm10561_vm13, %v10582_v54, %v10534_v50  ;;  %27126 = vmatprep.mubr.msk.f32.mxu0 %vm28435_vm2, %v31574_v44 }
 0x87a   : > { %v10594_v14 = vcombine.low %v10564_v18, %v10585_v32  ;;  %27129 = vmatprep.subr.mxu1 %v31574_v44 }
 0x87c   : > { %10600 = vst [vmem:[%s30716_s29 + $0x10] sm:$0xff] %v10594_v14 }
 0x87e   : > { %27097 = vmatmul.mubr.f32.vlgmr.msra.gmra.mrb[40].mxu1 %v30522_v4 }
 0x87f   : > { %27127 = vmatmul.mubr.f32.vlgmr.msra.gmra.mrb[42].mxu0 %v30529_v23  ;;  %27130 = vmatpush3.msra.mxu1 %v29971_v33 }
 0x880   : > { %27160 = vmatpush3.msra.mxu0 %v30665_v19  ;;  %27131 = vmatprep.mubr.msk.f32.mxu1 %vm28435_vm2, %v31574_v44 }
 0x881   : > { %27164 = vmatprep.subr.mxu0 %v18489_v63  ;;  %27161 = vmatprep.mubr.f32.mxu0 %v30755_v21 }
 0x882   : > { %27132 = vmatmul.mubr.f32.vlgmr.msra.gmra.mrb[42].mxu1 %v18013_v0  ;;  %27134 = vmatprep.subr.mxu1 %v31574_v44 }
 0x883   : > { %27162 = vmatmul.mubr.f32.vlgmr.msra.gmra.mrb[44].mxu0 %v30760_v48  ;;  %27135 = vmatpush3.msra.mxu1 %v30100_v56 }
 0x884   : > { %27165 = vmatpush3.msra.mxu0 %v18489_v63  ;;  %v13897_v4 = vpop.f32.mrb[32].mxu1  ;;  %v14345_v23 = vpop.f32.mrb[34].mxu0  ;;  %27136 = vmatprep.mubr.msk.f32.mxu1 %vm28435_vm2, %v31574_v44 }
 0x885   : > { %27169 = vmatprep.subr.mxu0 %v30699_v2  ;;  %v26858_v36 = vpop.f32.mrb[33].mxu1  ;;  %v26888_v9 = vpop.f32.mrb[35].mxu0  ;;  %27166 = vmatprep.mubr.f32.mxu0 %v30630_v42  ;;  %v19380_v56 = vsel %vm13003_vm6, %v14345_v23, 0 }
 0x886   : > { %27139 = vmatprep.subr.mxu1 %v31574_v44  ;;  %v30796_v7 = vand.u32 4294901760, %v19380_v56 }
 0x888   : > { %v19470_v25 = vsub.f32 %v19380_v56, %v30796_v7 }
 0x88a   : > { %27137 = vmatmul.mubr.f32.vlgmr.msra.gmra.mrb[42].mxu1 %v30670_v1 }
 0x88b   : > { %27167 = vmatmul.mubr.f32.vlgmr.msra.gmra.mrb[44].mxu0 %v30653_v16  ;;  %27140 = vmatpush3.msra.mxu1 %v30089_v34  ;;  %v18888_v34 = vsel %vm13003_vm6, %v13897_v4, 0 }
 0x88c   : > { %27170 = vmatpush3.msra.mxu0 %v30699_v2  ;;  %27141 = vmatprep.mubr.msk.f32.mxu1 %vm28435_vm2, %v31574_v44  ;;  %v30794_v13 = vand.u32 4294901760, %v18888_v34 }
 0x88d   : > { %27174 = vmatprep.subr.mxu0 %v30665_v19  ;;  %27171 = vmatprep.mubr.f32.mxu0 %v30659_v28 }
 0x88e   : > { %27144 = vmatprep.subr.mxu1 %v31574_v44  ;;  %v18978_v5 = vsub.f32 %v18888_v34, %v30794_v13 }
 0x890   : > { %v18979_v41 = vand.u32 4294901760, %v18978_v5 }
 0x892   : > { %27142 = vmatmul.mubr.f32.vlgmr.msra.gmra.mrb[42].mxu1 %v30702_v45  ;;  %v18980_v61 = vsub.f32 %v18978_v5, %v18979_v41 }
 0x893   : > { %27172 = vmatmul.mubr.f32.vlgmr.msra.gmra.mrb[44].mxu0 %v30696_v47  ;;  %27145 = vmatpush3.msra.mxu1 %v29971_v33 }
 0x894   : > { %27175 = vmatpush3.msra.mxu0 %v30665_v19  ;;  %27146 = vmatprep.mubr.msk.f32.mxu1 %vm28435_vm2, %v31574_v44  ;;  %v18981_v15 = vand.u32 4294901760, %v18980_v61 }
 0x895   : > { %27179 = vmatprep.subr.mxu0 %v30728_v27  ;;  %27176 = vmatprep.mubr.f32.mxu0 %v30709_v51 }
 0x896   : > { %27149 = vmatprep.subr.mxu1 %v31574_v44 }
 0x89a   : > { %27147 = vmatmul.mubr.f32.vlgmr.msra.gmra.mrb[42].mxu1 %v18011_v22 }
 0x89b   : > { %27177 = vmatmul.mubr.f32.vlgmr.msra.gmra.mrb[44].mxu0 %v30731_v35  ;;  %27150 = vmatpush3.msra.mxu1 %v30094_v37  ;;  %v19471_v37 = vand.u32 4294901760, %v19470_v25 }
 0x89c   : > { %27180 = vmatpush3.msra.mxu0 %v30728_v27  ;;  %27151 = vmatprep.mubr.msk.f32.mxu1 %vm28435_vm2, %v31574_v44 }
 0x89d   : > { %27184 = vmatprep.subr.mxu0 %v30665_v19  ;;  %27154 = vmatprep.subr.mxu1 %v31574_v44  ;;  %v19472_v10 = vsub.f32 %v19470_v25, %v19471_v37 }
 0x89e   : > { %27181 = vmatprep.mubr.f32.mxu0 %v30630_v42 }
 0x8a2   : > { %27152 = vmatmul.mubr.f32.vlgmr.msra.gmra.mrb[42].mxu1 %v30670_v1 }
 0x8a3   : > { %27155 = vmatpush3.msra.mxu1 %v29971_v33  ;;  %27182 = vmatmul.mubr.f32.vlgmr.msra.gmra.mrb[44].mxu0 %v30653_v16  ;;  %v19473_v33 = vand.u32 4294901760, %v19472_v10 }
 0x8a4   : > { %27185 = vmatpush3.msra.mxu0 %v30665_v19  ;;  %27189 = vmatprep.subr.mxu1 %v30794_v13 }
 0x8a5   : > { %27219 = vmatprep.subr.mxu0 %v30796_v7  ;;  %27156 = vmatprep.mubr.msk.f32.mxu1 %vm28435_vm2, %v31574_v44 }
 0x8a6   : > { %27186 = vmatprep.mubr.f32.mxu0 %v30630_v42 }
 0x8aa   : > { %27157 = vmatmul.mubr.f32.vlgmr.msra.gmra.mrb[42].mxu1 %v30670_v1 }
 0x8ab   : > { %27187 = vmatmul.mubr.f32.vlgmr.msra.gmra.mrb[44].mxu0 %v30653_v16  ;;  %27190 = vmatpush3.msra.mxu1 %v30794_v13 }
 0x8ac   : > { %27220 = vmatpush3.msra.mxu0 %v30796_v7  ;;  %27194 = vmatprep.subr.mxu1 %v18981_v15 }
 0x8ad   : > { %27224 = vmatprep.subr.mxu0 %v19473_v33  ;;  %27191 = vmatprep.mubr.f32.mxu1 %v30755_v21 }
 0x8ae   : > { %27221 = vmatprep.mubr.f32.mxu0 %v30755_v21  ;;  %27192 = vmatmul.mubr.f32.vlgmr.msra.gmra.mrb[44].mxu1 %v30760_v48 }
 0x8af   : > { %27195 = vmatpush3.msra.mxu1 %v18981_v15  ;;  %27222 = vmatmul.mubr.f32.vlgmr.msra.gmra.mrb[46].mxu0 %v30760_v48 }
 0x8b0   : > { %27225 = vmatpush3.msra.mxu0 %v19473_v33  ;;  %27199 = vmatprep.subr.mxu1 %v18978_v5  ;;  %v14793_v44 = vpop.f32.mrb[34].mxu1 }
 0x8b1   : > { %27229 = vmatprep.subr.mxu0 %v19470_v25  ;;  %v26918_v19 = vpop.f32.mrb[35].mxu1  ;;  %27196 = vmatprep.mubr.f32.mxu1 %v30630_v42  ;;  %v19872_v1 = vsel %vm13003_vm6, %v14793_v44, 0 }
 0x8b2   : > { %27226 = vmatprep.mubr.f32.mxu0 %v30630_v42  ;;  %v30840_v24 = vand.u32 4294901760, %v19872_v1 }
 0x8b4   : > { %v19962_v8 = vsub.f32 %v19872_v1, %v30840_v24 }
 0x8b6   : > { %27197 = vmatmul.mubr.f32.vlgmr.msra.gmra.mrb[44].mxu1 %v30653_v16  ;;  %v19963_v12 = vand.u32 4294901760, %v19962_v8 }
 0x8b7   : > { %27200 = vmatpush3.msra.mxu1 %v18978_v5  ;;  %27227 = vmatmul.mubr.f32.vlgmr.msra.gmra.mrb[46].mxu0 %v30653_v16 }
 0x8b8   : > { %27230 = vmatpush3.msra.mxu0 %v19470_v25  ;;  %27204 = vmatprep.subr.mxu1 %v30794_v13  ;;  %v19964_v40 = vsub.f32 %v19962_v8, %v19963_v12 }
 0x8b9   : > { %27234 = vmatprep.subr.mxu0 %v30796_v7  ;;  %27201 = vmatprep.mubr.f32.mxu1 %v30659_v28 }
 0x8ba   : > { %27231 = vmatprep.mubr.f32.mxu0 %v30659_v28  ;;  %v19965_v6 = vand.u32 4294901760, %v19964_v40 }
 0x8be   : > { %27202 = vmatmul.mubr.f32.vlgmr.msra.gmra.mrb[44].mxu1 %v30696_v47 }
 0x8bf   : > { %27205 = vmatpush3.msra.mxu1 %v30794_v13  ;;  %27232 = vmatmul.mubr.f32.vlgmr.msra.gmra.mrb[46].mxu0 %v30696_v47 }
 0x8c0   : > { %27235 = vmatpush3.msra.mxu0 %v30796_v7  ;;  %27209 = vmatprep.subr.mxu1 %v18979_v41 }
 0x8c1   : > { %27239 = vmatprep.subr.mxu0 %v19471_v37  ;;  %27206 = vmatprep.mubr.f32.mxu1 %v30709_v51 }
 0x8c2   : > { %27236 = vmatprep.mubr.f32.mxu0 %v30709_v51 }
 0x8c6   : > { %27207 = vmatmul.mubr.f32.vlgmr.msra.gmra.mrb[44].mxu1 %v30731_v35 }
 0x8c7   : > { %27210 = vmatpush3.msra.mxu1 %v18979_v41  ;;  %27237 = vmatmul.mubr.f32.vlgmr.msra.gmra.mrb[46].mxu0 %v30731_v35 }
 0x8c8   : > { %27240 = vmatpush3.msra.mxu0 %v19471_v37  ;;  %27214 = vmatprep.subr.mxu1 %v30794_v13 }
 0x8c9   : > { %27244 = vmatprep.subr.mxu0 %v30796_v7  ;;  %27211 = vmatprep.mubr.f32.mxu1 %v30630_v42 }
 0x8ca   : > { %27241 = vmatprep.mubr.f32.mxu0 %v30630_v42 }
 0x8cd   : > { %v15242_v43 = vpop.f32.mrb[36].mxu0 }
 0x8ce   : > { %v20364_v11 = vsel %vm13003_vm6, %v15242_v43, 0  ;;  %v26948_v39 = vpop.f32.mrb[37].mxu0  ;;  %27212 = vmatmul.mubr.f32.vlgmr.msra.gmra.mrb[44].mxu1 %v30653_v16 }
 0x8cf   : > { %v30851_v20 = vand.u32 4294901760, %v20364_v11  ;;  %27215 = vmatpush3.msra.mxu1 %v30794_v13  ;;  %27242 = vmatmul.mubr.f32.vlgmr.msra.gmra.mrb[46].mxu0 %v30653_v16 }
 0x8d0   : > { %27245 = vmatpush3.msra.mxu0 %v30796_v7  ;;  %27249 = vmatprep.subr.mxu1 %v30840_v24 }
 0x8d1   : > { %v20454_v52 = vsub.f32 %v20364_v11, %v30851_v20  ;;  %27279 = vmatprep.subr.mxu0 %v30851_v20  ;;  %27216 = vmatprep.mubr.f32.mxu1 %v30630_v42 }
 0x8d2   : > { %27246 = vmatprep.mubr.f32.mxu0 %v30630_v42 }
 0x8d3   : > { %v20455_v29 = vand.u32 4294901760, %v20454_v52 }
 0x8d5   : > { %v20456_v62 = vsub.f32 %v20454_v52, %v20455_v29 }
 0x8d6   : > { %27217 = vmatmul.mubr.f32.vlgmr.msra.gmra.mrb[44].mxu1 %v30653_v16 }
 0x8d7   : > { %27247 = vmatmul.mubr.f32.vlgmr.msra.gmra.mrb[46].mxu0 %v30653_v16  ;;  %27250 = vmatpush3.msra.mxu1 %v30840_v24  ;;  %v20457_v2 = vand.u32 4294901760, %v20456_v62 }
 0x8d8   : > { %27280 = vmatpush3.msra.mxu0 %v30851_v20  ;;  %27254 = vmatprep.subr.mxu1 %v19965_v6 }
 0x8d9   : > { %27251 = vmatprep.mubr.f32.mxu1 %v30755_v21  ;;  %27281 = vmatprep.mubr.f32.mxu0 %v30755_v21 }
 0x8da   : > { %27284 = vmatprep.subr.mxu0 %v20457_v2  ;;  %27252 = vmatmul.mubr.f32.vlgmr.msra.gmra.mrb[46].mxu1 %v30760_v48 }
 0x8db   : > { %27255 = vmatpush3.msra.mxu1 %v19965_v6  ;;  %27282 = vmatmul.mubr.f32.vlgmr.msra.gmra.mrb[48].mxu0 %v30760_v48 }
 0x8dc   : > { %27285 = vmatpush3.msra.mxu0 %v20457_v2  ;;  %27259 = vmatprep.subr.mxu1 %v19962_v8 }
 0x8dd   : > { %27289 = vmatprep.subr.mxu0 %v20454_v52  ;;  %27256 = vmatprep.mubr.f32.mxu1 %v30630_v42 }
 0x8de   : > { %27286 = vmatprep.mubr.f32.mxu0 %v30630_v42 }
 0x8e2   : > { %27257 = vmatmul.mubr.f32.vlgmr.msra.gmra.mrb[46].mxu1 %v30653_v16 }
 0x8e3   : > { %27260 = vmatpush3.msra.mxu1 %v19962_v8  ;;  %27287 = vmatmul.mubr.f32.vlgmr.msra.gmra.mrb[48].mxu0 %v30653_v16 }
 0x8e4   : > { %27290 = vmatpush3.msra.mxu0 %v20454_v52  ;;  %27264 = vmatprep.subr.mxu1 %v30840_v24 }
 0x8e5   : > { %27294 = vmatprep.subr.mxu0 %v30851_v20  ;;  %27261 = vmatprep.mubr.f32.mxu1 %v30659_v28 }
 0x8e6   : > { %27291 = vmatprep.mubr.f32.mxu0 %v30659_v28 }
 0x8ea   : > { %27262 = vmatmul.mubr.f32.vlgmr.msra.gmra.mrb[46].mxu1 %v30696_v47 }
 0x8eb   : > { %27265 = vmatpush3.msra.mxu1 %v30840_v24  ;;  %27292 = vmatmul.mubr.f32.vlgmr.msra.gmra.mrb[48].mxu0 %v30696_v47 }
 0x8ec   : > { %27295 = vmatpush3.msra.mxu0 %v30851_v20  ;;  %27269 = vmatprep.subr.mxu1 %v19963_v12 }
 0x8ed   : > { %27299 = vmatprep.subr.mxu0 %v20455_v29  ;;  %27266 = vmatprep.mubr.f32.mxu1 %v30709_v51 }
 0x8ee   : > { %27296 = vmatprep.mubr.f32.mxu0 %v30709_v51 }
 0x8f2   : > { %27267 = vmatmul.mubr.f32.vlgmr.msra.gmra.mrb[46].mxu1 %v30731_v35 }
 0x8f3   : > { %27270 = vmatpush3.msra.mxu1 %v19963_v12  ;;  %27297 = vmatmul.mubr.f32.vlgmr.msra.gmra.mrb[48].mxu0 %v30731_v35 }
 0x8f4   : > { %27300 = vmatpush3.msra.mxu0 %v20455_v29  ;;  %27274 = vmatprep.subr.mxu1 %v30840_v24 }
 0x8f5   : > { %27304 = vmatprep.subr.mxu0 %v30851_v20  ;;  %27271 = vmatprep.mubr.f32.mxu1 %v30630_v42 }
 0x8f6   : > { %27301 = vmatprep.mubr.f32.mxu0 %v30630_v42 }
 0x8f9   : > { %v15691_v58 = vpop.f32.mrb[36].mxu1 }
 0x8fa   : > { %v20856_v45 = vsel %vm13003_vm6, %v15691_v58, 0  ;;  %v16140_v60 = vpop.f32.mrb[38].mxu0  ;;  %v26978_v3 = vpop.f32.mrb[37].mxu1  ;;  %27272 = vmatmul.mubr.f32.vlgmr.msra.gmra.mrb[46].mxu1 %v30653_v16 }
 0x8fb   : > { %v30891_v57 = vand.u32 4294901760, %v20856_v45  ;;  %v21348_v46 = vsel %vm13003_vm6, %v16140_v60, 0  ;;  %v27008_v59 = vpop.f32.mrb[39].mxu0  ;;  %27275 = vmatpush3.msra.mxu1 %v30840_v24  ;;  %27302 = vmatmul.mubr.f32.vlgmr.msra.gmra.mrb[48].mxu0 %v30653_v16 }
 0x8fc   : > { %v30896_v53 = vand.u32 4294901760, %v21348_v46  ;;  %27305 = vmatpush3.msra.mxu0 %v30851_v20  ;;  %27276 = vmatprep.mubr.f32.mxu1 %v30630_v42 }
 0x8fd   : > { %v20946_v30 = vsub.f32 %v20856_v45, %v30891_v57  ;;  %27309 = vmatprep.subr.mxu1 %v30891_v57  ;;  %27306 = vmatprep.mubr.f32.mxu0 %v30630_v42 }
 0x8fe   : > { %v21438_v38 = vsub.f32 %v21348_v46, %v30896_v53  ;;  %27339 = vmatprep.subr.mxu0 %v30896_v53 }
 0x8ff   : > { %v20947_v26 = vand.u32 4294901760, %v20946_v30 }
 0x900   : > { %v21439_v27 = vand.u32 4294901760, %v21438_v38 }
 0x901   : > { %v20948_v22 = vsub.f32 %v20946_v30, %v20947_v26 }
 0x902   : > { %27277 = vmatmul.mubr.f32.vlgmr.msra.gmra.mrb[46].mxu1 %v30653_v16  ;;  %v21440_v50 = vsub.f32 %v21438_v38, %v21439_v27 }
 0x903   : > { %27307 = vmatmul.mubr.f32.vlgmr.msra.gmra.mrb[48].mxu0 %v30653_v16  ;;  %27310 = vmatpush3.msra.mxu1 %v30891_v57  ;;  %v20949_v54 = vand.u32 4294901760, %v20948_v22 }
 0x904   : > { %27340 = vmatpush3.msra.mxu0 %v30896_v53  ;;  %27311 = vmatprep.mubr.f32.mxu1 %v30755_v21  ;;  %v21441_v18 = vand.u32 4294901760, %v21440_v50 }
 0x905   : > { %27314 = vmatprep.subr.mxu1 %v20949_v54  ;;  %27341 = vmatprep.mubr.f32.mxu0 %v30755_v21 }
 0x906   : > { %27344 = vmatprep.subr.mxu0 %v21441_v18  ;;  %27312 = vmatmul.mubr.f32.vlgmr.msra.gmra.mrb[48].mxu1 %v30760_v48 }
 0x907   : > { %27315 = vmatpush3.msra.mxu1 %v20949_v54  ;;  %27342 = vmatmul.mubr.f32.vlgmr.msra.gmra.mrb[50].mxu0 %v30760_v48 }
 0x908   : > { %27345 = vmatpush3.msra.mxu0 %v21441_v18  ;;  %27319 = vmatprep.subr.mxu1 %v20946_v30 }
 0x909   : > { %27349 = vmatprep.subr.mxu0 %v21438_v38  ;;  %27316 = vmatprep.mubr.f32.mxu1 %v30630_v42 }
 0x90a   : > { %27346 = vmatprep.mubr.f32.mxu0 %v30630_v42 }
 0x90e   : > { %27317 = vmatmul.mubr.f32.vlgmr.msra.gmra.mrb[48].mxu1 %v30653_v16 }
 0x90f   : > { %27320 = vmatpush3.msra.mxu1 %v20946_v30  ;;  %27347 = vmatmul.mubr.f32.vlgmr.msra.gmra.mrb[50].mxu0 %v30653_v16 }
 0x910   : > { %27350 = vmatpush3.msra.mxu0 %v21438_v38  ;;  %27324 = vmatprep.subr.mxu1 %v30891_v57 }
 0x911   : > { %27354 = vmatprep.subr.mxu0 %v30896_v53  ;;  %27321 = vmatprep.mubr.f32.mxu1 %v30659_v28 }
 0x912   : > { %27351 = vmatprep.mubr.f32.mxu0 %v30659_v28 }
 0x916   : > { %27322 = vmatmul.mubr.f32.vlgmr.msra.gmra.mrb[48].mxu1 %v30696_v47 }
 0x917   : > { %27325 = vmatpush3.msra.mxu1 %v30891_v57  ;;  %27352 = vmatmul.mubr.f32.vlgmr.msra.gmra.mrb[50].mxu0 %v30696_v47 }
 0x918   : > { %27355 = vmatpush3.msra.mxu0 %v30896_v53  ;;  %27329 = vmatprep.subr.mxu1 %v20947_v26 }
 0x919   : > { %27359 = vmatprep.subr.mxu0 %v21439_v27  ;;  %27326 = vmatprep.mubr.f32.mxu1 %v30709_v51 }
 0x91a   : > { %27356 = vmatprep.mubr.f32.mxu0 %v30709_v51 }
 0x91e   : > { %27327 = vmatmul.mubr.f32.vlgmr.msra.gmra.mrb[48].mxu1 %v30731_v35 }
 0x91f   : > { %27330 = vmatpush3.msra.mxu1 %v20947_v26  ;;  %27357 = vmatmul.mubr.f32.vlgmr.msra.gmra.mrb[50].mxu0 %v30731_v35 }
 0x920   : > { %27360 = vmatpush3.msra.mxu0 %v21439_v27  ;;  %27334 = vmatprep.subr.mxu1 %v30891_v57 }
 0x921   : > { %27364 = vmatprep.subr.mxu0 %v30896_v53  ;;  %27331 = vmatprep.mubr.f32.mxu1 %v30630_v42 }
 0x922   : > { %27361 = vmatprep.mubr.f32.mxu0 %v30630_v42 }
 0x925   : > { %v16589_v32 = vpop.f32.mrb[38].mxu1 }
 0x926   : > { %v21840_v31 = vsel %vm13003_vm6, %v16589_v32, 0  ;;  %v17038_v14 = vpop.f32.mrb[40].mxu0  ;;  %v27038_v49 = vpop.f32.mrb[39].mxu1  ;;  %27332 = vmatmul.mubr.f32.vlgmr.msra.gmra.mrb[48].mxu1 %v30653_v16 }
 0x927   : > { %v30935_v55 = vand.u32 4294901760, %v21840_v31  ;;  %v22332_v17 = vsel %vm13003_vm6, %v17038_v14, 0  ;;  %v27068_v63 = vpop.f32.mrb[41].mxu0  ;;  %27335 = vmatpush3.msra.mxu1 %v30891_v57  ;;  %27362 = vmatmul.mubr.f32.vlgmr.msra.gmra.mrb[50].mxu0 %v30653_v16 }
 0x928   : > { %v30940_v0 = vand.u32 4294901760, %v22332_v17  ;;  %27365 = vmatpush3.msra.mxu0 %v30896_v53  ;;  %27336 = vmatprep.mubr.f32.mxu1 %v30630_v42 }
 0x929   : > { %v21930_v4 = vsub.f32 %v21840_v31, %v30935_v55  ;;  %27369 = vmatprep.subr.mxu1 %v30935_v55  ;;  %27366 = vmatprep.mubr.f32.mxu0 %v30630_v42 }
 0x92a   : > { %v22422_v23 = vsub.f32 %v22332_v17, %v30940_v0  ;;  %27399 = vmatprep.subr.mxu0 %v30940_v0 }
 0x92b   : > { %v21931_v36 = vand.u32 4294901760, %v21930_v4 }
 0x92c   : > { %v22423_v9 = vand.u32 4294901760, %v22422_v23 }
 0x92d   : > { %v21932_v34 = vsub.f32 %v21930_v4, %v21931_v36 }
 0x92e   : > { %27337 = vmatmul.mubr.f32.vlgmr.msra.gmra.mrb[48].mxu1 %v30653_v16  ;;  %v22424_v56 = vsub.f32 %v22422_v23, %v22423_v9 }
 0x92f   : > { %27367 = vmatmul.mubr.f32.vlgmr.msra.gmra.mrb[50].mxu0 %v30653_v16  ;;  %27370 = vmatpush3.msra.mxu1 %v30935_v55  ;;  %v21933_v13 = vand.u32 4294901760, %v21932_v34 }
 0x930   : > { %27400 = vmatpush3.msra.mxu0 %v30940_v0  ;;  %27371 = vmatprep.mubr.f32.mxu1 %v30755_v21  ;;  %v22425_v7 = vand.u32 4294901760, %v22424_v56 }
 0x931   : > { %27374 = vmatprep.subr.mxu1 %v21933_v13  ;;  %27401 = vmatprep.mubr.f32.mxu0 %v30755_v21 }
 0x932   : > { %27404 = vmatprep.subr.mxu0 %v22425_v7  ;;  %27372 = vmatmul.mubr.f32.vlgmr.msra.gmra.mrb[50].mxu1 %v30760_v48 }
 0x933   : > { %27375 = vmatpush3.msra.mxu1 %v21933_v13  ;;  %27402 = vmatmul.mubr.f32.vlgmr.msra.gmra.mrb[52].mxu0 %v30760_v48 }
 0x934   : > { %27405 = vmatpush3.msra.mxu0 %v22425_v7  ;;  %27379 = vmatprep.subr.mxu1 %v21930_v4 }
 0x935   : > { %27409 = vmatprep.subr.mxu0 %v22422_v23  ;;  %27376 = vmatprep.mubr.f32.mxu1 %v30630_v42 }
 0x936   : > { %27406 = vmatprep.mubr.f32.mxu0 %v30630_v42 }
 0x93a   : > { %27377 = vmatmul.mubr.f32.vlgmr.msra.gmra.mrb[50].mxu1 %v30653_v16 }
 0x93b   : > { %27380 = vmatpush3.msra.mxu1 %v21930_v4  ;;  %27407 = vmatmul.mubr.f32.vlgmr.msra.gmra.mrb[52].mxu0 %v30653_v16 }
 0x93c   : > { %27410 = vmatpush3.msra.mxu0 %v22422_v23  ;;  %27384 = vmatprep.subr.mxu1 %v30935_v55 }
 0x93d   : > { %27414 = vmatprep.subr.mxu0 %v30940_v0  ;;  %27381 = vmatprep.mubr.f32.mxu1 %v30659_v28 }
 0x93e   : > { %27411 = vmatprep.mubr.f32.mxu0 %v30659_v28 }
 0x942   : > { %27382 = vmatmul.mubr.f32.vlgmr.msra.gmra.mrb[50].mxu1 %v30696_v47 }
 0x943   : > { %27385 = vmatpush3.msra.mxu1 %v30935_v55  ;;  %27412 = vmatmul.mubr.f32.vlgmr.msra.gmra.mrb[52].mxu0 %v30696_v47 }
 0x944   : > { %27415 = vmatpush3.msra.mxu0 %v30940_v0  ;;  %27389 = vmatprep.subr.mxu1 %v21931_v36 }
 0x945   : > { %27419 = vmatprep.subr.mxu0 %v22423_v9  ;;  %27386 = vmatprep.mubr.f32.mxu1 %v30709_v51 }
 0x946   : > { %27416 = vmatprep.mubr.f32.mxu0 %v30709_v51 }
 0x94a   : > { %27387 = vmatmul.mubr.f32.vlgmr.msra.gmra.mrb[50].mxu1 %v30731_v35 }
 0x94b   : > { %27390 = vmatpush3.msra.mxu1 %v21931_v36  ;;  %27417 = vmatmul.mubr.f32.vlgmr.msra.gmra.mrb[52].mxu0 %v30731_v35 }
 0x94c   : > { %27420 = vmatpush3.msra.mxu0 %v22423_v9  ;;  %27394 = vmatprep.subr.mxu1 %v30935_v55 }
 0x94d   : > { %27424 = vmatprep.subr.mxu0 %v30940_v0  ;;  %27391 = vmatprep.mubr.f32.mxu1 %v30630_v42 }
 0x94e   : > { %27421 = vmatprep.mubr.f32.mxu0 %v30630_v42 }
 0x951   : > { %v17487_v5 = vpop.f32.mrb[40].mxu1 }
 0x952   : > { %v22824_v25 = vsel %vm13003_vm6, %v17487_v5, 0  ;;  %v17936_v41 = vpop.f32.mrb[42].mxu0  ;;  %v27098_v37 = vpop.f32.mrb[41].mxu1  ;;  %27392 = vmatmul.mubr.f32.vlgmr.msra.gmra.mrb[50].mxu1 %v30653_v16 }
 0x953   : > { %v30979_v61 = vand.u32 4294901760, %v22824_v25  ;;  %v23316_v10 = vsel %vm13003_vm6, %v17936_v41, 0  ;;  %v27128_v15 = vpop.f32.mrb[43].mxu0  ;;  %27395 = vmatpush3.msra.mxu1 %v30935_v55  ;;  %27422 = vmatmul.mubr.f32.vlgmr.msra.gmra.mrb[52].mxu0 %v30653_v16 }
 0x954   : > { %v23319_v33 = vand.u32 4294901760, %v23316_v10  ;;  %27425 = vmatpush3.msra.mxu0 %v30940_v0  ;;  %27396 = vmatprep.mubr.f32.mxu1 %v30630_v42 }
 0x955   : > { %v22914_v44 = vsub.f32 %v22824_v25, %v30979_v61  ;;  %27429 = vmatprep.subr.mxu1 %v30979_v61  ;;  %27426 = vmatprep.mubr.f32.mxu0 %v30630_v42 }
 0x956   : > { %v23406_v19 = vsub.f32 %v23316_v10, %v23319_v33  ;;  %27459 = vmatprep.subr.mxu0 %v23319_v33 }
 0x957   : > { %v22915_v1 = vand.u32 4294901760, %v22914_v44 }
 0x958   : > { %v23407_v24 = vand.u32 4294901760, %v23406_v19 }
 0x959   : > { %v22916_v8 = vsub.f32 %v22914_v44, %v22915_v1 }
 0x95a   : > { %27397 = vmatmul.mubr.f32.vlgmr.msra.gmra.mrb[50].mxu1 %v30653_v16  ;;  %v23408_v43 = vsub.f32 %v23406_v19, %v23407_v24 }
 0x95b   : > { %27427 = vmatmul.mubr.f32.vlgmr.msra.gmra.mrb[52].mxu0 %v30653_v16  ;;  %27430 = vmatpush3.msra.mxu1 %v30979_v61  ;;  %v22917_v11 = vand.u32 4294901760, %v22916_v8 }
 0x95c   : > { %27460 = vmatpush3.msra.mxu0 %v23319_v33  ;;  %27431 = vmatprep.mubr.f32.mxu1 %v30755_v21  ;;  %v23409_v39 = vand.u32 4294901760, %v23408_v43 }
 0x95d   : > { %27434 = vmatprep.subr.mxu1 %v22917_v11  ;;  %27461 = vmatprep.mubr.f32.mxu0 %v30755_v21 }
 0x95e   : > { %27464 = vmatprep.subr.mxu0 %v23409_v39  ;;  %27432 = vmatmul.mubr.f32.vlgmr.msra.gmra.mrb[52].mxu1 %v30760_v48 }
 0x95f   : > { %27435 = vmatpush3.msra.mxu1 %v22917_v11  ;;  %27462 = vmatmul.mubr.f32.vlgmr.msra.gmra.mrb[54].mxu0 %v30760_v48 }
 0x960   : > { %27465 = vmatpush3.msra.mxu0 %v23409_v39  ;;  %27439 = vmatprep.subr.mxu1 %v22914_v44 }
 0x961   : > { %27469 = vmatprep.subr.mxu0 %v23406_v19  ;;  %27436 = vmatprep.mubr.f32.mxu1 %v30630_v42 }
 0x962   : > { %27466 = vmatprep.mubr.f32.mxu0 %v30630_v42 }
 0x966   : > { %27437 = vmatmul.mubr.f32.vlgmr.msra.gmra.mrb[52].mxu1 %v30653_v16 }
 0x967   : > { %27440 = vmatpush3.msra.mxu1 %v22914_v44  ;;  %27467 = vmatmul.mubr.f32.vlgmr.msra.gmra.mrb[54].mxu0 %v30653_v16 }
 0x968   : > { %27470 = vmatpush3.msra.mxu0 %v23406_v19  ;;  %27444 = vmatprep.subr.mxu1 %v30979_v61 }
 0x969   : > { %27474 = vmatprep.subr.mxu0 %v23319_v33  ;;  %27441 = vmatprep.mubr.f32.mxu1 %v30659_v28 }
 0x96a   : > { %27471 = vmatprep.mubr.f32.mxu0 %v30659_v28 }
 0x96e   : > { %27442 = vmatmul.mubr.f32.vlgmr.msra.gmra.mrb[52].mxu1 %v30696_v47 }
 0x96f   : > { %27445 = vmatpush3.msra.mxu1 %v30979_v61  ;;  %27472 = vmatmul.mubr.f32.vlgmr.msra.gmra.mrb[54].mxu0 %v30696_v47 }
 0x970   : > { %27475 = vmatpush3.msra.mxu0 %v23319_v33  ;;  %27449 = vmatprep.subr.mxu1 %v22915_v1 }
 0x971   : > { %27479 = vmatprep.subr.mxu0 %v23407_v24  ;;  %27446 = vmatprep.mubr.f32.mxu1 %v30709_v51 }
 0x972   : > { %27476 = vmatprep.mubr.f32.mxu0 %v30709_v51 }
 0x976   : > { %27447 = vmatmul.mubr.f32.vlgmr.msra.gmra.mrb[52].mxu1 %v30731_v35 }
 0x977   : > { %27450 = vmatpush3.msra.mxu1 %v22915_v1  ;;  %27477 = vmatmul.mubr.f32.vlgmr.msra.gmra.mrb[54].mxu0 %v30731_v35 }
 0x978   : > { %27480 = vmatpush3.msra.mxu0 %v23407_v24  ;;  %27454 = vmatprep.subr.mxu1 %v30979_v61 }
 0x979   : > { %27484 = vmatprep.subr.mxu0 %v23319_v33  ;;  %27451 = vmatprep.mubr.f32.mxu1 %v30630_v42 }
 0x97a   : > { %27481 = vmatprep.mubr.f32.mxu0 %v30630_v42 }
 0x97d   : > { %v18385_v12 = vpop.f32.mrb[42].mxu1 }
 0x97e   : > { %v23808_v20 = vsel %vm13003_vm6, %v18385_v12, 0  ;;  %v27158_v52 = vpop.f32.mrb[43].mxu1  ;;  %27452 = vmatmul.mubr.f32.vlgmr.msra.gmra.mrb[52].mxu1 %v30653_v16  ;;  %v31015_v40 = vpop.f32.mrb[44].mxu0 }
 0x97f   : > { %v23811_v29 = vand.u32 4294901760, %v23808_v20  ;;  %27455 = vmatpush3.msra.mxu1 %v30979_v61  ;;  %27482 = vmatmul.mubr.f32.vlgmr.msra.gmra.mrb[54].mxu0 %v30653_v16  ;;  %v31019_v62 = vpop.f32.mrb[45].mxu0  ;;  %v24707_v57 = vrot.slane %v31015_v40, 6  ;;  %v24737_v26 = vrot.slane %v31015_v40, 7 }
 0x980   : > { %27485 = vmatpush3.msra.mxu0 %v23319_v33  ;;  %27456 = vmatprep.mubr.f32.mxu1 %v30630_v42  ;;  %v24386_v60 = vrot.slane %v31019_v62, 3  ;;  %v24332_v3 = vrot.slane %v31019_v62, 1  ;;  %v24443_v46 = vrot.slane %v31019_v62, 5  ;;  %v24359_v53 = vrot.slane %v31019_v62, 2 }
 0x981   : > { %v23898_v6 = vsub.f32 %v23808_v20, %v23811_v29  ;;  %27489 = vmatprep.subr.mxu1 %v23811_v29  ;;  %27486 = vmatprep.mubr.f32.mxu0 %v30630_v42  ;;  %v24473_v30 = vrot.slane %v31019_v62, 6  ;;  %v24503_v38 = vrot.slane %v31019_v62, 7 }
 0x983   : > { %v23899_v2 = vand.u32 4294901760, %v23898_v6 }
 0x985   : > { %v23900_v58 = vsub.f32 %v23898_v6, %v23899_v2 }
 0x986   : > { %27457 = vmatmul.mubr.f32.vlgmr.msra.gmra.mrb[52].mxu1 %v30653_v16 }
 0x987   : > { %27487 = vmatmul.mubr.f32.vlgmr.msra.gmra.mrb[54].mxu0 %v30653_v16  ;;  %27490 = vmatpush3.msra.mxu1 %v23811_v29  ;;  %v23901_v45 = vand.u32 4294901760, %v23900_v58 }
 0x988   : > { %27491 = vmatprep.mubr.f32.mxu1 %v30755_v21  ;;  %v24620_v21 = vrot.slane %v31015_v40, 3 }
 0x989   : > { %27494 = vmatprep.subr.mxu1 %v23901_v45 }
 0x98a   : > { %27492 = vmatmul.mubr.f32.vlgmr.msra.gmra.mrb[54].mxu1 %v30760_v48  ;;  %v24593_v48 = vrot.slane %v31015_v40, 2 }
 0x98b   : > { %27495 = vmatpush3.msra.mxu1 %v23901_v45  ;;  %27496 = vmatprep.mubr.f32.mxu1 %v30630_v42 }
 0x98c   : > { %27499 = vmatprep.subr.mxu1 %v23898_v6 }
 0x992   : > { %27497 = vmatmul.mubr.f32.vlgmr.msra.gmra.mrb[54].mxu1 %v30653_v16 }
 0x993   : > { %27500 = vmatpush3.msra.mxu1 %v23898_v6  ;;  %27501 = vmatprep.mubr.f32.mxu1 %v30659_v28  ;;  %v24566_v28 = vrot.slane %v31015_v40, 1 }
 0x994   : > { %27504 = vmatprep.subr.mxu1 %v23811_v29 }
 0x99a   : > { %27502 = vmatmul.mubr.f32.vlgmr.msra.gmra.mrb[54].mxu1 %v30696_v47  ;;  %v24647_v47 = vrot.slane %v31015_v40, 4 }
 0x99b   : > { %27505 = vmatpush3.msra.mxu1 %v23811_v29  ;;  %27506 = vmatprep.mubr.f32.mxu1 %v30709_v51  ;;  %v24677_v51 = vrot.slane %v31015_v40, 5 }
 0x99c   : > { %27509 = vmatprep.subr.mxu1 %v23899_v2 }
 0x9a2   : > { %27507 = vmatmul.mubr.f32.vlgmr.msra.gmra.mrb[54].mxu1 %v30731_v35  ;;  %v24413_v35 = vrot.slane %v31019_v62, 4 }
 0x9a3   : > { %27510 = vmatpush3.msra.mxu1 %v23899_v2  ;;  %27511 = vmatprep.mubr.f32.mxu1 %v30630_v42 }
 0x9a4   : > { %27514 = vmatprep.subr.mxu1 %v23811_v29 }
 0x9a9   : > { %v31044_v59 = vpop.f32.mrb[44].mxu1 }
 0x9aa   : > { %v31050_v27 = vpop.f32.mrb[46].mxu0  ;;  %v19369_v22 = vpop.f32.mrb[45].mxu1  ;;  %27512 = vmatmul.mubr.f32.vlgmr.msra.gmra.mrb[54].mxu1 %v30653_v16  ;;  %v24621_v50 = vrot.slane %v31044_v59, 2  ;;  %v24594_v54 = vrot.slane %v31044_v59, 1  ;;  %v24567_v18 = vsel %vm10080_vm3, %v31044_v59, %v24566_v28  ;;  %v24648_v32 = vrot.slane %v31044_v59, 3 }
 0x9ab   : > { %v19861_v31 = vpop.f32.mrb[47].mxu0  ;;  %27515 = vmatpush3.msra.mxu1 %v23811_v29  ;;  %27516 = vmatprep.mubr.f32.mxu1 %v30630_v42  ;;  %v24623_v14 = vrot.slane %v31050_v27, 1  ;;  %v24387_v49 = vrot.slane %v19369_v22, 2  ;;  %v24568_v55 = vrot.slane %v31050_v27, 7  ;;  %v24650_v17 = vrot.slane %v31050_v27, 2 }
 0x9ac   : > { %v24622_v63 = vsel %vm10080_vm3, %v24621_v50, %v24620_v21  ;;  %v24389_v0 = vrot.slane %v19861_v31, 1  ;;  %v24595_v4 = vsel %vm10080_vm3, %v24594_v54, %v24593_v48  ;;  %v24649_v23 = vsel %vm10080_vm3, %v24648_v32, %v24647_v47 }
 0x9ad   : > { %v24624_v36 = vsel %vm10083_vm4, %v24623_v14, %v24622_v63  ;;  %v24388_v9 = vsel %vm10080_vm3, %v24387_v49, %v24386_v60  ;;  %v24596_v42 = vsel %vm10083_vm4, %v31050_v27, %v24595_v4  ;;  %v24569_v34 = vsel %vm10083_vm4, %v24568_v55, %v24567_v18 }
 0x9ae   : > { %v24390_v56 = vsel %vm10083_vm4, %v24389_v0, %v24388_v9  ;;  %v24651_v13 = vsel %vm10083_vm4, %v24650_v17, %v24649_v23  ;;  %v24333_v7 = vsel %vm10080_vm3, %v19369_v22, %v24332_v3  ;;  %v24334_v5 = vrot.slane %v19861_v31, 7 }
 0x9af   : > { %v24678_v25 = vrot.slane %v31044_v59, 4  ;;  %v24680_v41 = vrot.slane %v31050_v27, 3  ;;  %v24414_v37 = vrot.slane %v19369_v22, 3  ;;  %v24416_v61 = vrot.slane %v19861_v31, 2 }
 0x9b0   : > { %v24335_v10 = vsel %vm10083_vm4, %v24334_v5, %v24333_v7  ;;  %v24708_v15 = vrot.slane %v31044_v59, 5  ;;  %v24710_v33 = vrot.slane %v31050_v27, 4  ;;  %v24444_v44 = vrot.slane %v19369_v22, 4 }
 0x9b1   : > { %v24679_v19 = vsel %vm10080_vm3, %v24678_v25, %v24677_v51  ;;  %v24415_v1 = vsel %vm10080_vm3, %v24414_v37, %v24413_v35  ;;  %v24446_v24 = vrot.slane %v19861_v31, 3  ;;  %v24360_v8 = vrot.slane %v19369_v22, 1 }
 0x9b2   : > { %27517 = vmatmul.mubr.f32.vlgmr.msra.gmra.mrb[54].mxu1 %v30653_v16  ;;  %v24681_v43 = vsel %vm10083_vm4, %v24680_v41, %v24679_v19  ;;  %v24417_v11 = vsel %vm10083_vm4, %v24416_v61, %v24415_v1  ;;  %v24709_v39 = vsel %vm10080_vm3, %v24708_v15, %v24707_v57  ;;  %v24445_v12 = vsel %vm10080_vm3, %v24444_v44, %v24443_v46 }
 0x9b3   : > { %v24711_v20 = vsel %vm10083_vm4, %v24710_v33, %v24709_v39  ;;  %v24447_v52 = vsel %vm10083_vm4, %v24446_v24, %v24445_v12  ;;  %v24361_v29 = vsel %vm10080_vm3, %v24360_v8, %v24359_v53  ;;  %v24474_v6 = vrot.slane %v19369_v22, 5 }
 0x9b4   : > { %v24362_v2 = vsel %vm10083_vm4, %v19861_v31, %v24361_v29  ;;  %v24476_v58 = vrot.slane %v19861_v31, 4  ;;  %v24504_v45 = vrot.slane %v19369_v22, 6  ;;  %v24506_v16 = vrot.slane %v19861_v31, 5 }
 0x9b5   : > { %v24475_v21 = vsel %vm10080_vm3, %v24474_v6, %v24473_v30  ;;  %v24545_v48 = vrot.slane %v31044_v59, 7  ;;  %v24547_v60 = vrot.slane %v31050_v27, 6  ;;  %v24311_v28 = vrot.slane %v19369_v22, 7 }
 0x9b6   : > { %v24477_v47 = vsel %vm10083_vm4, %v24476_v58, %v24475_v21  ;;  %v24505_v3 = vsel %vm10080_vm3, %v24504_v45, %v24503_v38  ;;  %v24313_v51 = vrot.slane %v19861_v31, 6  ;;  %v24738_v35 = vrot.slane %v31044_v59, 6 }
 0x9b7   : > { %v24507_v57 = vsel %vm10083_vm4, %v24506_v16, %v24505_v3  ;;  %v24546_v46 = vsel %vm10080_vm3, %v24545_v48, %v31015_v40  ;;  %v24312_v53 = vsel %vm10080_vm3, %v24311_v28, %v31019_v62  ;;  %v24740_v30 = vrot.slane %v31050_v27, 5 }
 0x9b8   : > { %v24548_v50 = vsel %vm10083_vm4, %v24547_v60, %v24546_v46  ;;  %v24314_v22 = vsel %vm10083_vm4, %v24313_v51, %v24312_v53  ;;  %v24739_v38 = vsel %vm10080_vm3, %v24738_v35, %v24737_v26 }
 0x9b9   : > { %v24741_v59 = vsel %vm10083_vm4, %v24740_v30, %v24739_v38 }
 0x9d5   : > { %v27278_v54 = vpop.f32.mrb[46].mxu1 }
 0x9d6   : > { %v20353_v18 = vpop.f32.mrb[47].mxu1  ;;  %v24625_v32 = vsel %vm10086_vm5, %v27278_v54, %v24624_v36  ;;  %v24597_v31 = vrot.slane %v27278_v54, 7  ;;  %v24570_v14 = vrot.slane %v27278_v54, 6  ;;  %v24652_v49 = vrot.slane %v27278_v54, 1  ;;  %v31108_v62 = vpop.f32.mrb[48].mxu0 }
 0x9d7   : > { %24638 = vrot.lane.b32.xlu1 %v24625_v32, %s28439_s24  ;;  %v24391_v27 = vsel %vm10086_vm5, %v20353_v18, %v24390_v56  ;;  %v24336_v55 = vrot.slane %v20353_v18, 6  ;;  %v24682_v17 = vrot.slane %v27278_v54, 2  ;;  %v24418_v40 = vrot.slane %v20353_v18, 1  ;;  %v31112_v63 = vpop.f32.mrb[49].mxu0 }
 0x9d8   : > { %24404 = vrot.lane.b32.xlu0 %v24391_v27, %s28439_s24  ;;  %v24598_v26 = vsel %vm10086_vm5, %v24597_v31, %v24596_v42  ;;  %v24571_v0 = vsel %vm10086_vm5, %v24570_v14, %v24569_v34  ;;  %v24653_v4 = vsel %vm10086_vm5, %v24652_v49, %v24651_v13  ;;  %v24712_v23 = vrot.slane %v27278_v54, 3 }
 0x9d9   : > { %v24337_v36 = vsel %vm10086_vm5, %v24336_v55, %v24335_v10  ;;  %v24683_v9 = vsel %vm10086_vm5, %v24682_v17, %v24681_v43  ;;  %v24419_v56 = vsel %vm10086_vm5, %v24418_v40, %v24417_v11  ;;  %v24448_v7 = vrot.slane %v20353_v18, 2 }
 0x9da   : > { %v24713_v5 = vsel %vm10086_vm5, %v24712_v23, %v24711_v20  ;;  %v24363_v25 = vrot.slane %v20353_v18, 7  ;;  %v24478_v41 = vrot.slane %v20353_v18, 3  ;;  %v24508_v37 = vrot.slane %v20353_v18, 4 }
 0x9db   : > { %24611 = vrot.lane.b32.xlu1 %v24598_v26, %s28438_s21  ;;  %v24449_v42 = vsel %vm10086_vm5, %v24448_v7, %v24447_v52  ;;  %v24549_v10 = vrot.slane %v27278_v54, 5  ;;  %v24315_v15 = vrot.slane %v20353_v18, 5  ;;  %v24742_v33 = vrot.slane %v27278_v54, 4 }
 0x9dc   : > { %24584 = vrot.lane.b32.xlu0 %v24571_v0, %s28437_s17  ;;  %v24364_v34 = vsel %vm10086_vm5, %v24363_v25, %v24362_v2  ;;  %v24479_v13 = vsel %vm10086_vm5, %v24478_v41, %v24477_v47  ;;  %v24509_v61 = vsel %vm10086_vm5, %v24508_v37, %v24507_v57  ;;  %v24626_v24 = vrot.slane %v31108_v62, 3 }
 0x9dd   : > { %v31131_v44 = vsel %vm10086_vm5, %v24549_v10, %v24548_v50  ;;  %v31134_v19 = vsel %vm10086_vm5, %v24315_v15, %v24314_v22  ;;  %v31137_v1 = vsel %vm10086_vm5, %v24742_v33, %v24741_v59  ;;  %v24392_v8 = vrot.slane %v31112_v63, 3 }
 0x9de   : > { %v24599_v43 = vrot.slane %v31108_v62, 2  ;;  %v24572_v11 = vrot.slane %v31108_v62, 1  ;;  %v24654_v39 = vrot.slane %v31108_v62, 4  ;;  %v24338_v12 = vrot.slane %v31112_v63, 1 }
 0x9df   : > { %24668 = vrot.lane.b32.xlu1 %v24653_v4, %s28440_s22  ;;  %v24684_v20 = vrot.slane %v31108_v62, 5  ;;  %v24420_v52 = vrot.slane %v31112_v63, 4  ;;  %v24714_v29 = vrot.slane %v31108_v62, 6  ;;  %v24450_v6 = vrot.slane %v31112_v63, 5 }
 0x9e0   : > { %24350 = vrot.lane.b32.xlu0 %v24337_v36, %s28437_s17  ;;  %v24365_v58 = vrot.slane %v31112_v63, 2  ;;  %v24480_v45 = vrot.slane %v31112_v63, 6  ;;  %v24510_v16 = vrot.slane %v31112_v63, 7  ;;  %v24744_v21 = vrot.slane %v31108_v62, 7 }
 0x9e3   : > { %24698 = vrot.lane.b32.xlu1 %v24683_v9, %s28441_s25 }
 0x9e4   : > { %24434 = vrot.lane.b32.xlu0 %v24419_v56, %s28440_s22 }
 0x9e7   : > { %24728 = vrot.lane.b32.xlu1 %v24713_v5, %s28442_s19 }
 0x9e8   : > { %24464 = vrot.lane.b32.xlu0 %v24449_v42, %s28441_s25 }
 0x9eb   : > { %24377 = vrot.lane.b32.xlu1 %v24364_v34, %s28438_s21 }
 0x9ec   : > { %24494 = vrot.lane.b32.xlu0 %v24479_v13, %s28442_s19 }
 0x9f0   : > { %24524 = vrot.lane.b32.xlu0 %v24509_v61, %s31551_s11 }
 0xa01   : > { %v31156_v2 = vpop.f32.mrb[48].mxu1 }
 0xa02   : > { %v27368_v48 = vpop.f32.mrb[50].mxu0  ;;  %v21337_v60 = vpop.f32.mrb[49].mxu1  ;;  %v24627_v28 = vrot.slane %v31156_v2, 2  ;;  %v24600_v47 = vrot.slane %v31156_v2, 1  ;;  %v24573_v3 = vsel %vm10080_vm3, %v31156_v2, %v24572_v11  ;;  %v24655_v51 = vrot.slane %v31156_v2, 3 }
 0xa03   : > { %v21829_v35 = vpop.f32.mrb[51].mxu0  ;;  %v24629_v57 = vrot.slane %v27368_v48, 1  ;;  %v24393_v46 = vrot.slane %v21337_v60, 2  ;;  %v24574_v53 = vrot.slane %v27368_v48, 7  ;;  %v24657_v30 = vrot.slane %v27368_v48, 2 }
 0xa04   : > { %v24628_v50 = vsel %vm10080_vm3, %v24627_v28, %v24626_v24  ;;  %v24395_v22 = vrot.slane %v21829_v35, 1  ;;  %v24601_v38 = vsel %vm10080_vm3, %v24600_v47, %v24599_v43  ;;  %v24656_v59 = vsel %vm10080_vm3, %v24655_v51, %v24654_v39 }
 0xa05   : > { %v24630_v54 = vsel %vm10083_vm4, %v24629_v57, %v24628_v50  ;;  %v24394_v18 = vsel %vm10080_vm3, %v24393_v46, %v24392_v8  ;;  %v24602_v32 = vsel %vm10083_vm4, %v27368_v48, %v24601_v38  ;;  %v24575_v31 = vsel %vm10083_vm4, %v24574_v53, %v24573_v3 }
 0xa06   : > { %v24396_v14 = vsel %vm10083_vm4, %v24395_v22, %v24394_v18  ;;  %v24658_v49 = vsel %vm10083_vm4, %v24657_v30, %v24656_v59  ;;  %v24339_v27 = vsel %vm10080_vm3, %v21337_v60, %v24338_v12  ;;  %v24340_v55 = vrot.slane %v21829_v35, 7 }
 0xa07   : > { %v24685_v17 = vrot.slane %v31156_v2, 4  ;;  %v24687_v40 = vrot.slane %v27368_v48, 3  ;;  %v24421_v26 = vrot.slane %v21337_v60, 3  ;;  %v24423_v0 = vrot.slane %v21829_v35, 2 }
 0xa08   : > { %v24341_v4 = vsel %vm10083_vm4, %v24340_v55, %v24339_v27  ;;  %v24715_v23 = vrot.slane %v31156_v2, 5  ;;  %v24717_v36 = vrot.slane %v27368_v48, 4  ;;  %v24451_v9 = vrot.slane %v21337_v60, 4 }
 0xa09   : > { %v24686_v56 = vsel %vm10080_vm3, %v24685_v17, %v24684_v20  ;;  %v24422_v7 = vsel %vm10080_vm3, %v24421_v26, %v24420_v52  ;;  %v24453_v5 = vrot.slane %v21829_v35, 3  ;;  %v24366_v25 = vrot.slane %v21337_v60, 1 }
 0xa0a   : > { %v24688_v41 = vsel %vm10083_vm4, %v24687_v40, %v24686_v56  ;;  %v24424_v37 = vsel %vm10083_vm4, %v24423_v0, %v24422_v7  ;;  %v24716_v42 = vsel %vm10080_vm3, %v24715_v23, %v24714_v29  ;;  %v24452_v34 = vsel %vm10080_vm3, %v24451_v9, %v24450_v6 }
 0xa0b   : > { %v24718_v13 = vsel %vm10083_vm4, %v24717_v36, %v24716_v42  ;;  %v24454_v61 = vsel %vm10083_vm4, %v24453_v5, %v24452_v34  ;;  %v24367_v10 = vsel %vm10080_vm3, %v24366_v25, %v24365_v58  ;;  %v24481_v15 = vrot.slane %v21337_v60, 5 }
 0xa0c   : > { %v24368_v33 = vsel %vm10083_vm4, %v21829_v35, %v24367_v10  ;;  %v24483_v24 = vrot.slane %v21829_v35, 4  ;;  %v24511_v8 = vrot.slane %v21337_v60, 6  ;;  %v24513_v43 = vrot.slane %v21829_v35, 5 }
 0xa0d   : > { %v24482_v11 = vsel %vm10080_vm3, %v24481_v15, %v24480_v45  ;;  %v24745_v39 = vrot.slane %v31156_v2, 6  ;;  %v24747_v12 = vrot.slane %v27368_v48, 5  ;;  %v24551_v20 = vrot.slane %v31156_v2, 7 }
 0xa0e   : > { %v24484_v52 = vsel %vm10083_vm4, %v24483_v24, %v24482_v11  ;;  %v24512_v29 = vsel %vm10080_vm3, %v24511_v8, %v24510_v16  ;;  %v24553_v6 = vrot.slane %v27368_v48, 6  ;;  %v24317_v28 = vrot.slane %v21337_v60, 7 }
 0xa0f   : > { %v24514_v58 = vsel %vm10083_vm4, %v24513_v43, %v24512_v29  ;;  %v24746_v47 = vsel %vm10080_vm3, %v24745_v39, %v24744_v21  ;;  %v24552_v3 = vsel %vm10080_vm3, %v24551_v20, %v31108_v62  ;;  %v24319_v51 = vrot.slane %v21829_v35, 6 }
 0xa10   : > { %v24748_v45 = vsel %vm10083_vm4, %v24747_v12, %v24746_v47  ;;  %v24554_v57 = vsel %vm10083_vm4, %v24553_v6, %v24552_v3  ;;  %v24318_v2 = vsel %vm10080_vm3, %v24317_v28, %v31112_v63 }
 0xa11   : > { %v24320_v46 = vsel %vm10083_vm4, %v24319_v51, %v24318_v2 }
 0xa2d   : > { %v27398_v16 = vpop.f32.mrb[50].mxu1 }
 0xa2e   : > { %v22321_v48 = vpop.f32.mrb[51].mxu1  ;;  %v24631_v60 = vsel %vm10086_vm5, %v27398_v16, %v24630_v54  ;;  %v24603_v53 = vrot.slane %v27398_v16, 7  ;;  %v24576_v30 = vrot.slane %v27398_v16, 6  ;;  %v24659_v21 = vrot.slane %v27398_v16, 1  ;;  %v31205_v50 = vpop.f32.mrb[52].mxu0 }
 0xa2f   : > { %24640 = vrot.lane.b32.xlu0 %v24631_v60, %s28439_s24  ;;  %v24397_v62 = vsel %vm10086_vm5, %v22321_v48, %v24396_v14  ;;  %v24342_v35 = vrot.slane %v22321_v48, 6  ;;  %v24689_v22 = vrot.slane %v27398_v16, 2  ;;  %v24425_v38 = vrot.slane %v22321_v48, 1  ;;  %v31209_v59 = vpop.f32.mrb[53].mxu0 }
 0xa30   : > { %24406 = vrot.lane.b32.xlu1 %v24397_v62, %s28439_s24  ;;  %v24604_v63 = vsel %vm10086_vm5, %v24603_v53, %v24602_v32  ;;  %v24577_v54 = vsel %vm10086_vm5, %v24576_v30, %v24575_v31  ;;  %v24660_v18 = vsel %vm10086_vm5, %v24659_v21, %v24658_v49  ;;  %v24719_v27 = vrot.slane %v27398_v16, 3 }
 0xa31   : > { %v24343_v55 = vsel %vm10086_vm5, %v24342_v35, %v24341_v4  ;;  %v24690_v17 = vsel %vm10086_vm5, %v24689_v22, %v24688_v41  ;;  %v24426_v14 = vsel %vm10086_vm5, %v24425_v38, %v24424_v37  ;;  %v24455_v40 = vrot.slane %v22321_v48, 2 }
 0xa32   : > { %v24720_v26 = vsel %vm10086_vm5, %v24719_v27, %v24718_v13  ;;  %v24369_v0 = vrot.slane %v22321_v48, 7  ;;  %v24485_v23 = vrot.slane %v22321_v48, 3  ;;  %v24515_v36 = vrot.slane %v22321_v48, 4 }
 0xa33   : > { %24613 = vrot.lane.b32.xlu0 %v24604_v63, %s28438_s21  ;;  %v24456_v32 = vsel %vm10086_vm5, %v24455_v40, %v24454_v61  ;;  %v24749_v9 = vrot.slane %v27398_v16, 4  ;;  %v24555_v56 = vrot.slane %v27398_v16, 5  ;;  %v24321_v7 = vrot.slane %v22321_v48, 5 }
 0xa34   : > { %24586 = vrot.lane.b32.xlu1 %v24577_v54, %s28437_s17  ;;  %v24370_v31 = vsel %vm10086_vm5, %v24369_v0, %v24368_v33  ;;  %v24486_v49 = vsel %vm10086_vm5, %v24485_v23, %v24484_v52  ;;  %v24516_v4 = vsel %vm10086_vm5, %v24515_v36, %v24514_v58  ;;  %v24632_v11 = vrot.slane %v31205_v50, 3 }
 0xa35   : > { %v31228_v5 = vsel %vm10086_vm5, %v24749_v9, %v24748_v45  ;;  %v31231_v25 = vsel %vm10086_vm5, %v24555_v56, %v24554_v57  ;;  %v31234_v41 = vsel %vm10086_vm5, %v24321_v7, %v24320_v46  ;;  %v24398_v39 = vrot.slane %v31209_v59, 3 }
 0xa36   : > { %v24605_v12 = vrot.slane %v31205_v50, 2  ;;  %v24578_v20 = vrot.slane %v31205_v50, 1  ;;  %v24344_v52 = vrot.slane %v31209_v59, 1  ;;  %v24691_v28 = vrot.slane %v31205_v50, 5 }
 0xa37   : > { %24670 = vrot.lane.b32.xlu0 %v24660_v18, %s28440_s22  ;;  %v24427_v58 = vrot.slane %v31209_v59, 4  ;;  %v24721_v47 = vrot.slane %v31205_v50, 6  ;;  %v24457_v3 = vrot.slane %v31209_v59, 5 }
 0xa38   : > { %24352 = vrot.lane.b32.xlu1 %v24343_v55, %s28437_s17 }
 0xa3b   : > { %24700 = vrot.lane.b32.xlu0 %v24690_v17, %s28441_s25 }
 0xa3c   : > { %24436 = vrot.lane.b32.xlu1 %v24426_v14, %s28440_s22 }
 0xa3f   : > { %24730 = vrot.lane.b32.xlu0 %v24720_v26, %s28442_s19 }
 0xa40   : > { %24466 = vrot.lane.b32.xlu1 %v24456_v32, %s28441_s25 }
 0xa43   : > { %24379 = vrot.lane.b32.xlu0 %v24370_v31, %s28438_s21 }
 0xa44   : > { %24496 = vrot.lane.b32.xlu1 %v24486_v49, %s28442_s19 }
 0xa48   : > { %24526 = vrot.lane.b32.xlu1 %v24516_v4, %s31551_s11  ;;  %v24371_v4 = vrot.slane %v31209_v59, 2 }
 0xa49   : > { %v24639_v37 = vpop.permute.xlu1 %24638 }
 0xa4a   : > { %v24405_v42 = vpop.permute.xlu0 %24404 }
 0xa4d   : > { %v24612_v34 = vpop.permute.xlu1 %24611 }
 0xa4e   : > { %v24585_v13 = vpop.permute.xlu0 %24584 }
 0xa4f   : > { %v24788_v61 = vsel %vm421_vm0, %v31131_v44, %v24585_v13  ;;  %v24661_v44 = vrot.slane %v31205_v50, 4 }
 0xa50   : > { %v24791_v10 = vsel %vm10541_vm8, %v24788_v61, %v24612_v34  ;;  %v24517_v61 = vrot.slane %v31209_v59, 7 }
 0xa51   : > { %v24669_v15 = vpop.permute.xlu1 %24668  ;;  %v24794_v33 = vsel %vm10545_vm9, %v24791_v10, %v24639_v37  ;;  %v24487_v37 = vrot.slane %v31209_v59, 6 }
 0xa52   : > { %v31248_v24 = vsel %vm10549_vm10, %v24794_v33, %v24669_v15  ;;  %v24351_v43 = vpop.permute.xlu0 %24350 }
 0xa53   : > { %v24767_v51 = vsel %vm421_vm0, %v31134_v19, %v24351_v43 }
 0xa55   : > { %v31250_v8 = vpop.permute.xlu1 %24698 }
 0xa59   : > { %v31258_v29 = vpop.f32.mrb[52].mxu1  ;;  %v31260_v6 = vpop.permute.xlu1 %24728 }
 0xa5a   : > { %v31268_v45 = vpop.f32.mrb[54].mxu0  ;;  %v31270_v57 = vpop.f32.mrb[53].mxu1  ;;  %v24633_v2 = vrot.slane %v31258_v29, 2  ;;  %v24606_v46 = vrot.slane %v31258_v29, 1  ;;  %v24579_v16 = vsel %vm10080_vm3, %v31258_v29, %v24578_v20  ;;  %v24662_v19 = vrot.slane %v31258_v29, 3 }
 0xa5b   : > { %v31276_v48 = vpop.f32.mrb[55].mxu0  ;;  %v24635_v60 = vrot.slane %v31268_v45, 1  ;;  %v24399_v53 = vrot.slane %v31270_v57, 2  ;;  %v24580_v30 = vrot.slane %v31268_v45, 7  ;;  %v24664_v22 = vrot.slane %v31268_v45, 2 }
 0xa5c   : > { %v24634_v21 = vsel %vm10080_vm3, %v24633_v2, %v24632_v11  ;;  %v24401_v62 = vrot.slane %v31276_v48, 1  ;;  %v24607_v35 = vsel %vm10080_vm3, %v24606_v46, %v24605_v12  ;;  %v24663_v14 = vsel %vm10080_vm3, %v24662_v19, %v24661_v44 }
 0xa5d   : > { %v24378_v38 = vpop.permute.xlu1 %24377  ;;  %v24636_v63 = vsel %vm10083_vm4, %v24635_v60, %v24634_v21  ;;  %v24400_v54 = vsel %vm10080_vm3, %v24399_v53, %v24398_v39  ;;  %v31290_v18 = vsel %vm10083_vm4, %v31268_v45, %v24607_v35  ;;  %v31293_v27 = vsel %vm10083_vm4, %v24580_v30, %v24579_v16 }
 0xa5e   : > { %v24770_v55 = vsel %vm10541_vm8, %v24767_v51, %v24378_v38  ;;  %v24402_v17 = vsel %vm10083_vm4, %v24401_v62, %v24400_v54  ;;  %v24345_v40 = vsel %vm10080_vm3, %v31270_v57, %v24344_v52  ;;  %v24665_v0 = vsel %vm10083_vm4, %v24664_v22, %v24663_v14 }
 0xa5f   : > { %v31301_v26 = vsel %vm10545_vm9, %v24770_v55, %v24405_v42  ;;  %v24346_v23 = vrot.slane %v31276_v48, 7  ;;  %v24692_v36 = vrot.slane %v31258_v29, 4  ;;  %v24694_v32 = vrot.slane %v31268_v45, 3 }
 0xa60   : > { %v24428_v31 = vrot.slane %v31270_v57, 3  ;;  %v24430_v49 = vrot.slane %v31276_v48, 2  ;;  %v24722_v7 = vrot.slane %v31258_v29, 5  ;;  %v24724_v13 = vrot.slane %v31268_v45, 4 }
 0xa61   : > { %v24347_v9 = vsel %vm10083_vm4, %v24346_v23, %v24345_v40  ;;  %v24693_v56 = vsel %vm10080_vm3, %v24692_v36, %v24691_v28  ;;  %v24458_v33 = vrot.slane %v31270_v57, 4  ;;  %v24460_v43 = vrot.slane %v31276_v48, 3 }
 0xa62   : > { %v24695_v42 = vsel %vm10083_vm4, %v24694_v32, %v24693_v56  ;;  %v24429_v34 = vsel %vm10080_vm3, %v24428_v31, %v24427_v58  ;;  %v24723_v15 = vsel %vm10080_vm3, %v24722_v7, %v24721_v47  ;;  %v24372_v39 = vrot.slane %v31270_v57, 1 }
 0xa63   : > { %v24431_v10 = vsel %vm10083_vm4, %v24430_v49, %v24429_v34  ;;  %v24725_v11 = vsel %vm10083_vm4, %v24724_v13, %v24723_v15  ;;  %v24488_v12 = vrot.slane %v31270_v57, 5  ;;  %v24751_v20 = vrot.slane %v31205_v50, 7 }
 0xa64   : > { %v24459_v44 = vsel %vm10080_vm3, %v24458_v33, %v24457_v3  ;;  %v24490_v52 = vrot.slane %v31276_v48, 4  ;;  %v24518_v28 = vrot.slane %v31270_v57, 6  ;;  %v24520_v58 = vrot.slane %v31276_v48, 5 }
 0xa65   : > { %v24461_v47 = vsel %vm10083_vm4, %v24460_v43, %v24459_v44  ;;  %v24373_v51 = vsel %vm10080_vm3, %v24372_v39, %v24371_v4  ;;  %v24489_v2 = vsel %vm10080_vm3, %v24488_v12, %v24487_v37  ;;  %v24752_v46 = vrot.slane %v31258_v29, 6 }
 0xa66   : > { %v24374_v16 = vsel %vm10083_vm4, %v31276_v48, %v24373_v51  ;;  %v24491_v60 = vsel %vm10083_vm4, %v24490_v52, %v24489_v2  ;;  %v24519_v3 = vsel %vm10080_vm3, %v24518_v28, %v24517_v61  ;;  %v24754_v53 = vrot.slane %v31268_v45, 5 }
 0xa67   : > { %v24521_v30 = vsel %vm10083_vm4, %v24520_v58, %v24519_v3  ;;  %v24753_v19 = vsel %vm10080_vm3, %v24752_v46, %v24751_v20  ;;  %v24557_v21 = vrot.slane %v31258_v29, 7  ;;  %v24559_v62 = vrot.slane %v31268_v45, 6 }
 0xa68   : > { %v24755_v35 = vsel %vm10083_vm4, %v24754_v53, %v24753_v19  ;;  %v24323_v22 = vrot.slane %v31270_v57, 7  ;;  %v24325_v38 = vrot.slane %v31276_v48, 6 }
 0xa69   : > { %v24558_v54 = vsel %vm10080_vm3, %v24557_v21, %v31205_v50 }
 0xa6a   : > { %v24560_v55 = vsel %vm10083_vm4, %v24559_v62, %v24558_v54  ;;  %v24324_v14 = vsel %vm10080_vm3, %v24323_v22, %v31209_v59 }
 0xa6b   : > { %v24326_v40 = vsel %vm10083_vm4, %v24325_v38, %v24324_v14 }
 0xa85   : > { %v27518_v23 = vpop.f32.mrb[54].mxu1 }
 0xa86   : > { %v24289_v29 = vpop.f32.mrb[55].mxu1  ;;  %v24637_v45 = vsel %vm10086_vm5, %v27518_v23, %v24636_v63  ;;  %v24609_v36 = vrot.slane %v27518_v23, 7  ;;  %v24582_v32 = vrot.slane %v27518_v23, 6  ;;  %v24666_v31 = vrot.slane %v27518_v23, 1 }
 0xa87   : > { %24642 = vrot.lane.b32.xlu1 %v24637_v45, %s28439_s24  ;;  %v24403_v57 = vsel %vm10086_vm5, %v24289_v29, %v24402_v17  ;;  %v24348_v48 = vrot.slane %v24289_v29, 6  ;;  %v24696_v50 = vrot.slane %v27518_v23, 2  ;;  %v24432_v49 = vrot.slane %v24289_v29, 1 }
 0xa88   : > { %24408 = vrot.lane.b32.xlu0 %v24403_v57, %s28439_s24  ;;  %v24610_v59 = vsel %vm10086_vm5, %v24609_v36, %v31290_v18  ;;  %v24583_v4 = vsel %vm10086_vm5, %v24582_v32, %v31293_v27  ;;  %v24667_v63 = vsel %vm10086_vm5, %v24666_v31, %v24665_v0  ;;  %v24726_v56 = vrot.slane %v27518_v23, 3  ;;  %s24845_s24 = sshll.u32 %s30716_s29, 4  ;;  %s24825_s29 = scalar_lea.sflag [#allocation4], %s28615_s20  ;;  %s31385_s24 = int_to_ptr.vmem [resolvable:$true] %s24845_s24 }
 0xa89   : > { %v24349_v7 = vsel %vm10086_vm5, %v24348_v48, %v24347_v9  ;;  %v24697_v37 = vsel %vm10086_vm5, %v24696_v50, %v24695_v42  ;;  %v24433_v17 = vsel %vm10086_vm5, %v24432_v49, %v24431_v10  ;;  %v24462_v34 = vrot.slane %v24289_v29, 2  ;;  %s28314_s23 = scalar_lea.vmem %s31385_s24, 384 }
 0xa8a   : > { %v24727_v13 = vsel %vm10086_vm5, %v24726_v56, %v24725_v11  ;;  %v24375_v61 = vrot.slane %v24289_v29, 7  ;;  %v24492_v15 = vrot.slane %v24289_v29, 3  ;;  %v24522_v33 = vrot.slane %v24289_v29, 4  ;;  %p28315_p8 = scmp.ne.s32.totalorder %s31385_s24, %s28314_s23 }
 0xa8b   : > { %24615 = vrot.lane.b32.xlu1 %v24610_v59, %s28438_s21  ;;  %v24463_v18 = vsel %vm10086_vm5, %v24462_v34, %v24461_v47  ;;  %v24756_v27 = vrot.slane %v27518_v23, 4  ;;  %v24561_v0 = vrot.slane %v27518_v23, 5  ;;  %v24327_v43 = vrot.slane %v24289_v29, 5 }
 0xa8c   : > { %24588 = vrot.lane.b32.xlu0 %v24583_v4, %s28437_s17  ;;  %v24376_v9 = vsel %vm10086_vm5, %v24375_v61, %v24374_v16  ;;  %v24493_v42 = vsel %vm10086_vm5, %v24492_v15, %v24491_v60  ;;  %v24523_v10 = vsel %vm10086_vm5, %v24522_v33, %v24521_v30  ;;  %p28316_p11 = pnand %p28315_p8, %p31614_p9 }
 0xa8d   : > { %v24757_v11 = vsel %vm10086_vm5, %v24756_v27, %v24755_v35  ;;  %v31373_v39 = vsel %vm10086_vm5, %v24561_v0, %v24560_v55  ;;  %v31376_v12 = vsel %vm10086_vm5, %v24327_v43, %v24326_v40 }
 0xa8e   : > { %p28317_p0 = pneg %p28316_p11 }
 0xa8f   : > { %24672 = vrot.lane.b32.xlu1 %v24667_v63, %s28440_s22 }
 0xa90   : > { %24354 = vrot.lane.b32.xlu0 %v24349_v7, %s28437_s17 }
 0xa93   : > { %24702 = vrot.lane.b32.xlu1 %v24697_v37, %s28441_s25 }
 0xa94   : > { %24438 = vrot.lane.b32.xlu0 %v24433_v17, %s28440_s22  ;;  %s31395_s22 = scalar_lea.hbm %s31543_s9, %s28200_s30 }
 0xa97   : > { %24732 = vrot.lane.b32.xlu1 %v24727_v13, %s28442_s19 }
 0xa98   : > { %24468 = vrot.lane.b32.xlu0 %v24463_v18, %s28441_s25  ;;  %s28444_s25 = smov [#allocation5]  }
 0xa99   : > { %s28318_s11 = sshll.u32 %s28444_s25, 4  ;;  %s28319_s11 = int_to_ptr.vmem [resolvable:$false] %s28318_s11 }
 0xa9a   : > { %s28320_s0 = scalar_lea.vmem %s28319_s11, 768  ;;  %p28321_p6 = scmp.lt.s32.totalorder %s31385_s24, %s28319_s11 }
 0xa9b   : > { %24381 = vrot.lane.b32.xlu1 %v24376_v9, %s28438_s21  ;;  %p28322_p13 = scmp.lt.s32.totalorder %s28320_s0, %s28314_s23 }
 0xa9c   : > { %24498 = vrot.lane.b32.xlu0 %v24493_v42, %s28442_s19 }
 0xa9d   : > { %p28323_p2 = por %p28322_p13, %p28321_p6 }
 0xa9f   : > { %p28324_p5 = pnand %p28323_p2, %p28317_p0 }
 0xaa1   : > { %28327 = shalt.err (!%p28324_p5)
}
 0xaa2   : > { %s28328_s21 = scalar_lea.hbm %s31395_s22, 384  ;;  %s28332_s12 = scalar_lea.hbm %s31543_s9, 768 }
 0xaa3   : > { %p28329_p4 = scmp.ne.s32.totalorder %s31395_s22, %s28328_s21  ;;  %p28333_p12 = scmp.lt.u32.totalorder %s31395_s22, %s31543_s9 }
 0xaa4   : > { %p28334_p1 = scmp.lt.u32.totalorder %s28332_s12, %s28328_s21  ;;  %p28336_p8 = scmp.lt.u32.totalorder %s28328_s21, %s31395_s22 }
 0xaa5   : > { %p28330_p7 = pnand %p28329_p4, %p31614_p9 }
 0xaa6   : > { %p28335_p3 = por %p28334_p1, %p28333_p12 }
 0xaa7   : > { %p28331_p10 = pneg %p28330_p7 }
 0xaa8   : > { %p28337_p11 = por %p28336_p8, %p28335_p3 }
 0xaaa   : > { %p28338_p0 = pnand %p28337_p11, %p28331_p10 }
 0xaac   : > { %28341 = shalt.err (!%p28338_p0)
}
 0xaad   : > { %s31553_s0 = smov 128   ;;  %s28446_s23 = smov 8   ;;  %v24435_v20 = vpop.permute.xlu0 %24434  ;;  %v24407_v28 = vpop.permute.xlu1 %24406  ;;  %v24800_v7 = vsel %vm10553_vm11, %v31248_v24, %v31250_v8 }
 0xaae   : > { %28204 = dma.vmem_to_hbm [thread:$0]  (%p31614_p9), %s31385_s24, 384, %s31395_s22, %s24825_s29, %s31553_s0, %s31553_s0, %s28446_s23   ;;  %v24776_v29 = vsel %vm10549_vm10, %v31301_v26, %v24435_v20  ;;  %v24803_v34 = vsel %vm10557_vm12, %v24800_v7, %v31260_v6 }
 0xaaf   : > { %s31615_s19 = smov 112   ;;  %s31616_s24 = smul.u32 24, %s28615_s20 }
 0xab0   : > { %24758 = vrot.lane.b32.xlu1 %v31137_v1, %s31615_s19  ;;  %24528 = vrot.lane.b32.xlu0 %v24523_v10, %s31615_s19  ;;  %s31482_s12 = scalar_lea.hbm %s31544_s10, %s28200_s30  ;;  %s24830_s25 = scalar_lea.sflag [#allocation7], %s28615_s20 }
 0xab1   : > { %v24465_v44 = vpop.permute.xlu0 %24464  ;;  %v24587_v47 = vpop.permute.xlu1 %24586  ;;  %s409_s22 = scalar_lea.vmem [#allocation6], %s31616_s24 }
 0xab2   : > { %v24789_v31 = vsel %vm421_vm0, %v31231_v25, %v24587_v47  ;;  %v24779_v48 = vsel %vm10553_vm11, %v24776_v29, %v24465_v44  ;;  %s24863_s29 = sshll.u32 %s409_s22, 4  ;;  %s31474_s29 = int_to_ptr.vmem [resolvable:$true] %s24863_s29 }
 0xab3   : > { %s28342_s11 = scalar_lea.vmem %s31474_s29, 384 }
 0xab4   : > { %24762 = vrot.lane.b32.xlu1 %v24757_v11, %s31615_s19  ;;  %24760 = vrot.lane.b32.xlu0 %v31228_v5, %s31615_s19  ;;  %p28343_p6 = scmp.ne.s32.totalorder %s31474_s29, %s28342_s11  ;;  %s28447_s19 = smov [#allocation6]  }
 0xab5   : > { %v24495_v52 = vpop.permute.xlu0 %24494  ;;  %v24353_v2 = vpop.permute.xlu1 %24352  ;;  %s28346_s24 = sshll.u32 %s28447_s19, 4  ;;  %s28347_s24 = int_to_ptr.vmem [resolvable:$false] %s28346_s24 }
 0xab6   : > { %v24768_v40 = vsel %vm421_vm0, %v31234_v41, %v24353_v2  ;;  %v24782_v56 = vsel %vm10557_vm12, %v24779_v48, %v24495_v52  ;;  %p28344_p13 = pnand %p28343_p6, %p31614_p9  ;;  %s28348_s0 = scalar_lea.vmem %s28347_s24, 768 }
 0xab7   : > { %p28349_p5 = scmp.lt.s32.totalorder %s31474_s29, %s28347_s24  ;;  %p28350_p4 = scmp.lt.s32.totalorder %s28348_s0, %s28342_s11 }
 0xab8   : > { %p28345_p2 = pneg %p28344_p13 }
 0xab9   : > { %v24525_v58 = vpop.permute.xlu0 %24524  ;;  %v24437_v16 = vpop.permute.xlu1 %24436  ;;  %p28351_p7 = por %p28350_p4, %p28349_p5 }
 0xaba   : > { %v24785_v18 = vsel %vm10561_vm13, %v24782_v56, %v24525_v58 }
 0xabb   : > { %p28352_p10 = pnand %p28351_p7, %p28345_p2 }
 0xabd   : > { %v24641_v51 = vpop.permute.xlu0 %24640  ;;  %v24467_v3 = vpop.permute.xlu1 %24466 }
 0xac1   : > { %v24614_v46 = vpop.permute.xlu0 %24613  ;;  %v24497_v53 = vpop.permute.xlu1 %24496 }
 0xac2   : > { %v24792_v26 = vsel %vm10541_vm8, %v24789_v31, %v24614_v46 }
 0xac3   : > { %v24795_v13 = vsel %vm10545_vm9, %v24792_v26, %v24641_v51 }
 0xac5   : > { %v24671_v60 = vpop.permute.xlu0 %24670  ;;  %v24527_v19 = vpop.permute.xlu1 %24526 }
 0xac6   : > { %v24798_v9 = vsel %vm10549_vm10, %v24795_v13, %v24671_v60 }
 0xac9   : > { %v24701_v1 = vpop.permute.xlu0 %24700 }
 0xaca   : > { %v24801_v10 = vsel %vm10553_vm11, %v24798_v9, %v24701_v1 }
 0xacd   : > { %v24731_v30 = vpop.permute.xlu0 %24730 }
 0xad1   : > { %v24380_v21 = vpop.permute.xlu0 %24379 }
 0xad2   : > { %v24771_v23 = vsel %vm10541_vm8, %v24768_v40, %v24380_v21 }
 0xad3   : > { %v24774_v57 = vsel %vm10545_vm9, %v24771_v23, %v24407_v28 }
 0xad4   : > { %v24777_v59 = vsel %vm10549_vm10, %v24774_v57, %v24437_v16 }
 0xad5   : > { %v24780_v61 = vsel %vm10553_vm11, %v24777_v59, %v24467_v3 }
 0xad6   : > { %v24783_v6 = vsel %vm10557_vm12, %v24780_v61, %v24497_v53 }
 0xad7   : > { %v24786_v28 = vsel %vm10561_vm13, %v24783_v6, %v24527_v19 }
 0xaf9   : > { %v24643_v62 = vpop.permute.xlu1 %24642 }
 0xafa   : > { %v24409_v35 = vpop.permute.xlu0 %24408 }
 0xafd   : > { %v24616_v5 = vpop.permute.xlu1 %24615 }
 0xafe   : > { %v24589_v22 = vpop.permute.xlu0 %24588 }
 0xaff   : > { %v24790_v36 = vsel %vm421_vm0, %v31373_v39, %v24589_v22 }
 0xb00   : > { %v24793_v50 = vsel %vm10541_vm8, %v24790_v36, %v24616_v5 }
 0xb01   : > { %v24673_v38 = vpop.permute.xlu1 %24672  ;;  %v24796_v37 = vsel %vm10545_vm9, %v24793_v50, %v24643_v62 }
 0xb02   : > { %v24355_v54 = vpop.permute.xlu0 %24354  ;;  %v24799_v8 = vsel %vm10549_vm10, %v24796_v37, %v24673_v38 }
 0xb03   : > { %v24769_v41 = vsel %vm421_vm0, %v31376_v12, %v24355_v54  ;;  %v24804_v12 = vsel %vm10557_vm12, %v24801_v10, %v24731_v30 }
 0xb05   : > { %v24703_v55 = vpop.permute.xlu1 %24702 }
 0xb06   : > { %v24439_v14 = vpop.permute.xlu0 %24438  ;;  %v24802_v42 = vsel %vm10553_vm11, %v24799_v8, %v24703_v55 }
 0xb09   : > { %v24733_v45 = vpop.permute.xlu1 %24732 }
 0xb0a   : > { %v24469_v32 = vpop.permute.xlu0 %24468  ;;  %v24805_v11 = vsel %vm10557_vm12, %v24802_v42, %v24733_v45 }
 0xb0d   : > { %v24382_v49 = vpop.permute.xlu1 %24381 }
 0xb0e   : > { %v24772_v4 = vsel %vm10541_vm8, %v24769_v41, %v24382_v49  ;;  %v24499_v63 = vpop.permute.xlu0 %24498 }
 0xb0f   : > { %v24775_v25 = vsel %vm10545_vm9, %v24772_v4, %v24409_v35 }
 0xb10   : > { %v24778_v17 = vsel %vm10549_vm10, %v24775_v25, %v24439_v14 }
 0xb11   : > { %v24781_v15 = vsel %vm10553_vm11, %v24778_v17, %v24469_v32 }
 0xb12   : > { %v24784_v0 = vsel %vm10557_vm12, %v24781_v15, %v24499_v63 }
 0xb22   : > { %v24759_v33 = vpop.permute.xlu1 %24758  ;;  %v24529_v24 = vpop.permute.xlu0 %24528 }
 0xb23   : > { %v24806_v27 = vsel %vm10561_vm13, %v24803_v34, %v24759_v33  ;;  %v24787_v20 = vsel %vm10561_vm13, %v24784_v0, %v24529_v24 }
 0xb24   : > { %v24815_v43 = vcombine.low %v24785_v18, %v24806_v27 }
 0xb26   : > { %24821 = vst [vmem:[%s409_s22] sm:$0xff] %v24815_v43  ;;  %v24763_v39 = vpop.permute.xlu1 %24762  ;;  %v24761_v52 = vpop.permute.xlu0 %24760 }
 0xb27   : > { %v24808_v44 = vsel %vm10561_vm13, %v24805_v11, %v24763_v39  ;;  %v24807_v47 = vsel %vm10561_vm13, %v24804_v12, %v24761_v52 }
 0xb28   : > { %v24817_v58 = vcombine.low %v24787_v20, %v24808_v44  ;;  %v24816_v51 = vcombine.low %v24786_v28, %v24807_v47 }
 0xb2a   : > { %24823 = vst [vmem:[%s409_s22 + $0x10] sm:$0xff] %v24817_v58  ;;  %24822 = vst [vmem:[%s409_s22 + $0x8] sm:$0xff] %v24816_v51 }
 0xb2b   : > { %28355 = shalt.err (!%p28352_p10)
}
 0xb2c   : > { %s28356_s16 = scalar_lea.hbm %s31482_s12, 384  ;;  %s28360_s21 = scalar_lea.hbm %s31544_s10, 768 }
 0xb2d   : > { %p28357_p12 = scmp.ne.s32.totalorder %s31482_s12, %s28356_s16  ;;  %p28361_p8 = scmp.lt.u32.totalorder %s31482_s12, %s31544_s10 }
 0xb2e   : > { %p28362_p11 = scmp.lt.u32.totalorder %s28360_s21, %s28356_s16  ;;  %p28364_p6 = scmp.lt.u32.totalorder %s28356_s16, %s31482_s12 }
 0xb2f   : > { %p28358_p1 = pnand %p28357_p12, %p31614_p9 }
 0xb30   : > { %p28363_p0 = por %p28362_p11, %p28361_p8 }
 0xb31   : > { %p28359_p3 = pneg %p28358_p1 }
 0xb32   : > { %p28365_p13 = por %p28364_p6, %p28363_p0 }
 0xb34   : > { %p28366_p2 = pnand %p28365_p13, %p28359_p3 }
 0xb36   : > { %28369 = shalt.err (!%p28366_p2)
}
 0xb37   : > { %s31617_s0 = smov 128  }
 0xb38   : > { %28205 = dma.vmem_to_hbm [thread:$0]  (%p31614_p9), %s31474_s29, 384, %s31482_s12, %s24830_s25, %s31617_s0, %s31617_s0, %s28446_s23  }
 0xb39 PF: > { %s24878_s11 = sand.u32 1, %s28408_s13   ;;  %p31618_p5 = scmp.ne.s32.totalorder %s31560_s28, 0 }
 0xb3a   : > { %p31619_p4 = scmp.ge.s32.totalorder %s28428_s18, 2  ;;  %s24879_s24 = scalar_lea.sflag [#allocation4], %s24878_s11 }
 0xb3c   : > { %p28213_p7 = pnand %p31619_p4, %p31618_p5 }
 0xb3e   : > { %28399 = dma.done.wait (!%p28213_p7), %s24879_s24, 384  }
 0xb3f   : > { %28401 = vsyncadd (!%p28213_p7), %s24879_s24, 4294966912  ;;  %s24888_s26 = scalar_lea.sflag [#allocation7], %s24878_s11 }
 0xb40   : > { %28403 = dma.done.wait (!%p28213_p7), %s24888_s26, 384  }
 0xb41   : > { %28405 = vsyncadd (!%p28213_p7), %s24888_s26, 4294966912  ;;  %s30_s18 = sadd.s32 1, %s28428_s18   ;;  %s31620_s16 = sld [smem:[#allocation11_spill]] }
 0xb42   : > { %p27_p10 = scmp.ge.s32.totalorder %s30_s18, 4   ;;  %s31621_s17 = sld [smem:[#allocation12_spill]] }
 0xb43   : > { %s31622_s13 = smov %s28412_s14  ;;  %s31623_s14 = smov %s28416_s15 }
 0xb44   : > { %s31624_s15 = smov %s28559_s27  ;;  %29 = sbr.rel (!%p27_p10) target bundleno = 10 (0xa), region = 118 }
 0xb4b   :  { %24893 = vsyncpa [#allocation3], 1 }
 0xb4c   :  { %24895 = vsyncpa [#allocation3 + $0x1], 1 }
 0xb4d   :  { %24896 = vsyncpa [#allocation4], 1 }
 0xb4e   :  { %24898 = vsyncpa [#allocation4 + $0x1], 1 }
 0xb4f   :  { %24899 = vsyncpa [#allocation7], 1 }
 0xb50   :  { %24901 = vsyncpa [#allocation7 + $0x1], 1 }

</bundles_post_ra>
